<compile_context>
chip_gen: v7x
topology: tpu7x:2x2x1
jax: 0.10.0
libtpu: 0.0.40
codegen_flags: <defaults>
</compile_context>

<pallas_src>
import functools

import jax
import jax.numpy as jnp
from jax.experimental import pallas as pl
from jax.experimental.pallas import tpu as pltpu

TAU_MEM_INV = 0.6   # LIFBoxParameters.tau_mem_inv (folded into scale/shift)
V_TH = 1.0          # LIFBoxParameters.v_th (norse default)
BN_EPS = 1e-5       # nn.BatchNorm2d default eps

# (name, ksize, stride, pad, apply_bn, apply_lif) -- static per-layer config.
LAYERS = (
    ("b0", 3, 1, 1, True, True),
    ("b1", 3, 2, 1, True, True),
    ("b2", 3, 2, 1, True, True),
    ("n0", 3, 1, 1, True, True),
    ("n1", 3, 1, 1, True, True),
    ("head", 1, 1, 0, False, False),
)


# ----------------------------- Pallas kernel ------------------------------- #
def _fused_matmul_kernel(p_ref, w_ref, scale_ref, shift_ref, o_ref, *, apply_lif):
    # p_ref:     (TM, K)   im2col patches, bf16
    # w_ref:     (K, TN)   conv weights as a matrix, bf16
    # scale_ref: (1, TN)   folded BN scale (* tau for LIF layers), f32
    # shift_ref: (1, TN)   folded BN shift + conv bias (* tau for LIF), f32
    acc = jnp.dot(p_ref[...], w_ref[...], preferred_element_type=jnp.float32)
    y = acc * scale_ref[...] + shift_ref[...]
    if apply_lif:
        # LIFBox single step from zero state (tau already folded): spike = y > v_th
        y = y > V_TH
    o_ref[...] = y.astype(o_ref.dtype)


def _round_up(x, m):
    return (x + m - 1) // m * m


def _pick_tiles(M, N):
    # Lane (N) tile: 128 when cleanly divisible (keeps wide layers lane-dense
    # and gives >=2 grid-N steps), otherwise the full dim -> no padding needed.
    tn = 128 if (N > 128 and N % 128 == 0) else N
    # Sublane (M) tile: cap at 128 (matches v5e MXU, fine on v6e/v7x).  If the
    # N axis only has one step, split M so both v7x TensorCores get work.
    tm = min(128, _round_up(M, 8))
    if N // tn == 1 and M >= 16:
        tm = min(tm, _round_up((M + 1) // 2, 8))
    Mp = _round_up(M, tm)
    return tm, tn, Mp


def fused_conv_matmul(patches, w_mat, scale, shift, *, apply_lif, out_dtype):
    """out = act((patches @ w_mat) * scale + shift), tiled over (M, N)."""
    M, K = patches.shape
    Kw, N = w_mat.shape
    assert K == Kw
    tm, tn, Mp = _pick_tiles(M, N)
    if Mp != M:  # never triggered for the shapes below (M is 8-aligned)
        patches = jnp.pad(patches, ((0, Mp - M), (0, 0)))

    out = pl.pallas_call(
        functools.partial(_fused_matmul_kernel, apply_lif=apply_lif),
        out_shape=jax.ShapeDtypeStruct((Mp, N), out_dtype),
        grid_spec=pltpu.PrefetchScalarGridSpec(
            num_scalar_prefetch=0,
            grid=(Mp // tm, N // tn),
            in_specs=[
                pl.BlockSpec((tm, K), lambda i, j: (i, 0)),
                pl.BlockSpec((K, tn), lambda i, j: (0, j)),
                pl.BlockSpec((1, tn), lambda i, j: (0, j)),
                pl.BlockSpec((1, tn), lambda i, j: (0, j)),
            ],
            out_specs=pl.BlockSpec((tm, tn), lambda i, j: (i, j)),
        ),
        compiler_params=pltpu.CompilerParams(
            dimension_semantics=("parallel", "parallel")),
    )(patches, w_mat, scale, shift)
    if Mp != M:
        out = out[:M]
    return out


# ------------------------------- glue (JAX) -------------------------------- #
def im2col(x, kh, kw, stride, pad):
    """x: (N, H, W, C) -> patches (N*Ho*Wo, kh*kw*C), Ho, Wo (keeps x's dtype)."""
    N, H, W, C = x.shape
    xp = jnp.pad(x, ((0, 0), (pad, pad), (pad, pad), (0, 0)))
    Ho = (H + 2 * pad - kh) // stride + 1
    Wo = (W + 2 * pad - kw) // stride + 1
    cols = [
        xp[:, i:i + stride * Ho:stride, j:j + stride * Wo:stride, :]
        for i in range(kh) for j in range(kw)
    ]
    patches = cols[0] if len(cols) == 1 else jnp.concatenate(cols, axis=-1)
    return patches.reshape(N * Ho * Wo, kh * kw * C), Ho, Wo


def fold_params(params):
    """One-time prep: BN fold, bias fold, tau fold, torch->matrix weight layout, bf16 cast."""
    folded = {}
    for name, _ksize, _stride, _pad, apply_bn, apply_lif in LAYERS:
        p = params[name]
        w, b = p["w"], p["b"]                       # w: (Cout, Cin, KH, KW), torch layout
        Cout, Cin, KH, KW = w.shape
        # row order must match the (i, j, c) concat order of im2col
        w_mat = jnp.transpose(w, (2, 3, 1, 0)).reshape(KH * KW * Cin, Cout)
        if apply_bn:
            inv_std = 1.0 / jnp.sqrt(p["running_var"] + BN_EPS)
            scale = p["gamma"] * inv_std
            shift = p["beta"] - p["running_mean"] * scale + scale * b
        else:
            scale = jnp.ones((Cout,), jnp.float32)
            shift = b
        if apply_lif:                               # fold the LIF membrane factor
            scale = TAU_MEM_INV * scale
            shift = TAU_MEM_INV * shift
        folded[name] = {
            "w_mat": w_mat.astype(jnp.bfloat16),
            "scale": scale.reshape(1, Cout).astype(jnp.float32),
            "shift": shift.reshape(1, Cout).astype(jnp.float32),
        }
    return folded


# --------------------------- parameter creation ----------------------------- #
def make_conv_bn_params(key, cin, cout, ksize, w_scale, with_bn=True):
    ks = jax.random.split(key, 7)
    p = {
        "w": w_scale * jax.random.normal(ks[0], (cout, cin, ksize, ksize), jnp.float32),
        "b": 0.05 * jax.random.normal(ks[1], (cout,), jnp.float32),
    }
    if with_bn:
        p["gamma"] = 1.0 + 0.1 * jax.random.normal(ks[2], (cout,), jnp.float32)
        p["beta"] = 0.05 * jax.random.normal(ks[3], (cout,), jnp.float32)
        p["running_mean"] = 0.05 * jax.random.normal(ks[4], (cout,), jnp.float32)
        p["running_var"] = 0.5 + jnp.abs(jax.random.normal(ks[5], (cout,), jnp.float32))
    return p


def init_yolo_simple_params(key, num_classes, num_anchors=3):
    keys = jax.random.split(key, 6)
    head_out = num_anchors * (5 + num_classes)
    return {
        # backbone
        "b0": make_conv_bn_params(keys[0], 3, 32, 3, 0.5),
        "b1": make_conv_bn_params(keys[1], 32, 64, 3, 0.25),
        "b2": make_conv_bn_params(keys[2], 64, 128, 3, 0.2),
        # neck
        "n0": make_conv_bn_params(keys[3], 128, 256, 3, 0.15),
        "n1": make_conv_bn_params(keys[4], 256, 128, 3, 0.1),
        # head (plain 1x1 conv, no BN, no LIF)
        "head": make_conv_bn_params(keys[5], 128, head_out, 1, 0.1, with_bn=False),
    }


# ------------------------------ forward pass -------------------------------- #
def yolo_simple_forward(folded, x_nchw):
    # NCHW -> NHWC once; cast to the MXU-native operand dtype.
    x = jnp.transpose(x_nchw, (0, 2, 3, 1)).astype(jnp.bfloat16)
    batch = x.shape[0]
    for name, ksize, stride, pad, _apply_bn, apply_lif in LAYERS:
        lp = folded[name]
        patches, Ho, Wo = im2col(x, ksize, ksize, stride, pad)
        # Spikes are exactly 0/1 -> store them in bf16 (halves inter-layer HBM
        # traffic and feeds the next matmul its native dtype); head stays f32.
        out_dtype = jnp.bfloat16 if apply_lif else jnp.float32
        y = fused_conv_matmul(patches, lp["w_mat"], lp["scale"], lp["shift"],
                              apply_lif=apply_lif, out_dtype=out_dtype)
        x = y.reshape(batch, Ho, Wo, lp["w_mat"].shape[1])
    return jnp.transpose(x, (0, 3, 1, 2))            # NHWC -> NCHW


if __name__ == "__main__":
    num_classes = 4
    num_anchors = 3

    key = jax.random.PRNGKey(0)
    k_param, k_input = jax.random.split(key)
    params = init_yolo_simple_params(k_param, num_classes, num_anchors)
    folded = fold_params(params)                     # one-time inference prep

    # small NCHW input: batch=2, channels=3 (RGB), spatial=16
    x = jax.random.normal(k_input, (2, 3, 16, 16), jnp.float32)

    fwd = jax.jit(yolo_simple_forward)
    out = jax.block_until_ready(fwd(folded, x))

    expected_shape = (2, num_anchors * (5 + num_classes), 4, 4)
    assert out.shape == expected_shape, (out.shape, expected_shape)
    assert out.dtype == jnp.float32
    assert bool(jnp.all(jnp.isfinite(out)))

    print("KERNEL_OK")
</pallas_src>

<mosaic_0001>
module attributes {stable_mosaic.version = 11 : i64} {
  func.func @_fused_matmul_kernel(%arg0: i32, %arg1: i32, %arg2: memref<128x27xbf16, #tpu.memory_space<vmem>>, %arg3: memref<27x32xbf16, #tpu.memory_space<vmem>>, %arg4: memref<1x32xf32, #tpu.memory_space<vmem>>, %arg5: memref<1x32xf32, #tpu.memory_space<vmem>>, %arg6: memref<128x32xbf16, #tpu.memory_space<vmem>>) attributes {dimension_semantics = [#tpu.dimension_semantics<parallel>, #tpu.dimension_semantics<parallel>], iteration_bounds = array<i64: 4, 1>, scalar_prefetch = 0 : i64, scratch_operands = 0 : i64, tpu.core_type = #tpu.core_type<tc>, window_params = [{transform_indices = @transform_0, window_bounds = array<i64: 128, 27>}, {transform_indices = @transform_1, window_bounds = array<i64: 27, 32>}, {transform_indices = @transform_2, window_bounds = array<i64: 1, 32>}, {transform_indices = @transform_3, window_bounds = array<i64: 1, 32>}, {transform_indices = @transform_4, window_bounds = array<i64: 128, 32>}]} {
    %c0 = arith.constant 0 : index
    %c0_0 = arith.constant 0 : index
    %0 = vector.load %arg2[%c0, %c0_0] : memref<128x27xbf16, #tpu.memory_space<vmem>>, vector<128x27xbf16>
    %c0_1 = arith.constant 0 : index
    %c0_2 = arith.constant 0 : index
    %1 = vector.load %arg3[%c0_1, %c0_2] : memref<27x32xbf16, #tpu.memory_space<vmem>>, vector<27x32xbf16>
    %cst = arith.constant dense<0.000000e+00> : vector<128x32xf32>
    %2 = tpu.matmul %0, %1, %cst {dimension_numbers = #tpu.dot_dimension_numbers<[1], [0], [0], [1], [0, 0, 1, 1], [], []>} : vector<128x27xbf16>, vector<27x32xbf16>, vector<128x32xf32> -> vector<128x32xf32>
    %c0_3 = arith.constant 0 : index
    %c0_4 = arith.constant 0 : index
    %3 = vector.load %arg4[%c0_3, %c0_4] : memref<1x32xf32, #tpu.memory_space<vmem>>, vector<1x32xf32>
    %4 = vector.broadcast %3 : vector<1x32xf32> to vector<128x32xf32>
    %5 = arith.mulf %2, %4 : vector<128x32xf32>
    %c0_5 = arith.constant 0 : index
    %c0_6 = arith.constant 0 : index
    %6 = vector.load %arg5[%c0_5, %c0_6] : memref<1x32xf32, #tpu.memory_space<vmem>>, vector<1x32xf32>
    %7 = vector.broadcast %6 : vector<1x32xf32> to vector<128x32xf32>
    %8 = arith.addf %5, %7 : vector<128x32xf32>
    %cst_7 = arith.constant 1.000000e+00 : f32
    %9 = vector.broadcast %cst_7 : f32 to vector<128x32xf32>
    %10 = arith.cmpf ogt, %8, %9 : vector<128x32xf32>
    %11 = arith.extui %10 : vector<128x32xi1> to vector<128x32xi32>
    %12 = arith.sitofp %11 : vector<128x32xi32> to vector<128x32xf32>
    %13 = arith.truncf %12 : vector<128x32xf32> to vector<128x32xbf16>
    %c0_8 = arith.constant 0 : index
    %c0_9 = arith.constant 0 : index
    %14 = vector.load %arg6[%c0_8, %c0_9] : memref<128x32xbf16, #tpu.memory_space<vmem>>, vector<128x32xbf16>
    tpu.vector_store %arg6[%c0_8, %c0_9], %13 {strides = array<i32>} : memref<128x32xbf16, #tpu.memory_space<vmem>>, vector<128x32xbf16>,
    return
  }
  func.func @transform_0(%arg0: i32, %arg1: i32) -> (i32, i32) {
    %c0_i32 = arith.constant 0 : i32
    %c0_i32_0 = arith.constant 0 : i32
    return %arg0, %c0_i32 : i32, i32
  }
  func.func @transform_1(%arg0: i32, %arg1: i32) -> (i32, i32) {
    %c0_i32 = arith.constant 0 : i32
    %c0_i32_0 = arith.constant 0 : i32
    return %c0_i32, %arg1 : i32, i32
  }
  func.func @transform_2(%arg0: i32, %arg1: i32) -> (i32, i32) {
    %c0_i32 = arith.constant 0 : i32
    %c0_i32_0 = arith.constant 0 : i32
    return %c0_i32, %arg1 : i32, i32
  }
  func.func @transform_3(%arg0: i32, %arg1: i32) -> (i32, i32) {
    %c0_i32 = arith.constant 0 : i32
    %c0_i32_0 = arith.constant 0 : i32
    return %c0_i32, %arg1 : i32, i32
  }
  func.func @transform_4(%arg0: i32, %arg1: i32) -> (i32, i32) {
    %c0_i32 = arith.constant 0 : i32
    return %arg0, %arg1 : i32, i32
  }
}

module attributes {stable_mosaic.version = 11 : i64} {
  func.func @_fused_matmul_kernel(%arg0: i32, %arg1: i32, %arg2: memref<64x288xbf16, #tpu.memory_space<vmem>>, %arg3: memref<288x64xbf16, #tpu.memory_space<vmem>>, %arg4: memref<1x64xf32, #tpu.memory_space<vmem>>, %arg5: memref<1x64xf32, #tpu.memory_space<vmem>>, %arg6: memref<64x64xbf16, #tpu.memory_space<vmem>>) attributes {dimension_semantics = [#tpu.dimension_semantics<parallel>, #tpu.dimension_semantics<parallel>], iteration_bounds = array<i64: 2, 1>, scalar_prefetch = 0 : i64, scratch_operands = 0 : i64, tpu.core_type = #tpu.core_type<tc>, window_params = [{transform_indices = @transform_0, window_bounds = array<i64: 64, 288>}, {transform_indices = @transform_1, window_bounds = array<i64: 288, 64>}, {transform_indices = @transform_2, window_bounds = array<i64: 1, 64>}, {transform_indices = @transform_3, window_bounds = array<i64: 1, 64>}, {transform_indices = @transform_4, window_bounds = array<i64: 64, 64>}]} {
    %c0 = arith.constant 0 : index
    %c0_0 = arith.constant 0 : index
    %0 = vector.load %arg2[%c0, %c0_0] : memref<64x288xbf16, #tpu.memory_space<vmem>>, vector<64x288xbf16>
    %c0_1 = arith.constant 0 : index
    %c0_2 = arith.constant 0 : index
    %1 = vector.load %arg3[%c0_1, %c0_2] : memref<288x64xbf16, #tpu.memory_space<vmem>>, vector<288x64xbf16>
    %cst = arith.constant dense<0.000000e+00> : vector<64x64xf32>
    %2 = tpu.matmul %0, %1, %cst {dimension_numbers = #tpu.dot_dimension_numbers<[1], [0], [0], [1], [0, 0, 1, 1], [], []>} : vector<64x288xbf16>, vector<288x64xbf16>, vector<64x64xf32> -> vector<64x64xf32>
    %c0_3 = arith.constant 0 : index
    %c0_4 = arith.constant 0 : index
    %3 = vector.load %arg4[%c0_3, %c0_4] : memref<1x64xf32, #tpu.memory_space<vmem>>, vector<1x64xf32>
    %4 = vector.broadcast %3 : vector<1x64xf32> to vector<64x64xf32>
    %5 = arith.mulf %2, %4 : vector<64x64xf32>
    %c0_5 = arith.constant 0 : index
    %c0_6 = arith.constant 0 : index
    %6 = vector.load %arg5[%c0_5, %c0_6] : memref<1x64xf32, #tpu.memory_space<vmem>>, vector<1x64xf32>
    %7 = vector.broadcast %6 : vector<1x64xf32> to vector<64x64xf32>
    %8 = arith.addf %5, %7 : vector<64x64xf32>
    %cst_7 = arith.constant 1.000000e+00 : f32
    %9 = vector.broadcast %cst_7 : f32 to vector<64x64xf32>
    %10 = arith.cmpf ogt, %8, %9 : vector<64x64xf32>
    %11 = arith.extui %10 : vector<64x64xi1> to vector<64x64xi32>
    %12 = arith.sitofp %11 : vector<64x64xi32> to vector<64x64xf32>
    %13 = arith.truncf %12 : vector<64x64xf32> to vector<64x64xbf16>
    %c0_8 = arith.constant 0 : index
    %c0_9 = arith.constant 0 : index
    %14 = vector.load %arg6[%c0_8, %c0_9] : memref<64x64xbf16, #tpu.memory_space<vmem>>, vector<64x64xbf16>
    tpu.vector_store %arg6[%c0_8, %c0_9], %13 {strides = array<i32>} : memref<64x64xbf16, #tpu.memory_space<vmem>>, vector<64x64xbf16>,
    return
  }
  func.func @transform_0(%arg0: i32, %arg1: i32) -> (i32, i32) {
    %c0_i32 = arith.constant 0 : i32
    %c0_i32_0 = arith.constant 0 : i32
    return %arg0, %c0_i32 : i32, i32
  }
  func.func @transform_1(%arg0: i32, %arg1: i32) -> (i32, i32) {
    %c0_i32 = arith.constant 0 : i32
    %c0_i32_0 = arith.constant 0 : i32
    return %c0_i32, %arg1 : i32, i32
  }
  func.func @transform_2(%arg0: i32, %arg1: i32) -> (i32, i32) {
    %c0_i32 = arith.constant 0 : i32
    %c0_i32_0 = arith.constant 0 : i32
    return %c0_i32, %arg1 : i32, i32
  }
  func.func @transform_3(%arg0: i32, %arg1: i32) -> (i32, i32) {
    %c0_i32 = arith.constant 0 : i32
    %c0_i32_0 = arith.constant 0 : i32
    return %c0_i32, %arg1 : i32, i32
  }
  func.func @transform_4(%arg0: i32, %arg1: i32) -> (i32, i32) {
    %c0_i32 = arith.constant 0 : i32
    return %arg0, %arg1 : i32, i32
  }
}

module attributes {stable_mosaic.version = 11 : i64} {
  func.func @_fused_matmul_kernel(%arg0: i32, %arg1: i32, %arg2: memref<16x576xbf16, #tpu.memory_space<vmem>>, %arg3: memref<576x128xbf16, #tpu.memory_space<vmem>>, %arg4: memref<1x128xf32, #tpu.memory_space<vmem>>, %arg5: memref<1x128xf32, #tpu.memory_space<vmem>>, %arg6: memref<16x128xbf16, #tpu.memory_space<vmem>>) attributes {dimension_semantics = [#tpu.dimension_semantics<parallel>, #tpu.dimension_semantics<parallel>], iteration_bounds = array<i64: 2, 1>, scalar_prefetch = 0 : i64, scratch_operands = 0 : i64, tpu.core_type = #tpu.core_type<tc>, window_params = [{transform_indices = @transform_0, window_bounds = array<i64: 16, 576>}, {transform_indices = @transform_1, window_bounds = array<i64: 576, 128>}, {transform_indices = @transform_2, window_bounds = array<i64: 1, 128>}, {transform_indices = @transform_3, window_bounds = array<i64: 1, 128>}, {transform_indices = @transform_4, window_bounds = array<i64: 16, 128>}]} {
    %c0 = arith.constant 0 : index
    %c0_0 = arith.constant 0 : index
    %0 = vector.load %arg2[%c0, %c0_0] : memref<16x576xbf16, #tpu.memory_space<vmem>>, vector<16x576xbf16>
    %c0_1 = arith.constant 0 : index
    %c0_2 = arith.constant 0 : index
    %1 = vector.load %arg3[%c0_1, %c0_2] : memref<576x128xbf16, #tpu.memory_space<vmem>>, vector<576x128xbf16>
    %cst = arith.constant dense<0.000000e+00> : vector<16x128xf32>
    %2 = tpu.matmul %0, %1, %cst {dimension_numbers = #tpu.dot_dimension_numbers<[1], [0], [0], [1], [0, 0, 1, 1], [], []>} : vector<16x576xbf16>, vector<576x128xbf16>, vector<16x128xf32> -> vector<16x128xf32>
    %c0_3 = arith.constant 0 : index
    %c0_4 = arith.constant 0 : index
    %3 = vector.load %arg4[%c0_3, %c0_4] : memref<1x128xf32, #tpu.memory_space<vmem>>, vector<1x128xf32>
    %4 = vector.broadcast %3 : vector<1x128xf32> to vector<16x128xf32>
    %5 = arith.mulf %2, %4 : vector<16x128xf32>
    %c0_5 = arith.constant 0 : index
    %c0_6 = arith.constant 0 : index
    %6 = vector.load %arg5[%c0_5, %c0_6] : memref<1x128xf32, #tpu.memory_space<vmem>>, vector<1x128xf32>
    %7 = vector.broadcast %6 : vector<1x128xf32> to vector<16x128xf32>
    %8 = arith.addf %5, %7 : vector<16x128xf32>
    %cst_7 = arith.constant 1.000000e+00 : f32
    %9 = vector.broadcast %cst_7 : f32 to vector<16x128xf32>
    %10 = arith.cmpf ogt, %8, %9 : vector<16x128xf32>
    %11 = arith.extui %10 : vector<16x128xi1> to vector<16x128xi32>
    %12 = arith.sitofp %11 : vector<16x128xi32> to vector<16x128xf32>
    %13 = arith.truncf %12 : vector<16x128xf32> to vector<16x128xbf16>
    %c0_8 = arith.constant 0 : index
    %c0_9 = arith.constant 0 : index
    %14 = vector.load %arg6[%c0_8, %c0_9] : memref<16x128xbf16, #tpu.memory_space<vmem>>, vector<16x128xbf16>
    tpu.vector_store %arg6[%c0_8, %c0_9], %13 {strides = array<i32>} : memref<16x128xbf16, #tpu.memory_space<vmem>>, vector<16x128xbf16>,
    return
  }
  func.func @transform_0(%arg0: i32, %arg1: i32) -> (i32, i32) {
    %c0_i32 = arith.constant 0 : i32
    %c0_i32_0 = arith.constant 0 : i32
    return %arg0, %c0_i32 : i32, i32
  }
  func.func @transform_1(%arg0: i32, %arg1: i32) -> (i32, i32) {
    %c0_i32 = arith.constant 0 : i32
    %c0_i32_0 = arith.constant 0 : i32
    return %c0_i32, %arg1 : i32, i32
  }
  func.func @transform_2(%arg0: i32, %arg1: i32) -> (i32, i32) {
    %c0_i32 = arith.constant 0 : i32
    %c0_i32_0 = arith.constant 0 : i32
    return %c0_i32, %arg1 : i32, i32
  }
  func.func @transform_3(%arg0: i32, %arg1: i32) -> (i32, i32) {
    %c0_i32 = arith.constant 0 : i32
    %c0_i32_0 = arith.constant 0 : i32
    return %c0_i32, %arg1 : i32, i32
  }
  func.func @transform_4(%arg0: i32, %arg1: i32) -> (i32, i32) {
    %c0_i32 = arith.constant 0 : i32
    return %arg0, %arg1 : i32, i32
  }
}

module attributes {stable_mosaic.version = 11 : i64} {
  func.func @_fused_matmul_kernel(%arg0: i32, %arg1: i32, %arg2: memref<32x1152xbf16, #tpu.memory_space<vmem>>, %arg3: memref<1152x128xbf16, #tpu.memory_space<vmem>>, %arg4: memref<1x128xf32, #tpu.memory_space<vmem>>, %arg5: memref<1x128xf32, #tpu.memory_space<vmem>>, %arg6: memref<32x128xbf16, #tpu.memory_space<vmem>>) attributes {dimension_semantics = [#tpu.dimension_semantics<parallel>, #tpu.dimension_semantics<parallel>], iteration_bounds = array<i64: 1, 2>, scalar_prefetch = 0 : i64, scratch_operands = 0 : i64, tpu.core_type = #tpu.core_type<tc>, window_params = [{transform_indices = @transform_0, window_bounds = array<i64: 32, 1152>}, {transform_indices = @transform_1, window_bounds = array<i64: 1152, 128>}, {transform_indices = @transform_2, window_bounds = array<i64: 1, 128>}, {transform_indices = @transform_3, window_bounds = array<i64: 1, 128>}, {transform_indices = @transform_4, window_bounds = array<i64: 32, 128>}]} {
    %c0 = arith.constant 0 : index
    %c0_0 = arith.constant 0 : index
    %0 = vector.load %arg2[%c0, %c0_0] : memref<32x1152xbf16, #tpu.memory_space<vmem>>, vector<32x1152xbf16>
    %c0_1 = arith.constant 0 : index
    %c0_2 = arith.constant 0 : index
    %1 = vector.load %arg3[%c0_1, %c0_2] : memref<1152x128xbf16, #tpu.memory_space<vmem>>, vector<1152x128xbf16>
    %cst = arith.constant dense<0.000000e+00> : vector<32x128xf32>
    %2 = tpu.matmul %0, %1, %cst {dimension_numbers = #tpu.dot_dimension_numbers<[1], [0], [0], [1], [0, 0, 1, 1], [], []>} : vector<32x1152xbf16>, vector<1152x128xbf16>, vector<32x128xf32> -> vector<32x128xf32>
    %c0_3 = arith.constant 0 : index
    %c0_4 = arith.constant 0 : index
    %3 = vector.load %arg4[%c0_3, %c0_4] : memref<1x128xf32, #tpu.memory_space<vmem>>, vector<1x128xf32>
    %4 = vector.broadcast %3 : vector<1x128xf32> to vector<32x128xf32>
    %5 = arith.mulf %2, %4 : vector<32x128xf32>
    %c0_5 = arith.constant 0 : index
    %c0_6 = arith.constant 0 : index
    %6 = vector.load %arg5[%c0_5, %c0_6] : memref<1x128xf32, #tpu.memory_space<vmem>>, vector<1x128xf32>
    %7 = vector.broadcast %6 : vector<1x128xf32> to vector<32x128xf32>
    %8 = arith.addf %5, %7 : vector<32x128xf32>
    %cst_7 = arith.constant 1.000000e+00 : f32
    %9 = vector.broadcast %cst_7 : f32 to vector<32x128xf32>
    %10 = arith.cmpf ogt, %8, %9 : vector<32x128xf32>
    %11 = arith.extui %10 : vector<32x128xi1> to vector<32x128xi32>
    %12 = arith.sitofp %11 : vector<32x128xi32> to vector<32x128xf32>
    %13 = arith.truncf %12 : vector<32x128xf32> to vector<32x128xbf16>
    %c0_8 = arith.constant 0 : index
    %c0_9 = arith.constant 0 : index
    %14 = vector.load %arg6[%c0_8, %c0_9] : memref<32x128xbf16, #tpu.memory_space<vmem>>, vector<32x128xbf16>
    tpu.vector_store %arg6[%c0_8, %c0_9], %13 {strides = array<i32>} : memref<32x128xbf16, #tpu.memory_space<vmem>>, vector<32x128xbf16>,
    return
  }
  func.func @transform_0(%arg0: i32, %arg1: i32) -> (i32, i32) {
    %c0_i32 = arith.constant 0 : i32
    %c0_i32_0 = arith.constant 0 : i32
    return %arg0, %c0_i32 : i32, i32
  }
  func.func @transform_1(%arg0: i32, %arg1: i32) -> (i32, i32) {
    %c0_i32 = arith.constant 0 : i32
    %c0_i32_0 = arith.constant 0 : i32
    return %c0_i32, %arg1 : i32, i32
  }
  func.func @transform_2(%arg0: i32, %arg1: i32) -> (i32, i32) {
    %c0_i32 = arith.constant 0 : i32
    %c0_i32_0 = arith.constant 0 : i32
    return %c0_i32, %arg1 : i32, i32
  }
  func.func @transform_3(%arg0: i32, %arg1: i32) -> (i32, i32) {
    %c0_i32 = arith.constant 0 : i32
    %c0_i32_0 = arith.constant 0 : i32
    return %c0_i32, %arg1 : i32, i32
  }
  func.func @transform_4(%arg0: i32, %arg1: i32) -> (i32, i32) {
    %c0_i32 = arith.constant 0 : i32
    return %arg0, %arg1 : i32, i32
  }
}

module attributes {stable_mosaic.version = 11 : i64} {
  func.func @_fused_matmul_kernel(%arg0: i32, %arg1: i32, %arg2: memref<16x128xbf16, #tpu.memory_space<vmem>>, %arg3: memref<128x27xbf16, #tpu.memory_space<vmem>>, %arg4: memref<1x27xf32, #tpu.memory_space<vmem>>, %arg5: memref<1x27xf32, #tpu.memory_space<vmem>>, %arg6: memref<16x27xf32, #tpu.memory_space<vmem>>) attributes {dimension_semantics = [#tpu.dimension_semantics<parallel>, #tpu.dimension_semantics<parallel>], iteration_bounds = array<i64: 2, 1>, scalar_prefetch = 0 : i64, scratch_operands = 0 : i64, tpu.core_type = #tpu.core_type<tc>, window_params = [{transform_indices = @transform_0, window_bounds = array<i64: 16, 128>}, {transform_indices = @transform_1, window_bounds = array<i64: 128, 27>}, {transform_indices = @transform_2, window_bounds = array<i64: 1, 27>}, {transform_indices = @transform_3, window_bounds = array<i64: 1, 27>}, {transform_indices = @transform_4, window_bounds = array<i64: 16, 27>}]} {
    %c0 = arith.constant 0 : index
    %c0_0 = arith.constant 0 : index
    %0 = vector.load %arg2[%c0, %c0_0] : memref<16x128xbf16, #tpu.memory_space<vmem>>, vector<16x128xbf16>
    %c0_1 = arith.constant 0 : index
    %c0_2 = arith.constant 0 : index
    %1 = vector.load %arg3[%c0_1, %c0_2] : memref<128x27xbf16, #tpu.memory_space<vmem>>, vector<128x27xbf16>
    %cst = arith.constant dense<0.000000e+00> : vector<16x27xf32>
    %2 = tpu.matmul %0, %1, %cst {dimension_numbers = #tpu.dot_dimension_numbers<[1], [0], [0], [1], [0, 0, 1, 1], [], []>} : vector<16x128xbf16>, vector<128x27xbf16>, vector<16x27xf32> -> vector<16x27xf32>
    %c0_3 = arith.constant 0 : index
    %c0_4 = arith.constant 0 : index
    %3 = vector.load %arg4[%c0_3, %c0_4] : memref<1x27xf32, #tpu.memory_space<vmem>>, vector<1x27xf32>
    %4 = vector.broadcast %3 : vector<1x27xf32> to vector<16x27xf32>
    %5 = arith.mulf %2, %4 : vector<16x27xf32>
    %c0_5 = arith.constant 0 : index
    %c0_6 = arith.constant 0 : index
    %6 = vector.load %arg5[%c0_5, %c0_6] : memref<1x27xf32, #tpu.memory_space<vmem>>, vector<1x27xf32>
    %7 = vector.broadcast %6 : vector<1x27xf32> to vector<16x27xf32>
    %8 = arith.addf %5, %7 : vector<16x27xf32>
    %c0_7 = arith.constant 0 : index
    %c0_8 = arith.constant 0 : index
    %9 = vector.load %arg6[%c0_7, %c0_8] : memref<16x27xf32, #tpu.memory_space<vmem>>, vector<16x27xf32>
    tpu.vector_store %arg6[%c0_7, %c0_8], %8 {strides = array<i32>} : memref<16x27xf32, #tpu.memory_space<vmem>>, vector<16x27xf32>,
    return
  }
  func.func @transform_0(%arg0: i32, %arg1: i32) -> (i32, i32) {
    %c0_i32 = arith.constant 0 : i32
    %c0_i32_0 = arith.constant 0 : i32
    return %arg0, %c0_i32 : i32, i32
  }
  func.func @transform_1(%arg0: i32, %arg1: i32) -> (i32, i32) {
    %c0_i32 = arith.constant 0 : i32
    %c0_i32_0 = arith.constant 0 : i32
    return %c0_i32, %arg1 : i32, i32
  }
  func.func @transform_2(%arg0: i32, %arg1: i32) -> (i32, i32) {
    %c0_i32 = arith.constant 0 : i32
    %c0_i32_0 = arith.constant 0 : i32
    return %c0_i32, %arg1 : i32, i32
  }
  func.func @transform_3(%arg0: i32, %arg1: i32) -> (i32, i32) {
    %c0_i32 = arith.constant 0 : i32
    %c0_i32_0 = arith.constant 0 : i32
    return %c0_i32, %arg1 : i32, i32
  }
  func.func @transform_4(%arg0: i32, %arg1: i32) -> (i32, i32) {
    %c0_i32 = arith.constant 0 : i32
    return %arg0, %arg1 : i32, i32
  }
}

module attributes {stable_mosaic.version = 11 : i64} {
  func.func @_fused_matmul_kernel(%arg0: i32, %arg1: i32, %arg2: memref<16x2304xbf16, #tpu.memory_space<vmem>>, %arg3: memref<2304x128xbf16, #tpu.memory_space<vmem>>, %arg4: memref<1x128xf32, #tpu.memory_space<vmem>>, %arg5: memref<1x128xf32, #tpu.memory_space<vmem>>, %arg6: memref<16x128xbf16, #tpu.memory_space<vmem>>) attributes {dimension_semantics = [#tpu.dimension_semantics<parallel>, #tpu.dimension_semantics<parallel>], iteration_bounds = array<i64: 2, 1>, scalar_prefetch = 0 : i64, scratch_operands = 0 : i64, tpu.core_type = #tpu.core_type<tc>, window_params = [{transform_indices = @transform_0, window_bounds = array<i64: 16, 2304>}, {transform_indices = @transform_1, window_bounds = array<i64: 2304, 128>}, {transform_indices = @transform_2, window_bounds = array<i64: 1, 128>}, {transform_indices = @transform_3, window_bounds = array<i64: 1, 128>}, {transform_indices = @transform_4, window_bounds = array<i64: 16, 128>}]} {
    %c0 = arith.constant 0 : index
    %c0_0 = arith.constant 0 : index
    %0 = vector.load %arg2[%c0, %c0_0] : memref<16x2304xbf16, #tpu.memory_space<vmem>>, vector<16x2304xbf16>
    %c0_1 = arith.constant 0 : index
    %c0_2 = arith.constant 0 : index
    %1 = vector.load %arg3[%c0_1, %c0_2] : memref<2304x128xbf16, #tpu.memory_space<vmem>>, vector<2304x128xbf16>
    %cst = arith.constant dense<0.000000e+00> : vector<16x128xf32>
    %2 = tpu.matmul %0, %1, %cst {dimension_numbers = #tpu.dot_dimension_numbers<[1], [0], [0], [1], [0, 0, 1, 1], [], []>} : vector<16x2304xbf16>, vector<2304x128xbf16>, vector<16x128xf32> -> vector<16x128xf32>
    %c0_3 = arith.constant 0 : index
    %c0_4 = arith.constant 0 : index
    %3 = vector.load %arg4[%c0_3, %c0_4] : memref<1x128xf32, #tpu.memory_space<vmem>>, vector<1x128xf32>
    %4 = vector.broadcast %3 : vector<1x128xf32> to vector<16x128xf32>
    %5 = arith.mulf %2, %4 : vector<16x128xf32>
    %c0_5 = arith.constant 0 : index
    %c0_6 = arith.constant 0 : index
    %6 = vector.load %arg5[%c0_5, %c0_6] : memref<1x128xf32, #tpu.memory_space<vmem>>, vector<1x128xf32>
    %7 = vector.broadcast %6 : vector<1x128xf32> to vector<16x128xf32>
    %8 = arith.addf %5, %7 : vector<16x128xf32>
    %cst_7 = arith.constant 1.000000e+00 : f32
    %9 = vector.broadcast %cst_7 : f32 to vector<16x128xf32>
    %10 = arith.cmpf ogt, %8, %9 : vector<16x128xf32>
    %11 = arith.extui %10 : vector<16x128xi1> to vector<16x128xi32>
    %12 = arith.sitofp %11 : vector<16x128xi32> to vector<16x128xf32>
    %13 = arith.truncf %12 : vector<16x128xf32> to vector<16x128xbf16>
    %c0_8 = arith.constant 0 : index
    %c0_9 = arith.constant 0 : index
    %14 = vector.load %arg6[%c0_8, %c0_9] : memref<16x128xbf16, #tpu.memory_space<vmem>>, vector<16x128xbf16>
    tpu.vector_store %arg6[%c0_8, %c0_9], %13 {strides = array<i32>} : memref<16x128xbf16, #tpu.memory_space<vmem>>, vector<16x128xbf16>,
    return
  }
  func.func @transform_0(%arg0: i32, %arg1: i32) -> (i32, i32) {
    %c0_i32 = arith.constant 0 : i32
    %c0_i32_0 = arith.constant 0 : i32
    return %arg0, %c0_i32 : i32, i32
  }
  func.func @transform_1(%arg0: i32, %arg1: i32) -> (i32, i32) {
    %c0_i32 = arith.constant 0 : i32
    %c0_i32_0 = arith.constant 0 : i32
    return %c0_i32, %arg1 : i32, i32
  }
  func.func @transform_2(%arg0: i32, %arg1: i32) -> (i32, i32) {
    %c0_i32 = arith.constant 0 : i32
    %c0_i32_0 = arith.constant 0 : i32
    return %c0_i32, %arg1 : i32, i32
  }
  func.func @transform_3(%arg0: i32, %arg1: i32) -> (i32, i32) {
    %c0_i32 = arith.constant 0 : i32
    %c0_i32_0 = arith.constant 0 : i32
    return %c0_i32, %arg1 : i32, i32
  }
  func.func @transform_4(%arg0: i32, %arg1: i32) -> (i32, i32) {
    %c0_i32 = arith.constant 0 : i32
    return %arg0, %arg1 : i32, i32
  }
}

</mosaic_0001>

<bundles_post_ra>
// kernel: yolo_simple_forward.6
= control target key start
LH: loop header
LB: loop body
LE: loop exit
PB: predicated region body
PF: predicated region fallthrough
CT: control target
= control target key end

     0   :  { %s959_s15 = smov 0   ;;  %s961_s16 = smov 0   ;;  %s1105_s0 = inlined_call_operand.vmem [shape: bf16[512,27], index: 0, kind: input, shape index: {}]   ;;  %s1106_s1 = inlined_call_operand.vmem [shape: bf16[27,32], index: 1, kind: input, shape index: {}]   ;;  %s1107_s2 = inlined_call_operand.vmem [shape: f32[1,32], index: 2, kind: input, shape index: {}]   ;;  %s1108_s3 = inlined_call_operand.vmem [shape: f32[1,32], index: 3, kind: input, shape index: {}]   ;;  %s1109_s4 = inlined_call_operand.vmem [shape: bf16[512,32], index: 4, kind: output, shape index: {}]  }
   0x1   :  { %s963_s17 = smov 0  }
   0x2 LB: > { %s26_s18 = sadd.s32 1, %s926_s16  ;;  %p763_p0 = scmp.ge.s32.totalorder %s930_s17, 1  ;;  %s930_s17 = sphi %s963_s17, %s14_s17   ;;  %s926_s16 = sphi %s961_s16, %s1111_s16   ;;  %s922_s15 = sphi %s959_s15, %s1110_s15  }
   0x3   : > { %p28_p1 = scmp.ge.s32.totalorder %s26_s18, 4  ;;  %p202_p2 = scmp.lt.s32.totalorder %s930_s17, 5 }
   0x5   : > { %s1113_s18 = smov (%p28_p1, %s26_s18), 0  ;;  %p203_p3 = pnand %p763_p0, %p202_p2 }
   0x6   : > { %v898_v0 = vld [vmem:[%s1106_s1] sm:$0xff] (!%p203_p3)   ;;  %vm363_vm0 = vcmask (!%p203_p3), 1044480   ;;  %v899_v1 = vld [vmem:[%s1106_s1 + $0x8] sm:$0x3f] (!%p203_p3)   ;;  %vm364_vm1 = vcmask (!%p203_p3), 1045504   ;;  %s764_s23 = sshll.u32 (!%p203_p3), %s922_s15, 4 }
   0x7   : > { %206 = sbr.rel (%p203_p3) target bundleno = 257 (0x101), region = 36  ;;  %848 = vmatprep.subr.bf16.mxu0 (!%p203_p3), %v898_v0  ;;  %868 = vmatprep.subr.bf16.mxu1 (!%p203_p3), %v898_v0  ;;  %v932_v2 = vmov (!%p203_p3), 65535   ;;  %p242_p4 = scmp.lt.s32.totalorder (!%p203_p3), %s764_s23, 63  ;;  %vm338_vm2 = vcmask (!%p203_p3), 220160   ;;  %v1002_v14 = vld [vmem:[%s1107_s2] ss:$0 sm:$0xff] (!%p203_p3) }
   0x8   : > { %849 = vmatpush3.bf16.msra.mxu0 (!%p203_p3), %v898_v0  ;;  %870 = vmatpush3.bf16.msra.mxu1 (!%p203_p3), %v898_v0  ;;  %v365_v3 = vsel (!%p203_p3), %vm363_vm0, 4294967295, %v932_v2  ;;  %v1007_v16 = vld [vmem:[%s1108_s3] ss:$0 sm:$0xff] (!%p203_p3)  ;;  %vm625_vm3 = vcmask (!%p203_p3), 257024   ;;  %v933_v37 = vmov (!%p203_p3), 0.0  }
   0x9   : > { %v366_v4 = vsel (!%p203_p3), %vm364_vm1, %v365_v3, 0 }
   0xa   : > { %v368_v5 = vand.u32 (!%p203_p3), %v899_v1, %v366_v4 }
   0xc   : > { %850 = vmatprep.subr.bf16.mxu0 (!%p203_p3), %v368_v5  ;;  %869 = vmatprep.subr.bf16.mxu1 (!%p203_p3), %v368_v5 }
   0xd   : > { %851 = vmatpush3.bf16.msra.mxu0 (!%p203_p3), %v368_v5  ;;  %871 = vmatpush3.bf16.msra.mxu1 (!%p203_p3), %v368_v5 }
   0xe   : > { %s1115_s23 = smov (!%p242_p4, %s764_s23), 63 }
   0xf   : > { %s765_s24 = sshll.u32 %s1115_s23, 2 }
  0x10   : > { %s245_s27 = scalar_lea.vmem %s1105_s0, %s765_s24  ;;  %s1027_s8 = scalar_lea.vmem %s1109_s4, %s765_s24 }
  0x11   : > { %v900_v6 = vld [vmem:[%s245_s27] sm:$0xff]   ;;  %v902_v8 = vld [vmem:[%s245_s27 + $0x8] sm:$0xff]   ;;  %v904_v10 = vld [vmem:[%s245_s27 + $0x10] sm:$0xff]  }
  0x12   : > { %v901_v7 = vld [vmem:[%s245_s27 + $0x20] sm:$0xff]   ;;  %852 = vmatprep.mubr.msk.bf16.mxu0 %vm338_vm2, %v900_v6  ;;  %v903_v9 = vld [vmem:[%s245_s27 + $0x28] sm:$0xff]   ;;  %v905_v11 = vld [vmem:[%s245_s27 + $0x30] sm:$0xff]  }
  0x13   : > { %860 = vmatprep.mubr.msk.bf16.mxu1 %vm338_vm2, %v901_v7  ;;  %853 = vmatmul.mubr.msk.bf16.vlgmr.msra.gmra.mrb[0].mxu0 %vm338_vm2, %v902_v8  ;;  %v906_v12 = vld [vmem:[%s245_s27 + $0x18] sm:$0xff]  }
  0x14   : > { %861 = vmatmul.mubr.msk.bf16.vlgmr.msra.gmra.mrb[0].mxu1 %vm338_vm2, %v903_v9  ;;  %856 = vmatprep.mubr.msk.bf16.mxu0 %vm338_vm2, %v904_v10  ;;  %v907_v13 = vld [vmem:[%s245_s27 + $0x38] sm:$0xff]  }
  0x15   : > { %864 = vmatprep.mubr.msk.bf16.mxu1 %vm338_vm2, %v905_v11 }
  0x1b   : > { %857 = vmatmul.mubr.msk.bf16.gmra.mrb[4].mxu0 %vm338_vm2, %v906_v12 }
  0x1c   : > { %865 = vmatmul.mubr.msk.bf16.gmra.mrb[4].mxu1 %vm338_vm2, %v907_v13 }
  0xe6   : > { %v854_v15 = vpop.f32.mrb[0].mxu0 }
  0xe7   : > { %v476_v17 = vmul.f32 %v854_v15, %v1002_v14  ;;  %v862_v18 = vpop.f32.mrb[0].mxu1  ;;  %v404_v19 = vpop.f32.mrb[1].mxu0 }
  0xe8   : > { %v484_v20 = vmul.f32 %v862_v18, %v1002_v14  ;;  %v474_v21 = vmul.f32 %v1002_v14, %v404_v19  ;;  %v436_v22 = vpop.f32.mrb[1].mxu1  ;;  %v855_v23 = vpop.f32.mrb[2].mxu0 }
  0xe9   : > { %v499_v24 = vadd.f32 %v1007_v16, %v476_v17  ;;  %v482_v25 = vmul.f32 %v1002_v14, %v436_v22  ;;  %v477_v26 = vmul.f32 %v855_v23, %v1002_v14  ;;  %v863_v27 = vpop.f32.mrb[2].mxu1  ;;  %v407_v28 = vpop.f32.mrb[3].mxu0 }
  0xea   : > { %v507_v29 = vadd.f32 %v1007_v16, %v484_v20  ;;  %v497_v30 = vadd.f32 %v1007_v16, %v474_v21  ;;  %v485_v31 = vmul.f32 %v863_v27, %v1002_v14  ;;  %v475_v32 = vmul.f32 %v1002_v14, %v407_v28  ;;  %v439_v33 = vpop.f32.mrb[3].mxu1 }
  0xeb   : > { %vm515_vm4 = vcmp.gt.f32.partialorder %v499_v24, 1.0  ;;  %v505_v34 = vadd.f32 %v1007_v16, %v482_v25  ;;  %v500_v35 = vadd.f32 %v1007_v16, %v477_v26  ;;  %v483_v36 = vmul.f32 %v1002_v14, %v439_v33 }
  0xec   : > { %v790_v38 = vsel %vm515_vm4, 1.0, %v933_v37  ;;  %vm523_vm5 = vcmp.gt.f32.partialorder %v507_v29, 1.0  ;;  %vm513_vm6 = vcmp.gt.f32.partialorder %v497_v30, 1.0  ;;  %v508_v39 = vadd.f32 %v1007_v16, %v485_v31 }
  0xed   : > { %v824_v40 = vpack.c.bf16 %v790_v38, %v790_v38  ;;  %v798_v41 = vsel %vm523_vm5, 1.0, %v933_v37  ;;  %v788_v42 = vsel %vm513_vm6, 1.0, %v933_v37  ;;  %vm521_vm7 = vcmp.gt.f32.partialorder %v505_v34, 1.0 }
  0xee   : > { %v832_v43 = vpack.c.bf16 %v798_v41, %v798_v41  ;;  %v822_v44 = vpack.c.bf16 %v788_v42, %v788_v42  ;;  %v796_v45 = vsel %vm521_vm7, 1.0, %v933_v37  ;;  %vm516_vm8 = vcmp.gt.f32.partialorder %v500_v35, 1.0  ;;  %v858_v46 = vpop.f32.mrb[4].mxu0 }
  0xef   : > { %628 = vst.msk [vmem:[%s1027_s8 + $0x8] sm:$0xf] %vm625_vm3, %v824_v40  ;;  %v830_v47 = vpack.c.bf16 %v796_v45, %v796_v45  ;;  %v791_v48 = vsel %vm516_vm8, 1.0, %v933_v37  ;;  %vm524_vm9 = vcmp.gt.f32.partialorder %v508_v39, 1.0  ;;  %v498_v49 = vadd.f32 %v1007_v16, %v475_v32  ;;  %v866_v50 = vpop.f32.mrb[4].mxu1  ;;  %v420_v51 = vpop.f32.mrb[5].mxu0 }
  0xf0   : > { %636 = vst.msk [vmem:[%s1027_s8 + $0x28] sm:$0xf] %vm625_vm3, %v832_v43  ;;  %626 = vst.msk [vmem:[%s1027_s8] sm:$0xf] %vm625_vm3, %v822_v44  ;;  %v825_v52 = vpack.c.bf16 %v791_v48, %v791_v48  ;;  %v799_v53 = vsel %vm524_vm9, 1.0, %v933_v37  ;;  %v506_v54 = vadd.f32 %v1007_v16, %v483_v36  ;;  %v480_v55 = vmul.f32 %v858_v46, %v1002_v14  ;;  %v452_v56 = vpop.f32.mrb[5].mxu1 }
  0xf1   : > { %v859_v57 = vpop.f32.mrb[6].mxu0  ;;  %634 = vst.msk [vmem:[%s1027_s8 + $0x20] sm:$0xf] %vm625_vm3, %v830_v47  ;;  %v833_v58 = vpack.c.bf16 %v799_v53, %v799_v53  ;;  %vm514_vm10 = vcmp.gt.f32.partialorder %v498_v49, 1.0  ;;  %v488_v59 = vmul.f32 %v866_v50, %v1002_v14  ;;  %v478_v60 = vmul.f32 %v1002_v14, %v420_v51  ;;  %v867_v61 = vpop.f32.mrb[6].mxu1 }
  0xf2   : > { %v423_v62 = vpop.f32.mrb[7].mxu0  ;;  %629 = vst.msk [vmem:[%s1027_s8 + $0xc] sm:$0xf] %vm625_vm3, %v825_v52  ;;  %v789_v63 = vsel %vm514_vm10, 1.0, %v933_v37  ;;  %vm522_vm11 = vcmp.gt.f32.partialorder %v506_v54, 1.0  ;;  %v503_v0 = vadd.f32 %v1007_v16, %v480_v55  ;;  %v486_v1 = vmul.f32 %v1002_v14, %v452_v56  ;;  %v455_v2 = vpop.f32.mrb[7].mxu1 }
  0xf3   : > { %637 = vst.msk [vmem:[%s1027_s8 + $0x2c] sm:$0xf] %vm625_vm3, %v833_v58  ;;  %v823_v3 = vpack.c.bf16 %v789_v63, %v789_v63  ;;  %v797_v4 = vsel %vm522_vm11, 1.0, %v933_v37  ;;  %v511_v5 = vadd.f32 %v1007_v16, %v488_v59  ;;  %v501_v6 = vadd.f32 %v1007_v16, %v478_v60 }
  0xf4   : > { %v831_v7 = vpack.c.bf16 %v797_v4, %v797_v4  ;;  %vm519_vm12 = vcmp.gt.f32.partialorder %v503_v0, 1.0  ;;  %v509_v8 = vadd.f32 %v1007_v16, %v486_v1  ;;  %v481_v9 = vmul.f32 %v859_v57, %v1002_v14 }
  0xf5   : > { %627 = vst.msk [vmem:[%s1027_s8 + $0x4] sm:$0xf] %vm625_vm3, %v823_v3  ;;  %v794_v10 = vsel %vm519_vm12, 1.0, %v933_v37  ;;  %vm527_vm13 = vcmp.gt.f32.partialorder %v511_v5, 1.0  ;;  %vm517_vm14 = vcmp.gt.f32.partialorder %v501_v6, 1.0  ;;  %v489_v11 = vmul.f32 %v867_v61, %v1002_v14 }
  0xf6   : > { %635 = vst.msk [vmem:[%s1027_s8 + $0x24] sm:$0xf] %vm625_vm3, %v831_v7  ;;  %v828_v12 = vpack.c.bf16 %v794_v10, %v794_v10  ;;  %v802_v13 = vsel %vm527_vm13, 1.0, %v933_v37  ;;  %v792_v15 = vsel %vm517_vm14, 1.0, %v933_v37  ;;  %vm525_vm15 = vcmp.gt.f32.partialorder %v509_v8, 1.0 }
  0xf7   : > { %v836_v17 = vpack.c.bf16 %v802_v13, %v802_v13  ;;  %v826_v18 = vpack.c.bf16 %v792_v15, %v792_v15  ;;  %v800_v19 = vsel %vm525_vm15, 1.0, %v933_v37  ;;  %v504_v20 = vadd.f32 %v1007_v16, %v481_v9 }
  0xf8   : > { %632 = vst.msk [vmem:[%s1027_s8 + $0x18] sm:$0xf] %vm625_vm3, %v828_v12  ;;  %v834_v21 = vpack.c.bf16 %v800_v19, %v800_v19  ;;  %v512_v22 = vadd.f32 %v1007_v16, %v489_v11  ;;  %v479_v23 = vmul.f32 %v1002_v14, %v423_v62  ;;  %v487_v24 = vmul.f32 %v1002_v14, %v455_v2 }
  0xf9   : > { %640 = vst.msk [vmem:[%s1027_s8 + $0x38] sm:$0xf] %vm625_vm3, %v836_v17  ;;  %630 = vst.msk [vmem:[%s1027_s8 + $0x10] sm:$0xf] %vm625_vm3, %v826_v18  ;;  %vm520_vm0 = vcmp.gt.f32.partialorder %v504_v20, 1.0 }
  0xfa   : > { %638 = vst.msk [vmem:[%s1027_s8 + $0x30] sm:$0xf] %vm625_vm3, %v834_v21  ;;  %v795_v25 = vsel %vm520_vm0, 1.0, %v933_v37  ;;  %vm528_vm1 = vcmp.gt.f32.partialorder %v512_v22, 1.0  ;;  %v502_v26 = vadd.f32 %v1007_v16, %v479_v23  ;;  %v510_v27 = vadd.f32 %v1007_v16, %v487_v24 }
  0xfb   : > { %v829_v28 = vpack.c.bf16 %v795_v25, %v795_v25  ;;  %v803_v14 = vsel %vm528_vm1, 1.0, %v933_v37 }
  0xfc   : > { %v837_v29 = vpack.c.bf16 %v803_v14, %v803_v14  ;;  %vm518_vm2 = vcmp.gt.f32.partialorder %v502_v26, 1.0  ;;  %vm526_vm4 = vcmp.gt.f32.partialorder %v510_v27, 1.0 }
  0xfd   : > { %633 = vst.msk [vmem:[%s1027_s8 + $0x1c] sm:$0xf] %vm625_vm3, %v829_v28  ;;  %v793_v30 = vsel %vm518_vm2, 1.0, %v933_v37  ;;  %v801_v31 = vsel %vm526_vm4, 1.0, %v933_v37 }
  0xfe   : > { %641 = vst.msk [vmem:[%s1027_s8 + $0x3c] sm:$0xf] %vm625_vm3, %v837_v29  ;;  %v827_v32 = vpack.c.bf16 %v793_v30, %v793_v30  ;;  %v835_v33 = vpack.c.bf16 %v801_v31, %v801_v31 }
 0x100   : > { %631 = vst.msk [vmem:[%s1027_s8 + $0x14] sm:$0xf] %vm625_vm3, %v827_v32  ;;  %639 = vst.msk [vmem:[%s1027_s8 + $0x34] sm:$0xf] %vm625_vm3, %v835_v33 }
 0x101 PF: > { %s14_s17 = sadd.s32 1, %s930_s17   ;;  %s1110_s15 = smov %s926_s16 }
 0x102   : > { %p11_p5 = scmp.ge.s32.totalorder %s14_s17, 6   ;;  %s1111_s16 = smov %s1113_s18 }
 0x104   :  { %13 = sbr.rel (!%p11_p5) target bundleno = 2 (0x2), region = 75 }

// kernel: yolo_simple_forward.7
= control target key start
LH: loop header
LB: loop body
LE: loop exit
PB: predicated region body
PF: predicated region fallthrough
CT: control target
= control target key end

     0   :  { %s1100_s15 = smov 0   ;;  %s1102_s16 = smov 0   ;;  %s1253_s0 = inlined_call_operand.vmem [shape: bf16[128,288], index: 0, kind: input, shape index: {}]   ;;  %s1254_s1 = inlined_call_operand.vmem [shape: bf16[288,64], index: 1, kind: input, shape index: {}]   ;;  %s1255_s2 = inlined_call_operand.vmem [shape: f32[1,64], index: 2, kind: input, shape index: {}]   ;;  %s1256_s3 = inlined_call_operand.vmem [shape: f32[1,64], index: 3, kind: input, shape index: {}]   ;;  %s1257_s4 = inlined_call_operand.vmem [shape: bf16[128,64], index: 4, kind: output, shape index: {}]  }
   0x1   :  { %s1104_s17 = smov 0  }
   0x2 LB: > { %s26_s18 = sadd.s32 1, %s1068_s16  ;;  %p849_p0 = scmp.ge.s32.totalorder %s1072_s17, 1  ;;  %s1072_s17 = sphi %s1104_s17, %s14_s17   ;;  %s1068_s16 = sphi %s1102_s16, %s1259_s16   ;;  %s1064_s15 = sphi %s1100_s15, %s1258_s15  }
   0x3   : > { %p28_p1 = scmp.ge.s32.totalorder %s26_s18, 2  ;;  %p203_p2 = scmp.lt.s32.totalorder %s1072_s17, 3 }
   0x5   : > { %s1261_s18 = smov (%p28_p1, %s26_s18), 0  ;;  %p204_p3 = pnand %p849_p0, %p203_p2 }
   0x6   : > { %v1016_v0 = vld [vmem:[%s1254_s1 + $0x40] sm:$0xff] (!%p204_p3)   ;;  %s850_s21 = sshll.u32 (!%p204_p3), %s1064_s15, 3  ;;  %v1018_v2 = vld [vmem:[%s1254_s1 + $0x48] sm:$0xff] (!%p204_p3)   ;;  %v1020_v4 = vld [vmem:[%s1254_s1 + $0x50] sm:$0xff] (!%p204_p3)   ;;  %vm490_vm0 = vcmask (!%p204_p3), 261120   ;;  %vm719_vm2 = vcmask (!%p204_p3), 519168  }
   0x7   : > { %207 = sbr.rel (%p204_p3) target bundleno = 284 (0x11c), region = 36  ;;  %v1017_v1 = vld [vmem:[%s1254_s1] sm:$0xff] (!%p204_p3)   ;;  %916 = vmatprep.subr.bf16.mxu0 (!%p204_p3), %v1016_v0  ;;  %974 = vmatprep.subr.bf16.mxu1 (!%p204_p3), %v1016_v0  ;;  %p244_p4 = scmp.lt.s32.totalorder (!%p204_p3), %s850_s21, 15  ;;  %v1019_v3 = vld [vmem:[%s1254_s1 + $0x8] sm:$0xff] (!%p204_p3)   ;;  %v1021_v5 = vld [vmem:[%s1254_s1 + $0x10] sm:$0xff] (!%p204_p3)  }
   0x8   : > { %917 = vmatpush3.bf16.msra.mxu0 (!%p204_p3), %v1017_v1  ;;  %982 = vmatpush3.bf16.msra.mxu1 (!%p204_p3), %v1017_v1  ;;  %v1022_v6 = vld [vmem:[%s1254_s1 + $0x58] sm:$0xff] (!%p204_p3)   ;;  %v1024_v8 = vld [vmem:[%s1254_s1 + $0x60] sm:$0xff] (!%p204_p3)   ;;  %v1026_v10 = vld [vmem:[%s1254_s1 + $0x68] sm:$0xff] (!%p204_p3)  }
   0x9   : > { %918 = vmatprep.subr.bf16.mxu0 (!%p204_p3), %v1018_v2  ;;  %975 = vmatprep.subr.bf16.mxu1 (!%p204_p3), %v1018_v2  ;;  %v1023_v7 = vld [vmem:[%s1254_s1 + $0x18] sm:$0xff] (!%p204_p3)   ;;  %v1025_v9 = vld [vmem:[%s1254_s1 + $0x20] sm:$0xff] (!%p204_p3)   ;;  %v1027_v13 = vld [vmem:[%s1254_s1 + $0x28] sm:$0xff] (!%p204_p3)  }
   0xa   : > { %v1028_v14 = vld [vmem:[%s1254_s1 + $0x70] sm:$0xff] (!%p204_p3)   ;;  %v1030_v16 = vld [vmem:[%s1254_s1 + $0x78] sm:$0xff] (!%p204_p3)   ;;  %v1038_v18 = vld [vmem:[%s1254_s1 + $0x80] sm:$0xff] (!%p204_p3)  }
   0xb   : > { %v1029_v15 = vld [vmem:[%s1254_s1 + $0x30] sm:$0xff] (!%p204_p3)   ;;  %v1031_v17 = vld [vmem:[%s1254_s1 + $0x38] sm:$0xff] (!%p204_p3)   ;;  %v1039_v22 = vld [vmem:[%s1254_s1 + $0x88] sm:$0xff] (!%p204_p3)  }
   0xc   : > { %919 = vmatpush3.bf16.msra.mxu0 (!%p204_p3), %v1019_v3  ;;  %983 = vmatpush3.bf16.msra.mxu1 (!%p204_p3), %v1019_v3  ;;  %v1199_v45 = vld [vmem:[%s1255_s2] ss:$0 sm:$0xff] (!%p204_p3)  ;;  %v1074_v3 = vmov (!%p204_p3), 0.0  }
   0xd   : > { %920 = vmatprep.subr.bf16.mxu0 (!%p204_p3), %v1020_v4  ;;  %976 = vmatprep.subr.bf16.mxu1 (!%p204_p3), %v1020_v4  ;;  %v1204_v51 = vld [vmem:[%s1256_s3] ss:$0 sm:$0xff] (!%p204_p3) }
   0xe   : > { %s1263_s21 = smov (!%p244_p4, %s850_s21), 15 }
   0xf   : > { %s990_s8 = smul.u32 12, %s1263_s21  ;;  %s853_s19 = sshll.u32 %s1263_s21, 2 }
  0x10   : > { %921 = vmatpush3.bf16.msra.mxu0 %v1021_v5  ;;  %984 = vmatpush3.bf16.msra.mxu1 %v1021_v5  ;;  %s1217_s21 = scalar_lea.vmem %s1257_s4, %s853_s19 }
  0x11   : > { %922 = vmatprep.subr.bf16.mxu0 %v1022_v6  ;;  %977 = vmatprep.subr.bf16.mxu1 %v1022_v6  ;;  %s1151_s15 = scalar_lea.vmem %s1253_s0, %s990_s8 }
  0x12   : > { %v1034_v11 = vld [vmem:[%s1151_s15 + $0x4] ss:$12 sps:$4 sm:$0xff]   ;;  %v1037_v12 = vld [vmem:[%s1151_s15 + $0x4c] ss:$12 sps:$4 sm:$0xff]   ;;  %v1035_v20 = vld [vmem:[%s1151_s15 + $0x48] ss:$12 sps:$4 sm:$0xff]  }
  0x13   : > { %535 = vmatprep.mubr.bf16.mxu0 %v1034_v11  ;;  %559 = vmatprep.mubr.bf16.mxu1 %v1037_v12  ;;  %v1032_v19 = vld [vmem:[%s1151_s15] ss:$12 sps:$4 sm:$0xff]   ;;  %v1040_v21 = vld [vmem:[%s1151_s15 + $0x1c] ss:$12 sps:$4 sm:$0xff]   ;;  %v1043_v24 = vld [vmem:[%s1151_s15 + $0x18] ss:$12 sps:$4 sm:$0xff]  }
  0x14   : > { %923 = vmatpush3.bf16.msra.mxu0 %v1023_v7  ;;  %985 = vmatpush3.bf16.msra.mxu1 %v1023_v7  ;;  %v1042_v23 = vld [vmem:[%s1151_s15 + $0x8] ss:$12 sps:$4 sm:$0xff]   ;;  %v1044_v25 = vld [vmem:[%s1151_s15 + $0x20] ss:$12 sps:$4 sm:$0xff]   ;;  %v1047_v27 = vld [vmem:[%s1151_s15 + $0x38] ss:$12 sps:$4 sm:$0xff]  }
  0x15   : > { %924 = vmatprep.subr.bf16.mxu0 %v1024_v8  ;;  %978 = vmatprep.subr.bf16.mxu1 %v1024_v8  ;;  %v1045_v26 = vld [vmem:[%s1151_s15 + $0x34] ss:$12 sps:$4 sm:$0xff]   ;;  %v1048_v28 = vld [vmem:[%s1151_s15 + $0x30] ss:$12 sps:$4 sm:$0xff]  }
  0x16   : > { %v1049_v29 = vld [vmem:[%s1151_s15 + $0x50] ss:$12 sps:$4 sm:$0xff]  }
  0x18   : > { %925 = vmatpush3.bf16.msra.mxu0 %v1025_v9  ;;  %986 = vmatpush3.bf16.msra.mxu1 %v1025_v9 }
  0x19   : > { %926 = vmatprep.subr.bf16.mxu0 %v1026_v10  ;;  %979 = vmatprep.subr.bf16.mxu1 %v1026_v10 }
  0x1c   : > { %927 = vmatpush3.bf16.msra.mxu0 %v1027_v13  ;;  %987 = vmatpush3.bf16.msra.mxu1 %v1027_v13 }
  0x1d   : > { %928 = vmatprep.subr.bf16.mxu0 %v1028_v14  ;;  %980 = vmatprep.subr.bf16.mxu1 %v1028_v14 }
  0x20   : > { %929 = vmatpush3.bf16.msra.mxu0 %v1029_v15  ;;  %988 = vmatpush3.bf16.msra.mxu1 %v1029_v15 }
  0x21   : > { %930 = vmatprep.subr.bf16.mxu0 %v1030_v16  ;;  %981 = vmatprep.subr.bf16.mxu1 %v1030_v16 }
  0x24   : > { %931 = vmatpush3.bf16.msra.mxu0 %v1031_v17  ;;  %989 = vmatpush3.bf16.msra.mxu1 %v1031_v17 }
  0x25   : > { %962 = vmatprep.subr.bf16.mxu1 %v1038_v18 }
  0x27   : > { %536 = vmatmul.mubr.bf16.vlgmr.msra.gmra.mrb[0].mxu0 %v1032_v19  ;;  %560 = vmatmul.mubr.bf16.vlgmr.msra.gmra.mrb[0].mxu1 %v1035_v20 }
  0x28   : > { %963 = vmatpush3.bf16.msra.mxu1 %v1038_v18  ;;  %543 = vmatprep.mubr.bf16.mxu0 %v1040_v21 }
  0x29   : > { %964 = vmatprep.subr.bf16.mxu1 %v1039_v22  ;;  %966 = vmatprep.mubr.msk.bf16.mxu1 %vm490_vm0, %v1042_v23 }
  0x2c   : > { %965 = vmatpush3.bf16.msra.mxu1 %v1039_v22 }
  0x2f   : > { %544 = vmatmul.mubr.bf16.gmra.mrb[4].mxu0 %v1043_v24  ;;  %967 = vmatmul.mubr.msk.bf16.vlgmr.msra.gmra.mrb[4].mxu1 %vm490_vm0, %v1044_v25 }
  0x30   : > { %551 = vmatprep.mubr.bf16.mxu0 %v1045_v26  ;;  %970 = vmatprep.mubr.msk.bf16.mxu1 %vm490_vm0, %v1047_v27 }
  0x37   : > { %552 = vmatmul.mubr.bf16.gmra.mrb[8].mxu0 %v1048_v28  ;;  %971 = vmatmul.mubr.msk.bf16.gmra.mrb[8].mxu1 %vm490_vm0, %v1049_v29 }
  0xfa   : > { %v932_v30 = vpop.f32.mrb[0].mxu0  ;;  %v950_v31 = vpop.f32.mrb[0].mxu1 }
  0xfb   : > { %v933_v32 = vpop.f32.mrb[1].mxu0  ;;  %v951_v33 = vpop.f32.mrb[1].mxu1 }
  0xfc   : > { %v934_v34 = vadd.f32 %v933_v32, %v932_v30  ;;  %v952_v35 = vadd.f32 %v951_v33, %v950_v31  ;;  %v935_v36 = vpop.f32.mrb[2].mxu0  ;;  %v953_v37 = vpop.f32.mrb[2].mxu1 }
  0xfd   : > { %v936_v38 = vpop.f32.mrb[3].mxu0  ;;  %v954_v39 = vpop.f32.mrb[3].mxu1 }
  0xfe   : > { %v937_v40 = vadd.f32 %v936_v38, %v935_v36  ;;  %v955_v41 = vadd.f32 %v954_v39, %v953_v37 }
 0x102   : > { %v938_v42 = vpop.f32.mrb[4].mxu0  ;;  %v968_v43 = vpop.f32.mrb[4].mxu1 }
 0x103   : > { %v939_v44 = vpop.f32.mrb[5].mxu0  ;;  %v602_v46 = vpop.f32.mrb[5].mxu1 }
 0x104   : > { %v940_v47 = vadd.f32 %v939_v44, %v938_v42  ;;  %v603_v48 = vadd.f32 %v934_v34, %v602_v46  ;;  %v941_v49 = vpop.f32.mrb[6].mxu0  ;;  %v969_v50 = vpop.f32.mrb[6].mxu1 }
 0x105   : > { %v942_v52 = vpop.f32.mrb[7].mxu0  ;;  %v605_v53 = vpop.f32.mrb[7].mxu1 }
 0x106   : > { %v611_v54 = vadd.f32 %v968_v43, %v940_v47  ;;  %v640_v55 = vmul.f32 %v1199_v45, %v603_v48  ;;  %v943_v56 = vadd.f32 %v942_v52, %v941_v49  ;;  %v606_v57 = vadd.f32 %v937_v40, %v605_v53 }
 0x108   : > { %v642_v58 = vmul.f32 %v1199_v45, %v611_v54  ;;  %v655_v59 = vadd.f32 %v1204_v51, %v640_v55  ;;  %v614_v60 = vadd.f32 %v969_v50, %v943_v56  ;;  %v641_v61 = vmul.f32 %v1199_v45, %v606_v57 }
 0x10a   : > { %v657_v62 = vadd.f32 %v1204_v51, %v642_v58  ;;  %vm663_vm1 = vcmp.gt.f32.partialorder %v655_v59, 1.0  ;;  %v643_v63 = vmul.f32 %v1199_v45, %v614_v60  ;;  %v656_v0 = vadd.f32 %v1204_v51, %v641_v61  ;;  %v944_v1 = vpop.f32.mrb[8].mxu0  ;;  %v972_v2 = vpop.f32.mrb[8].mxu1 }
 0x10b   : > { %v890_v4 = vsel %vm663_vm1, 1.0, %v1074_v3  ;;  %v627_v5 = vadd.f32 %v972_v2, %v952_v35  ;;  %v945_v6 = vpop.f32.mrb[9].mxu0  ;;  %v618_v7 = vpop.f32.mrb[9].mxu1 }
 0x10c   : > { %vm665_vm3 = vcmp.gt.f32.partialorder %v657_v62, 1.0  ;;  %v908_v8 = vpack.c.bf16 %v890_v4, %v890_v4  ;;  %v658_v9 = vadd.f32 %v1204_v51, %v643_v63  ;;  %vm664_vm4 = vcmp.gt.f32.partialorder %v656_v0, 1.0  ;;  %v947_v10 = vpop.f32.mrb[10].mxu0  ;;  %v973_v11 = vpop.f32.mrb[10].mxu1 }
 0x10d   : > { %v892_v12 = vsel %vm665_vm3, 1.0, %v1074_v3  ;;  %v891_v13 = vsel %vm664_vm4, 1.0, %v1074_v3  ;;  %v646_v14 = vmul.f32 %v1199_v45, %v627_v5  ;;  %v946_v15 = vadd.f32 %v945_v6, %v944_v1  ;;  %v948_v16 = vpop.f32.mrb[11].mxu0  ;;  %v621_v17 = vpop.f32.mrb[11].mxu1 }
 0x10e   : > { %v910_v18 = vpack.c.bf16 %v892_v12, %v892_v12  ;;  %720 = vst.msk [vmem:[%s1217_s21] sm:$0xf] %vm719_vm2, %v908_v8  ;;  %vm666_vm5 = vcmp.gt.f32.partialorder %v658_v9, 1.0  ;;  %v909_v19 = vpack.c.bf16 %v891_v13, %v891_v13  ;;  %v630_v20 = vadd.f32 %v973_v11, %v955_v41 }
 0x10f   : > { %v893_v21 = vsel %vm666_vm5, 1.0, %v1074_v3  ;;  %v661_v22 = vadd.f32 %v1204_v51, %v646_v14  ;;  %v619_v23 = vadd.f32 %v946_v15, %v618_v7  ;;  %v949_v24 = vadd.f32 %v948_v16, %v947_v10 }
 0x110   : > { %722 = vst.msk [vmem:[%s1217_s21 + $0x8] sm:$0xf] %vm719_vm2, %v910_v18  ;;  %v911_v25 = vpack.c.bf16 %v893_v21, %v893_v21  ;;  %721 = vst.msk [vmem:[%s1217_s21 + $0x4] sm:$0xf] %vm719_vm2, %v909_v19  ;;  %v647_v26 = vmul.f32 %v1199_v45, %v630_v20 }
 0x111   : > { %vm669_vm6 = vcmp.gt.f32.partialorder %v661_v22, 1.0  ;;  %v644_v27 = vmul.f32 %v1199_v45, %v619_v23  ;;  %v622_v28 = vadd.f32 %v949_v24, %v621_v17 }
 0x112   : > { %723 = vst.msk [vmem:[%s1217_s21 + $0xc] sm:$0xf] %vm719_vm2, %v911_v25  ;;  %v896_v29 = vsel %vm669_vm6, 1.0, %v1074_v3  ;;  %v662_v30 = vadd.f32 %v1204_v51, %v647_v26 }
 0x113   : > { %v914_v31 = vpack.c.bf16 %v896_v29, %v896_v29  ;;  %v659_v32 = vadd.f32 %v1204_v51, %v644_v27  ;;  %v645_v33 = vmul.f32 %v1199_v45, %v622_v28 }
 0x114   : > { %vm670_vm7 = vcmp.gt.f32.partialorder %v662_v30, 1.0 }
 0x115   : > { %726 = vst.msk [vmem:[%s1217_s21 + $0x18] sm:$0xf] %vm719_vm2, %v914_v31  ;;  %vm667_vm8 = vcmp.gt.f32.partialorder %v659_v32, 1.0  ;;  %v897_v34 = vsel %vm670_vm7, 1.0, %v1074_v3  ;;  %v660_v35 = vadd.f32 %v1204_v51, %v645_v33 }
 0x116   : > { %v894_v36 = vsel %vm667_vm8, 1.0, %v1074_v3  ;;  %v915_v37 = vpack.c.bf16 %v897_v34, %v897_v34 }
 0x117   : > { %v912_v38 = vpack.c.bf16 %v894_v36, %v894_v36  ;;  %vm668_vm9 = vcmp.gt.f32.partialorder %v660_v35, 1.0 }
 0x118   : > { %727 = vst.msk [vmem:[%s1217_s21 + $0x1c] sm:$0xf] %vm719_vm2, %v915_v37  ;;  %v895_v39 = vsel %vm668_vm9, 1.0, %v1074_v3 }
 0x119   : > { %724 = vst.msk [vmem:[%s1217_s21 + $0x10] sm:$0xf] %vm719_vm2, %v912_v38  ;;  %v913_v40 = vpack.c.bf16 %v895_v39, %v895_v39 }
 0x11b   : > { %725 = vst.msk [vmem:[%s1217_s21 + $0x14] sm:$0xf] %vm719_vm2, %v913_v40 }
 0x11c PF: > { %s14_s17 = sadd.s32 1, %s1072_s17   ;;  %s1258_s15 = smov %s1068_s16 }
 0x11d   : > { %p11_p5 = scmp.ge.s32.totalorder %s14_s17, 4   ;;  %s1259_s16 = smov %s1261_s18 }
 0x11f   :  { %13 = sbr.rel (!%p11_p5) target bundleno = 2 (0x2), region = 75 }

// kernel: yolo_simple_forward.8
= control target key start
LH: loop header
LB: loop body
LE: loop exit
PB: predicated region body
PF: predicated region fallthrough
CT: control target
= control target key end

     0   :  { %s1113_s15 = smov 0   ;;  %s1115_s16 = smov 0   ;;  %s1267_s0 = inlined_call_operand.vmem [shape: bf16[32,576], index: 0, kind: input, shape index: {}]   ;;  %s1268_s1 = inlined_call_operand.vmem [shape: bf16[576,128], index: 1, kind: input, shape index: {}]   ;;  %s1269_s2 = inlined_call_operand.vmem [shape: f32[1,128], index: 2, kind: input, shape index: {}]   ;;  %s1270_s3 = inlined_call_operand.vmem [shape: f32[1,128], index: 3, kind: input, shape index: {}]   ;;  %s1271_s4 = inlined_call_operand.vmem [shape: bf16[32,128], index: 4, kind: output, shape index: {}]  }
   0x1   :  { %s1117_s17 = smov 0  }
   0x2 LB: > { %s26_s18 = sadd.s32 1, %s1080_s16  ;;  %p871_p0 = scmp.ge.s32.totalorder %s1084_s17, 1  ;;  %s1084_s17 = sphi %s1117_s17, %s14_s17   ;;  %s1080_s16 = sphi %s1115_s16, %s1273_s16   ;;  %s1076_s15 = sphi %s1113_s15, %s1272_s15  }
   0x3   : > { %p28_p1 = scmp.ge.s32.totalorder %s26_s18, 2  ;;  %p203_p2 = scmp.lt.s32.totalorder %s1084_s17, 3 }
   0x5   : > { %s1275_s18 = smov (%p28_p1, %s26_s18), 0  ;;  %p204_p3 = pnand %p871_p0, %p203_p2 }
   0x6   : > { %v1019_v0 = vld [vmem:[%s1268_s1 + $0x40] sm:$0xff] (!%p204_p3)   ;;  %v1023_v4 = vld [vmem:[%s1268_s1 + $0x48] sm:$0xff] (!%p204_p3)   ;;  %v1027_v8 = vld [vmem:[%s1268_s1 + $0x50] sm:$0xff] (!%p204_p3)   ;;  %s872_s27 = sshll.u32 (!%p204_p3), %s1076_s15, 1  ;;  %v1086_v34 = vmov (!%p204_p3), 0.0   ;;  %vm1087_vm0 = vmmov (!%p204_p3), 0  }
   0x7   : > { %207 = sbr.rel (%p204_p3) target bundleno = 281 (0x119), region = 36  ;;  %v1020_v1 = vld [vmem:[%s1268_s1 + $0xc0] sm:$0xff] (!%p204_p3)   ;;  %931 = vmatprep.subr.bf16.mxu0 (!%p204_p3), %v1019_v0  ;;  %v1024_v5 = vld [vmem:[%s1268_s1 + $0xc8] sm:$0xff] (!%p204_p3)   ;;  %v1028_v9 = vld [vmem:[%s1268_s1 + $0xd0] sm:$0xff] (!%p204_p3)   ;;  %p244_p4 = scmp.lt.s32.totalorder (!%p204_p3), %s872_s27, 3  ;;  %vm589_vm1 = vcmask (!%p204_p3), 523264  }
   0x8   : > { %v1021_v2 = vld [vmem:[%s1268_s1] sm:$0xff] (!%p204_p3)   ;;  %953 = vmatprep.subr.bf16.mxu1 (!%p204_p3), %v1020_v1  ;;  %v1025_v6 = vld [vmem:[%s1268_s1 + $0x8] sm:$0xff] (!%p204_p3)   ;;  %v1029_v10 = vld [vmem:[%s1268_s1 + $0x10] sm:$0xff] (!%p204_p3)  }
   0x9   : > { %v1022_v3 = vld [vmem:[%s1268_s1 + $0x80] sm:$0xff] (!%p204_p3)   ;;  %932 = vmatpush3.bf16.msra.mxu0 (!%p204_p3), %v1021_v2  ;;  %v1026_v7 = vld [vmem:[%s1268_s1 + $0x88] sm:$0xff] (!%p204_p3)   ;;  %v1030_v11 = vld [vmem:[%s1268_s1 + $0x90] sm:$0xff] (!%p204_p3)  }
   0xa   : > { %954 = vmatpush3.bf16.msra.mxu1 (!%p204_p3), %v1022_v3  ;;  %933 = vmatprep.subr.bf16.mxu0 (!%p204_p3), %v1023_v4  ;;  %v1031_v12 = vld [vmem:[%s1268_s1 + $0x58] sm:$0xff] (!%p204_p3)   ;;  %v1035_v16 = vld [vmem:[%s1268_s1 + $0x60] sm:$0xff] (!%p204_p3)   ;;  %v1039_v20 = vld [vmem:[%s1268_s1 + $0x68] sm:$0xff] (!%p204_p3)  }
   0xb   : > { %955 = vmatprep.subr.bf16.mxu1 (!%p204_p3), %v1024_v5  ;;  %v1032_v13 = vld [vmem:[%s1268_s1 + $0xd8] sm:$0xff] (!%p204_p3)   ;;  %v1036_v17 = vld [vmem:[%s1268_s1 + $0xe0] sm:$0xff] (!%p204_p3)   ;;  %v1040_v21 = vld [vmem:[%s1268_s1 + $0xe8] sm:$0xff] (!%p204_p3)  }
   0xc   : > { %v1033_v14 = vld [vmem:[%s1268_s1 + $0x18] sm:$0xff] (!%p204_p3)   ;;  %v1037_v18 = vld [vmem:[%s1268_s1 + $0x20] sm:$0xff] (!%p204_p3)   ;;  %v1041_v22 = vld [vmem:[%s1268_s1 + $0x28] sm:$0xff] (!%p204_p3)  }
   0xd   : > { %934 = vmatpush3.bf16.msra.mxu0 (!%p204_p3), %v1025_v6  ;;  %v1034_v15 = vld [vmem:[%s1268_s1 + $0x98] sm:$0xff] (!%p204_p3)   ;;  %v1038_v19 = vld [vmem:[%s1268_s1 + $0xa0] sm:$0xff] (!%p204_p3)   ;;  %v1042_v23 = vld [vmem:[%s1268_s1 + $0xa8] sm:$0xff] (!%p204_p3)  }
   0xe   : > { %956 = vmatpush3.bf16.msra.mxu1 %v1026_v7  ;;  %935 = vmatprep.subr.bf16.mxu0 %v1027_v8  ;;  %s1277_s27 = smov (!%p244_p4, %s872_s27), 3  ;;  %v1043_v24 = vld [vmem:[%s1268_s1 + $0x70] sm:$0xff]   ;;  %v1047_v28 = vld [vmem:[%s1268_s1 + $0x78] sm:$0xff]   ;;  %v1057_v37 = vld [vmem:[%s1268_s1 + $0x100] sm:$0xff]  }
   0xf   : > { %957 = vmatprep.subr.bf16.mxu1 %v1028_v9  ;;  %v1044_v25 = vld [vmem:[%s1268_s1 + $0xf0] sm:$0xff]   ;;  %s992_s28 = smul.u32 20, %s1277_s27  ;;  %v1048_v29 = vld [vmem:[%s1268_s1 + $0xf8] sm:$0xff]   ;;  %v1058_v38 = vld [vmem:[%s1268_s1 + $0x108] sm:$0xff]   ;;  %s875_s8 = sshll.u32 %s1277_s27, 2 }
  0x10   : > { %v1045_v26 = vld [vmem:[%s1268_s1 + $0x30] sm:$0xff]   ;;  %v1049_v30 = vld [vmem:[%s1268_s1 + $0x38] sm:$0xff]   ;;  %v918_v57 = vld [vmem:[%s1269_s2] ss:$0 sm:$0xff]  ;;  %s267_s10 = scalar_lea.vmem %s1271_s4, %s875_s8 }
  0x11   : > { %936 = vmatpush3.bf16.msra.mxu0 %v1029_v10  ;;  %v1046_v27 = vld [vmem:[%s1268_s1 + $0xb0] sm:$0xff]   ;;  %s248_s12 = scalar_lea.vmem %s1267_s0, %s992_s28  ;;  %v1050_v31 = vld [vmem:[%s1268_s1 + $0xb8] sm:$0xff]   ;;  %v919_v60 = vld [vmem:[%s1270_s3] ss:$0 sm:$0xff] }
  0x12   : > { %958 = vmatpush3.bf16.msra.mxu1 %v1030_v11  ;;  %937 = vmatprep.subr.bf16.mxu0 %v1031_v12  ;;  %v1051_v32 = vld [vmem:[%s248_s12] ss:$20 sps:$4 sm:$0xff]   ;;  %v1053_v33 = vld [vmem:[%s248_s12 + $0x4] ss:$20 sps:$4 sm:$0xff]   ;;  %v1054_v35 = vld [vmem:[%s248_s12 + $0x8] ss:$20 sps:$4 sm:$0xff]  }
  0x13   : > { %959 = vmatprep.subr.bf16.mxu1 %v1032_v13  ;;  %v1056_v36 = vld [vmem:[%s248_s12 + $0xc] ss:$20 sps:$4 sm:$0xff]   ;;  %625 = vmatprep.mubr.bf16.mxu0 %v1053_v33  ;;  %v1059_v39 = vld [vmem:[%s1268_s1 + $0x110] sm:$0xff]   ;;  %v1060_v40 = vld [vmem:[%s1268_s1 + $0x118] sm:$0xff]  }
  0x14   : > { %666 = vmatprep.mubr.bf16.mxu1 %v1056_v36  ;;  %v1061_v41 = vld [vmem:[%s248_s12 + $0x10] ss:$20 sps:$4 sm:$0xff]  }
  0x15   : > { %938 = vmatpush3.bf16.msra.mxu0 %v1033_v14 }
  0x16   : > { %960 = vmatpush3.bf16.msra.mxu1 %v1034_v15  ;;  %939 = vmatprep.subr.bf16.mxu0 %v1035_v16 }
  0x17   : > { %961 = vmatprep.subr.bf16.mxu1 %v1036_v17 }
  0x19   : > { %940 = vmatpush3.bf16.msra.mxu0 %v1037_v18 }
  0x1a   : > { %962 = vmatpush3.bf16.msra.mxu1 %v1038_v19  ;;  %941 = vmatprep.subr.bf16.mxu0 %v1039_v20 }
  0x1b   : > { %963 = vmatprep.subr.bf16.mxu1 %v1040_v21 }
  0x1d   : > { %942 = vmatpush3.bf16.msra.mxu0 %v1041_v22 }
  0x1e   : > { %964 = vmatpush3.bf16.msra.mxu1 %v1042_v23  ;;  %943 = vmatprep.subr.bf16.mxu0 %v1043_v24 }
  0x1f   : > { %965 = vmatprep.subr.bf16.mxu1 %v1044_v25 }
  0x21   : > { %944 = vmatpush3.bf16.msra.mxu0 %v1045_v26 }
  0x22   : > { %966 = vmatpush3.bf16.msra.mxu1 %v1046_v27  ;;  %945 = vmatprep.subr.bf16.mxu0 %v1047_v28 }
  0x23   : > { %967 = vmatprep.subr.bf16.mxu1 %v1048_v29 }
  0x25   : > { %946 = vmatpush3.bf16.msra.mxu0 %v1049_v30 }
  0x26   : > { %968 = vmatpush3.bf16.msra.mxu1 %v1050_v31  ;;  %980 = vmatprep.subr.bf16.mxu0 %v1086_v34 }
  0x28   : > { %626 = vmatmul.mubr.bf16.vlgmr.msra.gmra.mrb[0].mxu0 %v1051_v32 }
  0x29   : > { %667 = vmatmul.mubr.bf16.vlgmr.msra.gmra.mrb[0].mxu1 %v1054_v35  ;;  %981 = vmatpush3.bf16.msra.mxu0 %v1057_v37 }
  0x2a   : > { %982 = vmatprep.subr.bf16.mxu0 %v1086_v34  ;;  %988 = vmatprep.mubr.msk.bf16.mxu0 %vm1087_vm0, %v1086_v34 }
  0x2d   : > { %983 = vmatpush3.bf16.msra.mxu0 %v1058_v38 }
  0x2e   : > { %984 = vmatprep.subr.bf16.mxu0 %v1086_v34 }
  0x31   : > { %985 = vmatpush3.bf16.msra.mxu0 %v1059_v39 }
  0x32   : > { %986 = vmatprep.subr.bf16.mxu0 %v1086_v34 }
  0x35   : > { %987 = vmatpush3.bf16.msra.mxu0 %v1060_v40 }
  0x38   : > { %989 = vmatmul.mubr.msk.bf16.vlgmr.msra.gmra.mrb[4].mxu0 %vm589_vm1, %v1061_v41 }
  0xfb   : > { %v947_v42 = vpop.f32.mrb[0].mxu0 }
  0xfc   : > { %v969_v43 = vpop.f32.mrb[0].mxu1  ;;  %v948_v44 = vpop.f32.mrb[1].mxu0 }
  0xfd   : > { %v949_v45 = vadd.f32 %v948_v44, %v947_v42  ;;  %v970_v46 = vpop.f32.mrb[1].mxu1  ;;  %v950_v47 = vpop.f32.mrb[2].mxu0 }
  0xfe   : > { %v971_v48 = vadd.f32 %v970_v46, %v969_v43  ;;  %v972_v49 = vpop.f32.mrb[2].mxu1  ;;  %v951_v50 = vpop.f32.mrb[3].mxu0 }
  0xff   : > { %v952_v51 = vadd.f32 %v951_v50, %v950_v47  ;;  %v973_v52 = vpop.f32.mrb[3].mxu1 }
 0x100   : > { %v974_v53 = vadd.f32 %v973_v52, %v972_v49  ;;  %v669_v54 = vadd.f32 %v971_v48, %v949_v45 }
 0x102   : > { %v672_v55 = vadd.f32 %v974_v53, %v952_v51 }
 0x10b   : > { %v709_v56 = vpop.f32.mrb[4].mxu0 }
 0x10c   : > { %v710_v58 = vadd.f32 %v709_v56, %v669_v54  ;;  %v990_v59 = vpop.f32.mrb[5].mxu0 }
 0x10d   : > { %v712_v61 = vpop.f32.mrb[6].mxu0 }
 0x10e   : > { %v723_v62 = vmul.f32 %v918_v57, %v710_v58  ;;  %v713_v63 = vadd.f32 %v712_v61, %v672_v55  ;;  %v991_v0 = vpop.f32.mrb[7].mxu0 }
 0x110   : > { %v732_v1 = vadd.f32 %v919_v60, %v723_v62  ;;  %v724_v2 = vmul.f32 %v918_v57, %v713_v63 }
 0x112   : > { %vm734_vm2 = vcmp.gt.f32.partialorder %v732_v1, 1.0  ;;  %v733_v3 = vadd.f32 %v919_v60, %v724_v2 }
 0x113   : > { %v920_v4 = vsel %vm734_vm2, 1.0, %v1086_v34 }
 0x114   : > { %vm735_vm3 = vcmp.gt.f32.partialorder %v733_v3, 1.0 }
 0x115   : > { %v921_v5 = vsel %vm735_vm3, 1.0, %v1086_v34 }
 0x116   : > { %v929_v6 = vpack.c.bf16 %v921_v5, %v920_v4 }
 0x118   : > { %930 = vst [vmem:[%s267_s10] sm:$0xff] %v929_v6  }
 0x119 PF: > { %s14_s17 = sadd.s32 1, %s1084_s17   ;;  %s1272_s15 = smov %s1080_s16 }
 0x11a   : > { %p11_p5 = scmp.ge.s32.totalorder %s14_s17, 4   ;;  %s1273_s16 = smov %s1275_s18 }
 0x11c   :  { %13 = sbr.rel (!%p11_p5) target bundleno = 2 (0x2), region = 75 }

// kernel: yolo_simple_forward.11
= control target key start
LH: loop header
LB: loop body
LE: loop exit
PB: predicated region body
PF: predicated region fallthrough
CT: control target
= control target key end

     0   :  { %9 = vsyncpa [#allocation3], 0  ;;  %s898_s0 = inlined_call_operand.vmem [shape: bf16[32,128], index: 0, kind: input, shape index: {}]   ;;  %s899_s1 = inlined_call_operand.vmem [shape: bf16[128,27], index: 1, kind: input, shape index: {}]   ;;  %s900_s2 = inlined_call_operand.vmem [shape: f32[1,27], index: 2, kind: input, shape index: {}]   ;;  %s901_s3 = inlined_call_operand.vmem [shape: f32[1,27], index: 3, kind: input, shape index: {}]   ;;  %s902_s4 = inlined_call_operand.hbm [shape: f32[32,27], index: 4, kind: output, shape index: {}]  }
   0x1   :  { %11 = vsyncpa [#allocation3 + $0x1], 0  ;;  %s754_s15 = smov 0   ;;  %s756_s16 = smov 0  }
   0x2   :  { %s758_s17 = smov 0   ;;  %s760_s18 = smov 0  }
   0x3   :  { %s762_s19 = smov 0   ;;  %s764_s20 = smov 0  }
   0x4 LB: > { %s519_s21 = sadd.s32 4294967295, %s722_s20   ;;  %s520_s22 = sadd.s32 4294967294, %s722_s20   ;;  %s722_s20 = sphi %s764_s20, %s17_s20   ;;  %s718_s19 = sphi %s762_s19, %s909_s19   ;;  %s714_s18 = sphi %s760_s18, %s908_s18   ;;  %s710_s17 = sphi %s758_s17, %s907_s17   ;;  %s706_s16 = sphi %s756_s16, %s906_s16   ;;  %s702_s15 = sphi %s754_s15, %s905_s15  }
   0x5   : > { %s29_s23 = sadd.s32 1, %s718_s19  ;;  %s142_s24 = sadd.s32 1, %s710_s17 }
   0x6   : > { %p31_p0 = scmp.ge.s32.totalorder %s29_s23, 2  ;;  %p152_p1 = scmp.ne.s32.totalorder %s710_s17, %s706_s16 }
   0x7   : > { %p153_p2 = scmp.eq.s32.totalorder %s519_s21, 1  ;;  %p158_p3 = scmp.ne.s32.totalorder %s706_s16, %s702_s15 }
   0x8   : > { %s911_s23 = smov (%p31_p0, %s29_s23), 0  ;;  %p159_p5 = scmp.eq.s32.totalorder %s520_s22, 1 }
   0x9   : > { %p794_p4 = por %p153_p2, %p152_p1  ;;  %s137_s26 = ssub.s32 %s718_s19, %s911_s23 }
   0xa   : > { %p526_p6 = scmp.ge.s32.totalorder %s722_s20, 1  ;;  %p140_p7 = scmp.eq.s32.totalorder %s137_s26, 0 }
   0xb   : > { %p801_p8 = por %p159_p5, %p158_p3  ;;  %p205_p9 = scmp.lt.s32.totalorder %s722_s20, 3 }
   0xc   : > { %s807_s28 = scalar_select %p140_p7, %s710_s17, %s142_s24  }
   0xd   : > { %p206_p10 = pnand %p526_p6, %p205_p9 }
   0xe   : > { %v635_v0 = vld [vmem:[%s899_s1] sm:$0xff] (!%p206_p10)   ;;  %v724_v1 = vmov (!%p206_p10), 0.0   ;;  %v636_v2 = vld [vmem:[%s899_s1 + $0x8] sm:$0xff] (!%p206_p10)   ;;  %vm725_vm0 = vmmov (!%p206_p10), 0   ;;  %s528_s7 = sshll.u32 (!%p206_p10), %s714_s18, 1  ;;  %v637_v3 = vld [vmem:[%s899_s1 + $0x10] sm:$0xff] (!%p206_p10)  }
   0xf   : > { %209 = sbr.rel (%p206_p10) target bundleno = 280 (0x118), region = 36  ;;  %556 = vmatprep.subr.bf16.mxu0 (!%p206_p10), %v724_v1  ;;  %572 = vmatprep.mubr.msk.bf16.mxu0 (!%p206_p10), %vm725_vm0, %v724_v1  ;;  %p242_p11 = scmp.lt.s32.totalorder (!%p206_p10), %s528_s7, 3  ;;  %v638_v4 = vld [vmem:[%s899_s1 + $0x18] sm:$0xff] (!%p206_p10)   ;;  %v639_v5 = vld [vmem:[%s899_s1 + $0x20] sm:$0xff] (!%p206_p10)   ;;  %v640_v6 = vld [vmem:[%s899_s1 + $0x28] sm:$0xff] (!%p206_p10)   ;;  %vm390_vm1 = vcmask (!%p206_p10), 220160  }
  0x10   : > { %557 = vmatpush3.bf16.msra.mxu0 (!%p206_p10), %v635_v0  ;;  %v641_v7 = vld [vmem:[%s899_s1 + $0x30] sm:$0xff] (!%p206_p10)   ;;  %v642_v8 = vld [vmem:[%s899_s1 + $0x38] sm:$0xff] (!%p206_p10)   ;;  %s238_s8 = sand.u32 (!%p206_p10), 1, %s706_s16   ;;  %v539_v10 = vld [vmem:[%s900_s2] ss:$0 sm:$0xff] (!%p206_p10)  ;;  %s546_s24 = sshll.u32 (!%p206_p10), %s714_s18, 8 }
  0x11   : > { %558 = vmatprep.subr.bf16.mxu0 (!%p206_p10), %v724_v1  ;;  %s527_s9 = sshll.u32 (!%p206_p10), %s238_s8, 4  ;;  %v540_v12 = vld [vmem:[%s901_s3] ss:$0 sm:$0xff] (!%p206_p10)  ;;  %s848_s29 = scalar_lea.hbm (!%p206_p10), %s902_s4, %s546_s24 }
  0x12   : > { %s240_s21 = scalar_lea.vmem (!%p206_p10), [#allocation2], %s527_s9  ;;  %s852_s30 = scalar_lea.sflag (!%p206_p10), [#allocation3], %s238_s8 }
  0x13   : > { %s408_s22 = sshll.u32 (!%p206_p10), %s240_s21, 4  ;;  %s726_s5 = smov (!%p206_p10), [#allocation2]   ;;  %s850_s22 = int_to_ptr.vmem [resolvable:$true] %s408_s22 }
  0x14   : > { %559 = vmatpush3.bf16.msra.mxu0 (!%p206_p10), %v636_v2  ;;  %s644_s18 = scalar_lea.vmem (!%p206_p10), %s850_s22, 256  ;;  %s648_s6 = sshll.u32 (!%p206_p10), %s726_s5, 4  ;;  %s649_s6 = int_to_ptr.vmem [resolvable:$false] %s648_s6 }
  0x15   : > { %560 = vmatprep.subr.bf16.mxu0 (!%p206_p10), %v724_v1  ;;  %p645_p12 = scmp.ne.s32.totalorder (!%p206_p10), %s850_s22, %s644_s18  ;;  %p651_p1 = scmp.lt.s32.totalorder (!%p206_p10), %s850_s22, %s649_s6 }
  0x16   : > { %s913_s7 = smov (!%p242_p11, %s528_s7), 3 }
  0x17   : > { %s529_s10 = sshll.u32 %s913_s7, 2  ;;  %p646_p13 = pnand %p645_p12, %p794_p4 }
  0x18   : > { %s245_s13 = scalar_lea.vmem %s898_s0, %s529_s10  ;;  %561 = vmatpush3.bf16.msra.mxu0 %v637_v3  ;;  %s650_s7 = scalar_lea.vmem %s649_s6, 512 }
  0x19   : > { %562 = vmatprep.subr.bf16.mxu0 %v724_v1  ;;  %v643_v9 = vld [vmem:[%s245_s13] sm:$0xff]   ;;  %p647_p0 = pneg %p646_p13  ;;  %p652_p2 = scmp.lt.s32.totalorder %s650_s7, %s644_s18 }
  0x1b   : > { %p653_p3 = por %p652_p2, %p651_p1 }
  0x1c   : > { %563 = vmatpush3.bf16.msra.mxu0 %v638_v4 }
  0x1d   : > { %564 = vmatprep.subr.bf16.mxu0 %v724_v1  ;;  %p654_p5 = pnand %p653_p3, %p647_p0 }
  0x20   : > { %565 = vmatpush3.bf16.msra.mxu0 %v639_v5 }
  0x21   : > { %566 = vmatprep.subr.bf16.mxu0 %v724_v1 }
  0x24   : > { %567 = vmatpush3.bf16.msra.mxu0 %v640_v6 }
  0x25   : > { %568 = vmatprep.subr.bf16.mxu0 %v724_v1 }
  0x28   : > { %569 = vmatpush3.bf16.msra.mxu0 %v641_v7 }
  0x29   : > { %570 = vmatprep.subr.bf16.mxu0 %v724_v1 }
  0x2c   : > { %571 = vmatpush3.bf16.msra.mxu0 %v642_v8 }
  0x2f   : > { %573 = vmatmul.mubr.bf16.vlgmr.msra.gmra.mrb[0].mxu0 %v643_v9 }
 0x102   : > { %v365_v11 = vpop.f32.mrb[0].mxu0 }
 0x103   : > { %v379_v13 = vmul.f32 %v539_v10, %v365_v11  ;;  %v574_v14 = vpop.f32.mrb[1].mxu0 }
 0x104   : > { %v368_v15 = vpop.f32.mrb[2].mxu0 }
 0x105   : > { %v388_v16 = vadd.f32 %v540_v12, %v379_v13  ;;  %v380_v17 = vmul.f32 %v539_v10, %v368_v15  ;;  %v575_v18 = vpop.f32.mrb[3].mxu0 }
 0x107   : > { %391 = vst.msk [vmem:[%s240_s21] sm:$0xff] %vm390_vm1, %v388_v16  ;;  %v389_v19 = vadd.f32 %v540_v12, %v380_v17 }
 0x109   : > { %392 = vst.msk [vmem:[%s240_s21 + $0x8] sm:$0xff] %vm390_vm1, %v389_v19 }
 0x10a   : > { %657 = shalt.err (!%p654_p5)
}
 0x10b   : > { %s658_s8 = scalar_lea.hbm %s848_s29, 256  ;;  %s662_s11 = scalar_lea.hbm %s902_s4, 512 }
 0x10c   : > { %p659_p6 = scmp.ne.s32.totalorder %s848_s29, %s658_s8  ;;  %p663_p10 = scmp.lt.u32.totalorder %s848_s29, %s902_s4 }
 0x10d   : > { %p664_p11 = scmp.lt.u32.totalorder %s662_s11, %s658_s8  ;;  %p666_p13 = scmp.lt.u32.totalorder %s658_s8, %s848_s29 }
 0x10e   : > { %p660_p7 = pnand %p659_p6, %p794_p4 }
 0x10f   : > { %p665_p12 = por %p664_p11, %p663_p10 }
 0x110   : > { %p661_p9 = pneg %p660_p7 }
 0x111   : > { %p667_p0 = por %p666_p13, %p665_p12 }
 0x113   : > { %p668_p1 = pnand %p667_p0, %p661_p9 }
 0x115   : > { %671 = shalt.err (!%p668_p1)
}
 0x116   : > { %s727_s21 = smov 128   ;;  %s728_s24 = smov 8  }
 0x117   : > { %576 = dma.vmem_to_hbm [thread:$0]  (%p794_p4), %s850_s22, 256, %s848_s29, %s852_s30, %s727_s21, %s727_s21, %s728_s24  }
 0x118 PF: > { %p582_p2 = scmp.ge.s32.totalorder %s722_s20, 2  ;;  %s423_s13 = sand.u32 1, %s702_s15  }
 0x119   : > { %s424_s26 = scalar_lea.sflag [#allocation3], %s423_s13 }
 0x11a   : > { %p579_p3 = pnand %p582_p2, %p801_p8 }
 0x11c   : > { %697 = dma.done.wait (!%p579_p3), %s424_s26, 256  }
 0x11d   : > { %699 = vsyncadd (!%p579_p3), %s424_s26, 4294967040  ;;  %s17_s20 = sadd.s32 1, %s722_s20   ;;  %s905_s15 = smov %s706_s16 }
 0x11e   : > { %p14_p5 = scmp.ge.s32.totalorder %s17_s20, 4   ;;  %s906_s16 = smov %s710_s17 }
 0x11f   : > { %s907_s17 = smov %s807_s28  ;;  %s908_s18 = smov %s718_s19 }
 0x120   : > { %s909_s19 = smov %s911_s23  ;;  %16 = sbr.rel (!%p14_p5) target bundleno = 4 (0x4), region = 80 }
 0x127   :  { %429 = vsyncpa [#allocation3], 1 }
 0x128   :  { %431 = vsyncpa [#allocation3 + $0x1], 1 }

// kernel: yolo_simple_forward.9
= control target key start
LH: loop header
LB: loop body
LE: loop exit
PB: predicated region body
PF: predicated region fallthrough
CT: control target
= control target key end

     0   :  { %s2496_s15 = smov 0   ;;  %s2498_s16 = smov 0   ;;  %s3000_s0 = inlined_call_operand.vmem [shape: bf16[32,1152], index: 0, kind: input, shape index: {}]   ;;  %s3001_s1 = inlined_call_operand.vmem [shape: bf16[1152,256], index: 1, kind: input, shape index: {}]   ;;  %s3002_s2 = inlined_call_operand.vmem [shape: f32[1,256], index: 2, kind: input, shape index: {}]   ;;  %s3003_s3 = inlined_call_operand.vmem [shape: f32[1,256], index: 3, kind: input, shape index: {}]   ;;  %s3004_s4 = inlined_call_operand.vmem [shape: bf16[32,256], index: 4, kind: output, shape index: {}]  }
   0x1   :  { %s2500_s17 = smov 0   ;;  %s2502_s18 = smov 0  }
   0x2   :  { %s2504_s19 = smov 0  }
   0x3 LB: > { %s23_s20 = sadd.s32 1, %s2464_s18  ;;  %s2024_s21 = sadd.s32 4294967295, %s2468_s19   ;;  %s2468_s19 = sphi %s2504_s19, %s14_s19   ;;  %s2464_s18 = sphi %s2502_s18, %s3009_s18   ;;  %s2460_s17 = sphi %s2500_s17, %s3008_s17   ;;  %s2456_s16 = sphi %s2498_s16, %s3007_s16   ;;  %s2452_s15 = sphi %s2496_s15, %s3006_s15  }
   0x4   : > { %p24_p0 = scmp.ge.s32.totalorder %s23_s20, 2  ;;  %p66_p1 = scmp.ne.s32.totalorder %s2456_s16, %s2452_s15 }
   0x5   : > { %p67_p2 = scmp.eq.s32.totalorder %s2468_s19, 0  ;;  %p150_p4 = scmp.eq.s32.totalorder %s2024_s21, 1 }
   0x6   : > { %s3011_s20 = smov (%p24_p0, %s23_s20), 0  ;;  %s59_s23 = sadd.s32 1, %s2456_s16 }
   0x7   : > { %p68_p3 = por %p67_p2, %p66_p1  ;;  %s56_s22 = ssub.s32 %s2464_s18, %s3011_s20 }
   0x8   : > { %p57_p5 = scmp.eq.s32.totalorder %s56_s22, 0  ;;  %p2531_p6 = por %p150_p4, %p66_p1 }
   0x9   : > { %p2028_p7 = scmp.ge.s32.totalorder %s2468_s19, 2 }
   0xa   : > { %s2536_s25 = scalar_select %p57_p5, %s2456_s16, %s59_s23  }
   0xb   : > { %182 = sbr.rel (%p2028_p7) target bundleno = 118 (0x76), region = 20 }
  0x12   : > { %185 = sbr.rel (!%p68_p3) target bundleno = 118 (0x76), region = 24  ;;  %s187_s26 = sand.u32 (%p68_p3), 1, %s2456_s16  }
  0x13   : > { %s2029_s27 = sshll.u32 (%p68_p3), %s2464_s18, 2  ;;  %s2289_s28 = smul.u32 (%p68_p3), 576, %s187_s26 }
  0x14   : > { %s2544_s5 = scalar_lea.vmem (%p68_p3), %s3001_s1, %s2029_s27 }
  0x15   : > { %v207_v0 = vld [vmem:[%s2544_s5] sm:$0xf] (%p68_p3)  ;;  %v209_v1 = vld [vmem:[%s2544_s5 + $0x8] sm:$0xf] (%p68_p3)  ;;  %v211_v2 = vld [vmem:[%s2544_s5 + $0x10] sm:$0xf] (%p68_p3) }
  0x16   : > { %v213_v3 = vld [vmem:[%s2544_s5 + $0x18] sm:$0xf] (%p68_p3)  ;;  %v215_v4 = vld [vmem:[%s2544_s5 + $0x20] sm:$0xf] (%p68_p3)  ;;  %s2551_s6 = scalar_lea.vmem (%p68_p3), [#allocation2], %s2289_s28 }
  0x17   : > { %208 = vst [vmem:[%s2551_s6] sm:$0xf] (%p68_p3), %v207_v0  ;;  %210 = vst [vmem:[%s2551_s6 + $0x4] sm:$0xf] (%p68_p3), %v209_v1  ;;  %v217_v5 = vld [vmem:[%s2544_s5 + $0x28] sm:$0xf] (%p68_p3) }
  0x18   : > { %212 = vst [vmem:[%s2551_s6 + $0x8] sm:$0xf] (%p68_p3), %v211_v2  ;;  %214 = vst [vmem:[%s2551_s6 + $0xc] sm:$0xf] (%p68_p3), %v213_v3  ;;  %v219_v6 = vld [vmem:[%s2544_s5 + $0x30] sm:$0xf] (%p68_p3) }
  0x19   : > { %216 = vst [vmem:[%s2551_s6 + $0x10] sm:$0xf] %v215_v4  ;;  %v221_v7 = vld [vmem:[%s2544_s5 + $0x38] sm:$0xf]  ;;  %218 = vst [vmem:[%s2551_s6 + $0x14] sm:$0xf] %v217_v5 }
  0x1a   : > { %220 = vst [vmem:[%s2551_s6 + $0x18] sm:$0xf] %v219_v6  ;;  %222 = vst [vmem:[%s2551_s6 + $0x1c] sm:$0xf] %v221_v7  ;;  %v223_v8 = vld [vmem:[%s2544_s5 + $0x40] sm:$0xf] }
  0x1b   : > { %v225_v9 = vld [vmem:[%s2544_s5 + $0x48] sm:$0xf]  ;;  %v227_v10 = vld [vmem:[%s2544_s5 + $0x50] sm:$0xf]  ;;  %224 = vst [vmem:[%s2551_s6 + $0x20] sm:$0xf] %v223_v8 }
  0x1c   : > { %226 = vst [vmem:[%s2551_s6 + $0x24] sm:$0xf] %v225_v9  ;;  %228 = vst [vmem:[%s2551_s6 + $0x28] sm:$0xf] %v227_v10  ;;  %v229_v11 = vld [vmem:[%s2544_s5 + $0x58] sm:$0xf] }
  0x1d   : > { %v231_v12 = vld [vmem:[%s2544_s5 + $0x60] sm:$0xf]  ;;  %v233_v13 = vld [vmem:[%s2544_s5 + $0x68] sm:$0xf]  ;;  %230 = vst [vmem:[%s2551_s6 + $0x2c] sm:$0xf] %v229_v11 }
  0x1e   : > { %232 = vst [vmem:[%s2551_s6 + $0x30] sm:$0xf] %v231_v12  ;;  %234 = vst [vmem:[%s2551_s6 + $0x34] sm:$0xf] %v233_v13  ;;  %v235_v14 = vld [vmem:[%s2544_s5 + $0x70] sm:$0xf] }
  0x1f   : > { %v237_v15 = vld [vmem:[%s2544_s5 + $0x78] sm:$0xf]  ;;  %v239_v16 = vld [vmem:[%s2544_s5 + $0x80] sm:$0xf]  ;;  %236 = vst [vmem:[%s2551_s6 + $0x38] sm:$0xf] %v235_v14 }
  0x20   : > { %238 = vst [vmem:[%s2551_s6 + $0x3c] sm:$0xf] %v237_v15  ;;  %240 = vst [vmem:[%s2551_s6 + $0x40] sm:$0xf] %v239_v16  ;;  %v241_v17 = vld [vmem:[%s2544_s5 + $0x88] sm:$0xf] }
  0x21   : > { %v243_v18 = vld [vmem:[%s2544_s5 + $0x90] sm:$0xf]  ;;  %v245_v19 = vld [vmem:[%s2544_s5 + $0x98] sm:$0xf]  ;;  %242 = vst [vmem:[%s2551_s6 + $0x44] sm:$0xf] %v241_v17 }
  0x22   : > { %244 = vst [vmem:[%s2551_s6 + $0x48] sm:$0xf] %v243_v18  ;;  %246 = vst [vmem:[%s2551_s6 + $0x4c] sm:$0xf] %v245_v19  ;;  %v247_v20 = vld [vmem:[%s2544_s5 + $0xa0] sm:$0xf] }
  0x23   : > { %v249_v21 = vld [vmem:[%s2544_s5 + $0xa8] sm:$0xf]  ;;  %v251_v22 = vld [vmem:[%s2544_s5 + $0xb0] sm:$0xf]  ;;  %248 = vst [vmem:[%s2551_s6 + $0x50] sm:$0xf] %v247_v20 }
  0x24   : > { %250 = vst [vmem:[%s2551_s6 + $0x54] sm:$0xf] %v249_v21  ;;  %252 = vst [vmem:[%s2551_s6 + $0x58] sm:$0xf] %v251_v22  ;;  %v253_v23 = vld [vmem:[%s2544_s5 + $0xb8] sm:$0xf] }
  0x25   : > { %v255_v24 = vld [vmem:[%s2544_s5 + $0xc0] sm:$0xf]  ;;  %v257_v25 = vld [vmem:[%s2544_s5 + $0xc8] sm:$0xf]  ;;  %254 = vst [vmem:[%s2551_s6 + $0x5c] sm:$0xf] %v253_v23 }
  0x26   : > { %256 = vst [vmem:[%s2551_s6 + $0x60] sm:$0xf] %v255_v24  ;;  %258 = vst [vmem:[%s2551_s6 + $0x64] sm:$0xf] %v257_v25  ;;  %v259_v26 = vld [vmem:[%s2544_s5 + $0xd0] sm:$0xf] }
  0x27   : > { %v261_v27 = vld [vmem:[%s2544_s5 + $0xd8] sm:$0xf]  ;;  %v263_v28 = vld [vmem:[%s2544_s5 + $0xe0] sm:$0xf]  ;;  %260 = vst [vmem:[%s2551_s6 + $0x68] sm:$0xf] %v259_v26 }
  0x28   : > { %262 = vst [vmem:[%s2551_s6 + $0x6c] sm:$0xf] %v261_v27  ;;  %264 = vst [vmem:[%s2551_s6 + $0x70] sm:$0xf] %v263_v28  ;;  %v265_v29 = vld [vmem:[%s2544_s5 + $0xe8] sm:$0xf] }
  0x29   : > { %v267_v30 = vld [vmem:[%s2544_s5 + $0xf0] sm:$0xf]  ;;  %v269_v31 = vld [vmem:[%s2544_s5 + $0xf8] sm:$0xf]  ;;  %266 = vst [vmem:[%s2551_s6 + $0x74] sm:$0xf] %v265_v29 }
  0x2a   : > { %268 = vst [vmem:[%s2551_s6 + $0x78] sm:$0xf] %v267_v30  ;;  %270 = vst [vmem:[%s2551_s6 + $0x7c] sm:$0xf] %v269_v31  ;;  %v271_v32 = vld [vmem:[%s2544_s5 + $0x100] sm:$0xf] }
  0x2b   : > { %v273_v33 = vld [vmem:[%s2544_s5 + $0x108] sm:$0xf]  ;;  %v275_v34 = vld [vmem:[%s2544_s5 + $0x110] sm:$0xf]  ;;  %272 = vst [vmem:[%s2551_s6 + $0x80] sm:$0xf] %v271_v32 }
  0x2c   : > { %274 = vst [vmem:[%s2551_s6 + $0x84] sm:$0xf] %v273_v33  ;;  %276 = vst [vmem:[%s2551_s6 + $0x88] sm:$0xf] %v275_v34  ;;  %v277_v35 = vld [vmem:[%s2544_s5 + $0x118] sm:$0xf] }
  0x2d   : > { %v279_v36 = vld [vmem:[%s2544_s5 + $0x120] sm:$0xf]  ;;  %v281_v37 = vld [vmem:[%s2544_s5 + $0x128] sm:$0xf]  ;;  %278 = vst [vmem:[%s2551_s6 + $0x8c] sm:$0xf] %v277_v35 }
  0x2e   : > { %280 = vst [vmem:[%s2551_s6 + $0x90] sm:$0xf] %v279_v36  ;;  %282 = vst [vmem:[%s2551_s6 + $0x94] sm:$0xf] %v281_v37  ;;  %v283_v38 = vld [vmem:[%s2544_s5 + $0x130] sm:$0xf] }
  0x2f   : > { %v285_v39 = vld [vmem:[%s2544_s5 + $0x138] sm:$0xf]  ;;  %v287_v40 = vld [vmem:[%s2544_s5 + $0x140] sm:$0xf]  ;;  %284 = vst [vmem:[%s2551_s6 + $0x98] sm:$0xf] %v283_v38 }
  0x30   : > { %286 = vst [vmem:[%s2551_s6 + $0x9c] sm:$0xf] %v285_v39  ;;  %288 = vst [vmem:[%s2551_s6 + $0xa0] sm:$0xf] %v287_v40  ;;  %v289_v41 = vld [vmem:[%s2544_s5 + $0x148] sm:$0xf] }
  0x31   : > { %v291_v42 = vld [vmem:[%s2544_s5 + $0x150] sm:$0xf]  ;;  %v293_v43 = vld [vmem:[%s2544_s5 + $0x158] sm:$0xf]  ;;  %290 = vst [vmem:[%s2551_s6 + $0xa4] sm:$0xf] %v289_v41 }
  0x32   : > { %292 = vst [vmem:[%s2551_s6 + $0xa8] sm:$0xf] %v291_v42  ;;  %294 = vst [vmem:[%s2551_s6 + $0xac] sm:$0xf] %v293_v43  ;;  %v295_v44 = vld [vmem:[%s2544_s5 + $0x160] sm:$0xf] }
  0x33   : > { %v297_v45 = vld [vmem:[%s2544_s5 + $0x168] sm:$0xf]  ;;  %v299_v46 = vld [vmem:[%s2544_s5 + $0x170] sm:$0xf]  ;;  %296 = vst [vmem:[%s2551_s6 + $0xb0] sm:$0xf] %v295_v44 }
  0x34   : > { %298 = vst [vmem:[%s2551_s6 + $0xb4] sm:$0xf] %v297_v45  ;;  %300 = vst [vmem:[%s2551_s6 + $0xb8] sm:$0xf] %v299_v46  ;;  %v301_v47 = vld [vmem:[%s2544_s5 + $0x178] sm:$0xf] }
  0x35   : > { %v303_v48 = vld [vmem:[%s2544_s5 + $0x180] sm:$0xf]  ;;  %v305_v49 = vld [vmem:[%s2544_s5 + $0x188] sm:$0xf]  ;;  %302 = vst [vmem:[%s2551_s6 + $0xbc] sm:$0xf] %v301_v47 }
  0x36   : > { %304 = vst [vmem:[%s2551_s6 + $0xc0] sm:$0xf] %v303_v48  ;;  %306 = vst [vmem:[%s2551_s6 + $0xc4] sm:$0xf] %v305_v49  ;;  %v307_v50 = vld [vmem:[%s2544_s5 + $0x190] sm:$0xf] }
  0x37   : > { %v309_v51 = vld [vmem:[%s2544_s5 + $0x198] sm:$0xf]  ;;  %v311_v52 = vld [vmem:[%s2544_s5 + $0x1a0] sm:$0xf]  ;;  %308 = vst [vmem:[%s2551_s6 + $0xc8] sm:$0xf] %v307_v50 }
  0x38   : > { %310 = vst [vmem:[%s2551_s6 + $0xcc] sm:$0xf] %v309_v51  ;;  %312 = vst [vmem:[%s2551_s6 + $0xd0] sm:$0xf] %v311_v52  ;;  %v313_v53 = vld [vmem:[%s2544_s5 + $0x1a8] sm:$0xf] }
  0x39   : > { %v315_v54 = vld [vmem:[%s2544_s5 + $0x1b0] sm:$0xf]  ;;  %v317_v55 = vld [vmem:[%s2544_s5 + $0x1b8] sm:$0xf]  ;;  %314 = vst [vmem:[%s2551_s6 + $0xd4] sm:$0xf] %v313_v53 }
  0x3a   : > { %316 = vst [vmem:[%s2551_s6 + $0xd8] sm:$0xf] %v315_v54  ;;  %318 = vst [vmem:[%s2551_s6 + $0xdc] sm:$0xf] %v317_v55  ;;  %v319_v56 = vld [vmem:[%s2544_s5 + $0x1c0] sm:$0xf] }
  0x3b   : > { %v321_v57 = vld [vmem:[%s2544_s5 + $0x1c8] sm:$0xf]  ;;  %v323_v58 = vld [vmem:[%s2544_s5 + $0x1d0] sm:$0xf]  ;;  %320 = vst [vmem:[%s2551_s6 + $0xe0] sm:$0xf] %v319_v56 }
  0x3c   : > { %322 = vst [vmem:[%s2551_s6 + $0xe4] sm:$0xf] %v321_v57  ;;  %324 = vst [vmem:[%s2551_s6 + $0xe8] sm:$0xf] %v323_v58  ;;  %v325_v59 = vld [vmem:[%s2544_s5 + $0x1d8] sm:$0xf] }
  0x3d   : > { %v327_v60 = vld [vmem:[%s2544_s5 + $0x1e0] sm:$0xf]  ;;  %v329_v61 = vld [vmem:[%s2544_s5 + $0x1e8] sm:$0xf]  ;;  %326 = vst [vmem:[%s2551_s6 + $0xec] sm:$0xf] %v325_v59 }
  0x3e   : > { %328 = vst [vmem:[%s2551_s6 + $0xf0] sm:$0xf] %v327_v60  ;;  %330 = vst [vmem:[%s2551_s6 + $0xf4] sm:$0xf] %v329_v61  ;;  %v331_v62 = vld [vmem:[%s2544_s5 + $0x1f0] sm:$0xf] }
  0x3f   : > { %v333_v63 = vld [vmem:[%s2544_s5 + $0x1f8] sm:$0xf]  ;;  %v335_v0 = vld [vmem:[%s2544_s5 + $0x200] sm:$0xf]  ;;  %332 = vst [vmem:[%s2551_s6 + $0xf8] sm:$0xf] %v331_v62 }
  0x40   : > { %334 = vst [vmem:[%s2551_s6 + $0xfc] sm:$0xf] %v333_v63  ;;  %336 = vst [vmem:[%s2551_s6 + $0x100] sm:$0xf] %v335_v0  ;;  %v337_v1 = vld [vmem:[%s2544_s5 + $0x208] sm:$0xf] }
  0x41   : > { %v339_v2 = vld [vmem:[%s2544_s5 + $0x210] sm:$0xf]  ;;  %v341_v3 = vld [vmem:[%s2544_s5 + $0x218] sm:$0xf]  ;;  %338 = vst [vmem:[%s2551_s6 + $0x104] sm:$0xf] %v337_v1 }
  0x42   : > { %340 = vst [vmem:[%s2551_s6 + $0x108] sm:$0xf] %v339_v2  ;;  %342 = vst [vmem:[%s2551_s6 + $0x10c] sm:$0xf] %v341_v3  ;;  %v343_v4 = vld [vmem:[%s2544_s5 + $0x220] sm:$0xf] }
  0x43   : > { %v345_v5 = vld [vmem:[%s2544_s5 + $0x228] sm:$0xf]  ;;  %v347_v6 = vld [vmem:[%s2544_s5 + $0x230] sm:$0xf]  ;;  %344 = vst [vmem:[%s2551_s6 + $0x110] sm:$0xf] %v343_v4 }
  0x44   : > { %346 = vst [vmem:[%s2551_s6 + $0x114] sm:$0xf] %v345_v5  ;;  %348 = vst [vmem:[%s2551_s6 + $0x118] sm:$0xf] %v347_v6  ;;  %v349_v7 = vld [vmem:[%s2544_s5 + $0x238] sm:$0xf] }
  0x45   : > { %v351_v8 = vld [vmem:[%s2544_s5 + $0x240] sm:$0xf]  ;;  %v353_v9 = vld [vmem:[%s2544_s5 + $0x248] sm:$0xf]  ;;  %350 = vst [vmem:[%s2551_s6 + $0x11c] sm:$0xf] %v349_v7 }
  0x46   : > { %352 = vst [vmem:[%s2551_s6 + $0x120] sm:$0xf] %v351_v8  ;;  %354 = vst [vmem:[%s2551_s6 + $0x124] sm:$0xf] %v353_v9  ;;  %v355_v10 = vld [vmem:[%s2544_s5 + $0x250] sm:$0xf] }
  0x47   : > { %v357_v11 = vld [vmem:[%s2544_s5 + $0x258] sm:$0xf]  ;;  %v359_v12 = vld [vmem:[%s2544_s5 + $0x260] sm:$0xf]  ;;  %356 = vst [vmem:[%s2551_s6 + $0x128] sm:$0xf] %v355_v10 }
  0x48   : > { %358 = vst [vmem:[%s2551_s6 + $0x12c] sm:$0xf] %v357_v11  ;;  %360 = vst [vmem:[%s2551_s6 + $0x130] sm:$0xf] %v359_v12  ;;  %v361_v13 = vld [vmem:[%s2544_s5 + $0x268] sm:$0xf] }
  0x49   : > { %v363_v14 = vld [vmem:[%s2544_s5 + $0x270] sm:$0xf]  ;;  %v365_v15 = vld [vmem:[%s2544_s5 + $0x278] sm:$0xf]  ;;  %362 = vst [vmem:[%s2551_s6 + $0x134] sm:$0xf] %v361_v13 }
  0x4a   : > { %364 = vst [vmem:[%s2551_s6 + $0x138] sm:$0xf] %v363_v14  ;;  %366 = vst [vmem:[%s2551_s6 + $0x13c] sm:$0xf] %v365_v15  ;;  %v367_v16 = vld [vmem:[%s2544_s5 + $0x280] sm:$0xf] }
  0x4b   : > { %v369_v17 = vld [vmem:[%s2544_s5 + $0x288] sm:$0xf]  ;;  %v371_v18 = vld [vmem:[%s2544_s5 + $0x290] sm:$0xf]  ;;  %368 = vst [vmem:[%s2551_s6 + $0x140] sm:$0xf] %v367_v16 }
  0x4c   : > { %370 = vst [vmem:[%s2551_s6 + $0x144] sm:$0xf] %v369_v17  ;;  %372 = vst [vmem:[%s2551_s6 + $0x148] sm:$0xf] %v371_v18  ;;  %v373_v19 = vld [vmem:[%s2544_s5 + $0x298] sm:$0xf] }
  0x4d   : > { %v375_v20 = vld [vmem:[%s2544_s5 + $0x2a0] sm:$0xf]  ;;  %v377_v21 = vld [vmem:[%s2544_s5 + $0x2a8] sm:$0xf]  ;;  %374 = vst [vmem:[%s2551_s6 + $0x14c] sm:$0xf] %v373_v19 }
  0x4e   : > { %376 = vst [vmem:[%s2551_s6 + $0x150] sm:$0xf] %v375_v20  ;;  %378 = vst [vmem:[%s2551_s6 + $0x154] sm:$0xf] %v377_v21  ;;  %v379_v22 = vld [vmem:[%s2544_s5 + $0x2b0] sm:$0xf] }
  0x4f   : > { %v381_v23 = vld [vmem:[%s2544_s5 + $0x2b8] sm:$0xf]  ;;  %v383_v24 = vld [vmem:[%s2544_s5 + $0x2c0] sm:$0xf]  ;;  %380 = vst [vmem:[%s2551_s6 + $0x158] sm:$0xf] %v379_v22 }
  0x50   : > { %382 = vst [vmem:[%s2551_s6 + $0x15c] sm:$0xf] %v381_v23  ;;  %384 = vst [vmem:[%s2551_s6 + $0x160] sm:$0xf] %v383_v24  ;;  %v385_v25 = vld [vmem:[%s2544_s5 + $0x2c8] sm:$0xf] }
  0x51   : > { %v387_v26 = vld [vmem:[%s2544_s5 + $0x2d0] sm:$0xf]  ;;  %v389_v27 = vld [vmem:[%s2544_s5 + $0x2d8] sm:$0xf]  ;;  %386 = vst [vmem:[%s2551_s6 + $0x164] sm:$0xf] %v385_v25 }
  0x52   : > { %388 = vst [vmem:[%s2551_s6 + $0x168] sm:$0xf] %v387_v26  ;;  %390 = vst [vmem:[%s2551_s6 + $0x16c] sm:$0xf] %v389_v27  ;;  %v391_v28 = vld [vmem:[%s2544_s5 + $0x2e0] sm:$0xf] }
  0x53   : > { %v393_v29 = vld [vmem:[%s2544_s5 + $0x2e8] sm:$0xf]  ;;  %v395_v30 = vld [vmem:[%s2544_s5 + $0x2f0] sm:$0xf]  ;;  %392 = vst [vmem:[%s2551_s6 + $0x170] sm:$0xf] %v391_v28 }
  0x54   : > { %394 = vst [vmem:[%s2551_s6 + $0x174] sm:$0xf] %v393_v29  ;;  %396 = vst [vmem:[%s2551_s6 + $0x178] sm:$0xf] %v395_v30  ;;  %v397_v31 = vld [vmem:[%s2544_s5 + $0x2f8] sm:$0xf] }
  0x55   : > { %v399_v32 = vld [vmem:[%s2544_s5 + $0x300] sm:$0xf]  ;;  %v401_v33 = vld [vmem:[%s2544_s5 + $0x308] sm:$0xf]  ;;  %398 = vst [vmem:[%s2551_s6 + $0x17c] sm:$0xf] %v397_v31 }
  0x56   : > { %400 = vst [vmem:[%s2551_s6 + $0x180] sm:$0xf] %v399_v32  ;;  %402 = vst [vmem:[%s2551_s6 + $0x184] sm:$0xf] %v401_v33  ;;  %v403_v34 = vld [vmem:[%s2544_s5 + $0x310] sm:$0xf] }
  0x57   : > { %v405_v35 = vld [vmem:[%s2544_s5 + $0x318] sm:$0xf]  ;;  %v407_v36 = vld [vmem:[%s2544_s5 + $0x320] sm:$0xf]  ;;  %404 = vst [vmem:[%s2551_s6 + $0x188] sm:$0xf] %v403_v34 }
  0x58   : > { %406 = vst [vmem:[%s2551_s6 + $0x18c] sm:$0xf] %v405_v35  ;;  %408 = vst [vmem:[%s2551_s6 + $0x190] sm:$0xf] %v407_v36  ;;  %v409_v37 = vld [vmem:[%s2544_s5 + $0x328] sm:$0xf] }
  0x59   : > { %v411_v38 = vld [vmem:[%s2544_s5 + $0x330] sm:$0xf]  ;;  %v413_v39 = vld [vmem:[%s2544_s5 + $0x338] sm:$0xf]  ;;  %410 = vst [vmem:[%s2551_s6 + $0x194] sm:$0xf] %v409_v37 }
  0x5a   : > { %412 = vst [vmem:[%s2551_s6 + $0x198] sm:$0xf] %v411_v38  ;;  %414 = vst [vmem:[%s2551_s6 + $0x19c] sm:$0xf] %v413_v39  ;;  %v415_v40 = vld [vmem:[%s2544_s5 + $0x340] sm:$0xf] }
  0x5b   : > { %v417_v41 = vld [vmem:[%s2544_s5 + $0x348] sm:$0xf]  ;;  %v419_v42 = vld [vmem:[%s2544_s5 + $0x350] sm:$0xf]  ;;  %416 = vst [vmem:[%s2551_s6 + $0x1a0] sm:$0xf] %v415_v40 }
  0x5c   : > { %418 = vst [vmem:[%s2551_s6 + $0x1a4] sm:$0xf] %v417_v41  ;;  %420 = vst [vmem:[%s2551_s6 + $0x1a8] sm:$0xf] %v419_v42  ;;  %v421_v43 = vld [vmem:[%s2544_s5 + $0x358] sm:$0xf] }
  0x5d   : > { %v423_v44 = vld [vmem:[%s2544_s5 + $0x360] sm:$0xf]  ;;  %v425_v45 = vld [vmem:[%s2544_s5 + $0x368] sm:$0xf]  ;;  %422 = vst [vmem:[%s2551_s6 + $0x1ac] sm:$0xf] %v421_v43 }
  0x5e   : > { %424 = vst [vmem:[%s2551_s6 + $0x1b0] sm:$0xf] %v423_v44  ;;  %426 = vst [vmem:[%s2551_s6 + $0x1b4] sm:$0xf] %v425_v45  ;;  %v427_v46 = vld [vmem:[%s2544_s5 + $0x370] sm:$0xf] }
  0x5f   : > { %v429_v47 = vld [vmem:[%s2544_s5 + $0x378] sm:$0xf]  ;;  %v431_v48 = vld [vmem:[%s2544_s5 + $0x380] sm:$0xf]  ;;  %428 = vst [vmem:[%s2551_s6 + $0x1b8] sm:$0xf] %v427_v46 }
  0x60   : > { %430 = vst [vmem:[%s2551_s6 + $0x1bc] sm:$0xf] %v429_v47  ;;  %432 = vst [vmem:[%s2551_s6 + $0x1c0] sm:$0xf] %v431_v48  ;;  %v433_v49 = vld [vmem:[%s2544_s5 + $0x388] sm:$0xf] }
  0x61   : > { %v435_v50 = vld [vmem:[%s2544_s5 + $0x390] sm:$0xf]  ;;  %v437_v51 = vld [vmem:[%s2544_s5 + $0x398] sm:$0xf]  ;;  %434 = vst [vmem:[%s2551_s6 + $0x1c4] sm:$0xf] %v433_v49 }
  0x62   : > { %436 = vst [vmem:[%s2551_s6 + $0x1c8] sm:$0xf] %v435_v50  ;;  %438 = vst [vmem:[%s2551_s6 + $0x1cc] sm:$0xf] %v437_v51  ;;  %v439_v52 = vld [vmem:[%s2544_s5 + $0x3a0] sm:$0xf] }
  0x63   : > { %v441_v53 = vld [vmem:[%s2544_s5 + $0x3a8] sm:$0xf]  ;;  %v443_v54 = vld [vmem:[%s2544_s5 + $0x3b0] sm:$0xf]  ;;  %440 = vst [vmem:[%s2551_s6 + $0x1d0] sm:$0xf] %v439_v52 }
  0x64   : > { %442 = vst [vmem:[%s2551_s6 + $0x1d4] sm:$0xf] %v441_v53  ;;  %444 = vst [vmem:[%s2551_s6 + $0x1d8] sm:$0xf] %v443_v54  ;;  %v445_v55 = vld [vmem:[%s2544_s5 + $0x3b8] sm:$0xf] }
  0x65   : > { %v447_v56 = vld [vmem:[%s2544_s5 + $0x3c0] sm:$0xf]  ;;  %v449_v57 = vld [vmem:[%s2544_s5 + $0x3c8] sm:$0xf]  ;;  %446 = vst [vmem:[%s2551_s6 + $0x1dc] sm:$0xf] %v445_v55 }
  0x66   : > { %448 = vst [vmem:[%s2551_s6 + $0x1e0] sm:$0xf] %v447_v56  ;;  %450 = vst [vmem:[%s2551_s6 + $0x1e4] sm:$0xf] %v449_v57  ;;  %v451_v58 = vld [vmem:[%s2544_s5 + $0x3d0] sm:$0xf] }
  0x67   : > { %v453_v59 = vld [vmem:[%s2544_s5 + $0x3d8] sm:$0xf]  ;;  %v455_v60 = vld [vmem:[%s2544_s5 + $0x3e0] sm:$0xf]  ;;  %452 = vst [vmem:[%s2551_s6 + $0x1e8] sm:$0xf] %v451_v58 }
  0x68   : > { %454 = vst [vmem:[%s2551_s6 + $0x1ec] sm:$0xf] %v453_v59  ;;  %456 = vst [vmem:[%s2551_s6 + $0x1f0] sm:$0xf] %v455_v60  ;;  %v457_v61 = vld [vmem:[%s2544_s5 + $0x3e8] sm:$0xf] }
  0x69   : > { %v459_v62 = vld [vmem:[%s2544_s5 + $0x3f0] sm:$0xf]  ;;  %v461_v63 = vld [vmem:[%s2544_s5 + $0x3f8] sm:$0xf]  ;;  %458 = vst [vmem:[%s2551_s6 + $0x1f4] sm:$0xf] %v457_v61 }
  0x6a   : > { %460 = vst [vmem:[%s2551_s6 + $0x1f8] sm:$0xf] %v459_v62  ;;  %462 = vst [vmem:[%s2551_s6 + $0x1fc] sm:$0xf] %v461_v63  ;;  %v463_v0 = vld [vmem:[%s2544_s5 + $0x400] sm:$0xf] }
  0x6b   : > { %v465_v1 = vld [vmem:[%s2544_s5 + $0x408] sm:$0xf]  ;;  %v467_v2 = vld [vmem:[%s2544_s5 + $0x410] sm:$0xf]  ;;  %464 = vst [vmem:[%s2551_s6 + $0x200] sm:$0xf] %v463_v0 }
  0x6c   : > { %466 = vst [vmem:[%s2551_s6 + $0x204] sm:$0xf] %v465_v1  ;;  %468 = vst [vmem:[%s2551_s6 + $0x208] sm:$0xf] %v467_v2  ;;  %v469_v3 = vld [vmem:[%s2544_s5 + $0x418] sm:$0xf] }
  0x6d   : > { %v471_v4 = vld [vmem:[%s2544_s5 + $0x420] sm:$0xf]  ;;  %v473_v5 = vld [vmem:[%s2544_s5 + $0x428] sm:$0xf]  ;;  %470 = vst [vmem:[%s2551_s6 + $0x20c] sm:$0xf] %v469_v3 }
  0x6e   : > { %472 = vst [vmem:[%s2551_s6 + $0x210] sm:$0xf] %v471_v4  ;;  %474 = vst [vmem:[%s2551_s6 + $0x214] sm:$0xf] %v473_v5  ;;  %v475_v6 = vld [vmem:[%s2544_s5 + $0x430] sm:$0xf] }
  0x6f   : > { %v477_v7 = vld [vmem:[%s2544_s5 + $0x438] sm:$0xf]  ;;  %v479_v8 = vld [vmem:[%s2544_s5 + $0x440] sm:$0xf]  ;;  %476 = vst [vmem:[%s2551_s6 + $0x218] sm:$0xf] %v475_v6 }
  0x70   : > { %478 = vst [vmem:[%s2551_s6 + $0x21c] sm:$0xf] %v477_v7  ;;  %480 = vst [vmem:[%s2551_s6 + $0x220] sm:$0xf] %v479_v8  ;;  %v481_v9 = vld [vmem:[%s2544_s5 + $0x448] sm:$0xf] }
  0x71   : > { %v483_v10 = vld [vmem:[%s2544_s5 + $0x450] sm:$0xf]  ;;  %v485_v11 = vld [vmem:[%s2544_s5 + $0x458] sm:$0xf]  ;;  %482 = vst [vmem:[%s2551_s6 + $0x224] sm:$0xf] %v481_v9 }
  0x72   : > { %484 = vst [vmem:[%s2551_s6 + $0x228] sm:$0xf] %v483_v10  ;;  %486 = vst [vmem:[%s2551_s6 + $0x22c] sm:$0xf] %v485_v11  ;;  %v487_v12 = vld [vmem:[%s2544_s5 + $0x460] sm:$0xf] }
  0x73   : > { %v489_v13 = vld [vmem:[%s2544_s5 + $0x468] sm:$0xf]  ;;  %v491_v14 = vld [vmem:[%s2544_s5 + $0x470] sm:$0xf]  ;;  %488 = vst [vmem:[%s2551_s6 + $0x230] sm:$0xf] %v487_v12 }
  0x74   : > { %490 = vst [vmem:[%s2551_s6 + $0x234] sm:$0xf] %v489_v13  ;;  %492 = vst [vmem:[%s2551_s6 + $0x238] sm:$0xf] %v491_v14  ;;  %v493_v15 = vld [vmem:[%s2544_s5 + $0x478] sm:$0xf] }
  0x75   : > { %494 = vst [vmem:[%s2551_s6 + $0x23c] sm:$0xf] %v493_v15 }
  0x76 PF: > { %p2030_p8 = scmp.ge.s32.totalorder %s2468_s19, 1  ;;  %p816_p9 = scmp.lt.s32.totalorder %s2468_s19, 3 }
  0x78   : > { %p817_p10 = pnand %p2030_p8, %p816_p9 }
  0x79   : > { %s823_s7 = sand.u32 (!%p817_p10), 1, %s2452_s15   ;;  %v2366_v16 = vld [vmem:[%s3000_s0 + $0x4] ss:$36 sps:$4 sm:$0xff] (!%p817_p10)   ;;  %v2369_v17 = vld [vmem:[%s3000_s0 + $0xc] ss:$36 sps:$4 sm:$0xff] (!%p817_p10)   ;;  %p866_p11 = scmp.lt.s32.totalorder (!%p817_p10), %s2460_s17, 1 }
  0x7a   : > { %820 = sbr.rel (%p817_p10) target bundleno = 459 (0x1cb), region = 73  ;;  %1594 = vmatprep.mubr.bf16.mxu0 (!%p817_p10), %v2366_v16  ;;  %1643 = vmatprep.mubr.bf16.mxu1 (!%p817_p10), %v2369_v17  ;;  %v2364_v48 = vld [vmem:[%s3000_s0] ss:$36 sps:$4 sm:$0xff] (!%p817_p10)   ;;  %v2367_v50 = vld [vmem:[%s3000_s0 + $0x8] ss:$36 sps:$4 sm:$0xff] (!%p817_p10)   ;;  %s2031_s28 = sshll.u32 (!%p817_p10), %s823_s7, 4 }
  0x7b   : > { %s2290_s8 = smul.u32 (!%p817_p10), 576, %s823_s7  ;;  %v2391_v52 = vld [vmem:[%s3000_s0 + $0x4c] ss:$36 sps:$4 sm:$0xff] (!%p817_p10)   ;;  %v2393_v10 = vld [vmem:[%s3000_s0 + $0x54] ss:$36 sps:$4 sm:$0xff] (!%p817_p10)   ;;  %s858_s29 = scalar_lea.vmem (!%p817_p10), [#allocation3], %s2031_s28 }
  0x7c   : > { %v2396_v12 = vld [vmem:[%s3000_s0 + $0x48] ss:$36 sps:$4 sm:$0xff] (!%p817_p10)   ;;  %v2397_v13 = vld [vmem:[%s3000_s0 + $0x50] ss:$36 sps:$4 sm:$0xff] (!%p817_p10)  }
  0x7d   : > { %s2847_s13 = scalar_lea.vmem (!%p817_p10), [#allocation2], %s2290_s8 }
  0x7e   : > { %v2332_v18 = vld [vmem:[%s2847_s13 + $0x40] sm:$0xff] (!%p817_p10)   ;;  %v2336_v22 = vld [vmem:[%s2847_s13 + $0x48] sm:$0xff] (!%p817_p10)   ;;  %v2340_v26 = vld [vmem:[%s2847_s13 + $0x50] sm:$0xff] (!%p817_p10)  }
  0x7f   : > { %v2333_v19 = vld [vmem:[%s2847_s13 + $0xc0] sm:$0xff] (!%p817_p10)   ;;  %2147 = vmatprep.subr.bf16.mxu0 (!%p817_p10), %v2332_v18  ;;  %v2337_v23 = vld [vmem:[%s2847_s13 + $0xc8] sm:$0xff] (!%p817_p10)   ;;  %v2341_v27 = vld [vmem:[%s2847_s13 + $0xd0] sm:$0xff] (!%p817_p10)  }
  0x80   : > { %v2334_v20 = vld [vmem:[%s2847_s13] sm:$0xff] (!%p817_p10)   ;;  %2175 = vmatprep.subr.bf16.mxu1 (!%p817_p10), %v2333_v19  ;;  %v2338_v24 = vld [vmem:[%s2847_s13 + $0x8] sm:$0xff] (!%p817_p10)   ;;  %v2342_v28 = vld [vmem:[%s2847_s13 + $0x10] sm:$0xff] (!%p817_p10)  }
  0x81   : > { %v2335_v21 = vld [vmem:[%s2847_s13 + $0x80] sm:$0xff]   ;;  %2148 = vmatpush3.bf16.msra.mxu0 %v2334_v20  ;;  %v2339_v25 = vld [vmem:[%s2847_s13 + $0x88] sm:$0xff]   ;;  %v2343_v29 = vld [vmem:[%s2847_s13 + $0x90] sm:$0xff]   ;;  %s2133_s15 = sshll.u32 (%p2531_p6), %s2460_s17, 2 }
  0x82   : > { %2176 = vmatpush3.bf16.msra.mxu1 %v2335_v21  ;;  %2149 = vmatprep.subr.bf16.mxu0 %v2336_v22  ;;  %v2344_v30 = vld [vmem:[%s2847_s13 + $0x58] sm:$0xff]   ;;  %v2348_v34 = vld [vmem:[%s2847_s13 + $0x60] sm:$0xff]   ;;  %v2352_v38 = vld [vmem:[%s2847_s13 + $0x68] sm:$0xff]   ;;  %s1872_s5 = scalar_lea.vmem (%p2531_p6), %s3004_s4, %s2133_s15 }
  0x83   : > { %2177 = vmatprep.subr.bf16.mxu1 %v2337_v23  ;;  %v2345_v31 = vld [vmem:[%s2847_s13 + $0xd8] sm:$0xff]   ;;  %v2349_v35 = vld [vmem:[%s2847_s13 + $0xe0] sm:$0xff]   ;;  %v2353_v39 = vld [vmem:[%s2847_s13 + $0xe8] sm:$0xff]  }
  0x84   : > { %v2346_v32 = vld [vmem:[%s2847_s13 + $0x18] sm:$0xff]   ;;  %v2350_v36 = vld [vmem:[%s2847_s13 + $0x20] sm:$0xff]   ;;  %v2354_v40 = vld [vmem:[%s2847_s13 + $0x28] sm:$0xff]  }
  0x85   : > { %2150 = vmatpush3.bf16.msra.mxu0 %v2338_v24  ;;  %v2347_v33 = vld [vmem:[%s2847_s13 + $0x98] sm:$0xff]   ;;  %v2351_v37 = vld [vmem:[%s2847_s13 + $0xa0] sm:$0xff]   ;;  %v2355_v41 = vld [vmem:[%s2847_s13 + $0xa8] sm:$0xff]  }
  0x86   : > { %2178 = vmatpush3.bf16.msra.mxu1 %v2339_v25  ;;  %2151 = vmatprep.subr.bf16.mxu0 %v2340_v26  ;;  %v2356_v42 = vld [vmem:[%s2847_s13 + $0x70] sm:$0xff]   ;;  %v2360_v46 = vld [vmem:[%s2847_s13 + $0x78] sm:$0xff]   ;;  %v2370_v53 = vld [vmem:[%s2847_s13 + $0x140] sm:$0xff]  }
  0x87   : > { %2179 = vmatprep.subr.bf16.mxu1 %v2341_v27  ;;  %v2357_v43 = vld [vmem:[%s2847_s13 + $0xf0] sm:$0xff]   ;;  %v2361_v47 = vld [vmem:[%s2847_s13 + $0xf8] sm:$0xff]   ;;  %v2371_v54 = vld [vmem:[%s2847_s13 + $0x100] sm:$0xff]  }
  0x88   : > { %v2358_v44 = vld [vmem:[%s2847_s13 + $0x30] sm:$0xff]   ;;  %v2362_v49 = vld [vmem:[%s2847_s13 + $0x38] sm:$0xff]   ;;  %v2372_v55 = vld [vmem:[%s2847_s13 + $0x1c0] sm:$0xff]  }
  0x89   : > { %2152 = vmatpush3.bf16.msra.mxu0 %v2342_v28  ;;  %v2359_v45 = vld [vmem:[%s2847_s13 + $0xb0] sm:$0xff]   ;;  %v2363_v51 = vld [vmem:[%s2847_s13 + $0xb8] sm:$0xff]   ;;  %v2373_v56 = vld [vmem:[%s2847_s13 + $0x180] sm:$0xff]  }
  0x8a   : > { %2180 = vmatpush3.bf16.msra.mxu1 %v2343_v29  ;;  %2153 = vmatprep.subr.bf16.mxu0 %v2344_v30  ;;  %v2374_v57 = vld [vmem:[%s2847_s13 + $0x148] sm:$0xff]   ;;  %v2378_v61 = vld [vmem:[%s2847_s13 + $0x150] sm:$0xff]   ;;  %v2382_v1 = vld [vmem:[%s2847_s13 + $0x158] sm:$0xff]  }
  0x8b   : > { %2181 = vmatprep.subr.bf16.mxu1 %v2345_v31  ;;  %v2375_v58 = vld [vmem:[%s2847_s13 + $0x108] sm:$0xff]   ;;  %v2379_v62 = vld [vmem:[%s2847_s13 + $0x110] sm:$0xff]   ;;  %v2383_v2 = vld [vmem:[%s2847_s13 + $0x118] sm:$0xff]  }
  0x8c   : > { %v2376_v59 = vld [vmem:[%s2847_s13 + $0x1c8] sm:$0xff]   ;;  %v2380_v63 = vld [vmem:[%s2847_s13 + $0x1d0] sm:$0xff]   ;;  %v2384_v3 = vld [vmem:[%s2847_s13 + $0x1d8] sm:$0xff]  }
  0x8d   : > { %2154 = vmatpush3.bf16.msra.mxu0 %v2346_v32  ;;  %v2377_v60 = vld [vmem:[%s2847_s13 + $0x188] sm:$0xff]   ;;  %v2381_v0 = vld [vmem:[%s2847_s13 + $0x190] sm:$0xff]   ;;  %v2385_v4 = vld [vmem:[%s2847_s13 + $0x198] sm:$0xff]  }
  0x8e   : > { %2182 = vmatpush3.bf16.msra.mxu1 %v2347_v33  ;;  %2155 = vmatprep.subr.bf16.mxu0 %v2348_v34  ;;  %v2386_v5 = vld [vmem:[%s2847_s13 + $0x160] sm:$0xff]   ;;  %v2390_v9 = vld [vmem:[%s2847_s13 + $0x168] sm:$0xff]   ;;  %v2400_v16 = vld [vmem:[%s2847_s13 + $0x170] sm:$0xff]  }
  0x8f   : > { %2183 = vmatprep.subr.bf16.mxu1 %v2349_v35  ;;  %v2387_v6 = vld [vmem:[%s2847_s13 + $0x120] sm:$0xff]   ;;  %v2395_v11 = vld [vmem:[%s2847_s13 + $0x128] sm:$0xff]   ;;  %v2401_v17 = vld [vmem:[%s2847_s13 + $0x130] sm:$0xff]  }
  0x90   : > { %v2388_v7 = vld [vmem:[%s2847_s13 + $0x1e0] sm:$0xff]   ;;  %v2398_v14 = vld [vmem:[%s2847_s13 + $0x1e8] sm:$0xff]   ;;  %v2402_v18 = vld [vmem:[%s2847_s13 + $0x1f0] sm:$0xff]  }
  0x91   : > { %2156 = vmatpush3.bf16.msra.mxu0 %v2350_v36  ;;  %v2389_v8 = vld [vmem:[%s2847_s13 + $0x1a0] sm:$0xff]   ;;  %v2399_v15 = vld [vmem:[%s2847_s13 + $0x1a8] sm:$0xff]   ;;  %v2403_v19 = vld [vmem:[%s2847_s13 + $0x1b0] sm:$0xff]  }
  0x92   : > { %2184 = vmatpush3.bf16.msra.mxu1 %v2351_v37  ;;  %2157 = vmatprep.subr.bf16.mxu0 %v2352_v38  ;;  %v2404_v20 = vld [vmem:[%s2847_s13 + $0x178] sm:$0xff]   ;;  %v2407_v23 = vld [vmem:[%s3000_s0 + $0x10] ss:$36 sps:$4 sm:$0xff]   ;;  %v2411_v26 = vld [vmem:[%s2847_s13 + $0x200] sm:$0xff]  }
  0x93   : > { %2185 = vmatprep.subr.bf16.mxu1 %v2353_v39  ;;  %v2405_v21 = vld [vmem:[%s2847_s13 + $0x138] sm:$0xff]   ;;  %v2415_v29 = vld [vmem:[%s2847_s13 + $0x208] sm:$0xff]   ;;  %v2419_v32 = vld [vmem:[%s2847_s13 + $0x210] sm:$0xff]  }
  0x94   : > { %v2406_v22 = vld [vmem:[%s2847_s13 + $0x1f8] sm:$0xff]   ;;  %v2420_v33 = vld [vmem:[%s3000_s0 + $0x64] ss:$36 sps:$4 sm:$0xff]   ;;  %v2426_v39 = vld [vmem:[%s2847_s13 + $0x230] sm:$0xff]  }
  0x95   : > { %2158 = vmatpush3.bf16.msra.mxu0 %v2354_v40  ;;  %v2409_v24 = vld [vmem:[%s3000_s0 + $0x14] ss:$36 sps:$4 sm:$0xff]   ;;  %v2414_v28 = vld [vmem:[%s3000_s0 + $0x1c] ss:$36 sps:$4 sm:$0xff]   ;;  %v2425_v38 = vld [vmem:[%s2847_s13 + $0x228] sm:$0xff]  }
  0x96   : > { %2186 = vmatpush3.bf16.msra.mxu1 %v2355_v41  ;;  %2159 = vmatprep.subr.bf16.mxu0 %v2356_v42  ;;  %v2410_v25 = vld [vmem:[%s2847_s13 + $0x1b8] sm:$0xff]   ;;  %v2422_v34 = vld [vmem:[%s3000_s0 + $0x60] ss:$36 sps:$4 sm:$0xff]   ;;  %v2429_v41 = vld [vmem:[%s3000_s0 + $0x68] ss:$36 sps:$4 sm:$0xff]  }
  0x97   : > { %2187 = vmatprep.subr.bf16.mxu1 %v2357_v43  ;;  %v2412_v27 = vld [vmem:[%s3000_s0 + $0x18] ss:$36 sps:$4 sm:$0xff]   ;;  %v2424_v36 = vld [vmem:[%s2847_s13 + $0x220] sm:$0xff]  }
  0x98   : > { %v2416_v30 = vld [vmem:[%s3000_s0 + $0x5c] ss:$36 sps:$4 sm:$0xff]  }
  0x99   : > { %2160 = vmatpush3.bf16.msra.mxu0 %v2358_v44  ;;  %v2418_v31 = vld [vmem:[%s3000_s0 + $0x58] ss:$36 sps:$4 sm:$0xff]   ;;  %v2428_v37 = vld [vmem:[%s3000_s0 + $0x20] ss:$36 sps:$4 sm:$0xff]  }
  0x9a   : > { %2188 = vmatpush3.bf16.msra.mxu1 %v2359_v45  ;;  %2161 = vmatprep.subr.bf16.mxu0 %v2360_v46  ;;  %v2423_v35 = vld [vmem:[%s2847_s13 + $0x218] sm:$0xff]  }
  0x9b   : > { %2189 = vmatprep.subr.bf16.mxu1 %v2361_v47  ;;  %v2427_v40 = vld [vmem:[%s2847_s13 + $0x238] sm:$0xff]   ;;  %s867_s13 = scalar_select %p866_p11, %s2460_s17, 1 }
  0x9d   : > { %2162 = vmatpush3.bf16.msra.mxu0 %v2362_v49  ;;  %s868_s22 = scalar_lea.vmem %s3002_s2, %s867_s13  ;;  %s871_s27 = scalar_lea.vmem %s3003_s3, %s867_s13 }
  0x9e   : > { %2190 = vmatpush3.bf16.msra.mxu1 %v2363_v51  ;;  %2203 = vmatprep.subr.bf16.mxu0 %v2370_v53 }
  0x9f   : > { %2231 = vmatprep.subr.bf16.mxu1 %v2372_v55 }
  0xa0   : > { %1595 = vmatmul.mubr.bf16.vlgmr.msra.gmra.mrb[0].mxu0 %v2364_v48 }
  0xa1   : > { %1644 = vmatmul.mubr.bf16.vlgmr.msra.gmra.mrb[0].mxu1 %v2367_v50  ;;  %2204 = vmatpush3.bf16.msra.mxu0 %v2371_v54 }
  0xa2   : > { %1602 = vmatprep.mubr.bf16.mxu0 %v2391_v52  ;;  %2232 = vmatpush3.bf16.msra.mxu1 %v2373_v56 }
  0xa3   : > { %2205 = vmatprep.subr.bf16.mxu0 %v2374_v57  ;;  %2233 = vmatprep.subr.bf16.mxu1 %v2376_v59 }
  0xa4   : > { %1651 = vmatprep.mubr.bf16.mxu1 %v2393_v10 }
  0xa5   : > { %2206 = vmatpush3.bf16.msra.mxu0 %v2375_v58 }
  0xa6   : > { %2234 = vmatpush3.bf16.msra.mxu1 %v2377_v60  ;;  %2207 = vmatprep.subr.bf16.mxu0 %v2378_v61 }
  0xa7   : > { %2235 = vmatprep.subr.bf16.mxu1 %v2380_v63 }
  0xa8   : > { %1603 = vmatmul.mubr.bf16.gmra.mrb[4].mxu0 %v2396_v12 }
  0xa9   : > { %2208 = vmatpush3.bf16.msra.mxu0 %v2379_v62  ;;  %1652 = vmatmul.mubr.bf16.gmra.mrb[4].mxu1 %v2397_v13 }
  0xaa   : > { %2236 = vmatpush3.bf16.msra.mxu1 %v2381_v0  ;;  %2209 = vmatprep.subr.bf16.mxu0 %v2382_v1 }
  0xab   : > { %2237 = vmatprep.subr.bf16.mxu1 %v2384_v3  ;;  %1692 = vmatprep.mubr.bf16.mxu0 %v2409_v24 }
  0xac   : > { %1741 = vmatprep.mubr.bf16.mxu1 %v2414_v28 }
  0xad   : > { %2210 = vmatpush3.bf16.msra.mxu0 %v2383_v2 }
  0xae   : > { %2238 = vmatpush3.bf16.msra.mxu1 %v2385_v4  ;;  %2211 = vmatprep.subr.bf16.mxu0 %v2386_v5 }
  0xaf   : > { %2239 = vmatprep.subr.bf16.mxu1 %v2388_v7 }
  0xb1   : > { %2212 = vmatpush3.bf16.msra.mxu0 %v2387_v6 }
  0xb2   : > { %2240 = vmatpush3.bf16.msra.mxu1 %v2389_v8  ;;  %2213 = vmatprep.subr.bf16.mxu0 %v2390_v9 }
  0xb3   : > { %2241 = vmatprep.subr.bf16.mxu1 %v2398_v14 }
  0xb5   : > { %2214 = vmatpush3.bf16.msra.mxu0 %v2395_v11 }
  0xb6   : > { %2242 = vmatpush3.bf16.msra.mxu1 %v2399_v15  ;;  %2215 = vmatprep.subr.bf16.mxu0 %v2400_v16 }
  0xb7   : > { %2243 = vmatprep.subr.bf16.mxu1 %v2402_v18 }
  0xb9   : > { %2216 = vmatpush3.bf16.msra.mxu0 %v2401_v17 }
  0xba   : > { %2244 = vmatpush3.bf16.msra.mxu1 %v2403_v19  ;;  %2217 = vmatprep.subr.bf16.mxu0 %v2404_v20 }
  0xbb   : > { %2245 = vmatprep.subr.bf16.mxu1 %v2406_v22 }
  0xbd   : > { %2218 = vmatpush3.bf16.msra.mxu0 %v2405_v21 }
  0xbe   : > { %2246 = vmatpush3.bf16.msra.mxu1 %v2410_v25  ;;  %2269 = vmatprep.subr.bf16.mxu0 %v2411_v26 }
  0xc0   : > { %1693 = vmatmul.mubr.bf16.vlgmr.msra.gmra.mrb[8].mxu0 %v2407_v23 }
  0xc1   : > { %2270 = vmatpush3.bf16.msra.mxu0 %v2411_v26  ;;  %1742 = vmatmul.mubr.bf16.vlgmr.msra.gmra.mrb[8].mxu1 %v2412_v27 }
  0xc2   : > { %2271 = vmatprep.subr.bf16.mxu0 %v2415_v29  ;;  %1700 = vmatprep.mubr.bf16.mxu0 %v2416_v30 }
  0xc3   : > { %1749 = vmatprep.mubr.bf16.mxu1 %v2420_v33 }
  0xc5   : > { %2272 = vmatpush3.bf16.msra.mxu0 %v2415_v29 }
  0xc6   : > { %2273 = vmatprep.subr.bf16.mxu0 %v2419_v32 }
  0xc8   : > { %1701 = vmatmul.mubr.bf16.gmra.mrb[12].mxu0 %v2418_v31 }
  0xc9   : > { %2274 = vmatpush3.bf16.msra.mxu0 %v2419_v32  ;;  %1750 = vmatmul.mubr.bf16.gmra.mrb[12].mxu1 %v2422_v34 }
  0xca   : > { %2275 = vmatprep.subr.bf16.mxu0 %v2423_v35  ;;  %2285 = vmatprep.mubr.bf16.mxu0 %v2428_v37 }
  0xcd   : > { %2276 = vmatpush3.bf16.msra.mxu0 %v2423_v35 }
  0xce   : > { %2277 = vmatprep.subr.bf16.mxu0 %v2424_v36 }
  0xd1   : > { %2278 = vmatpush3.bf16.msra.mxu0 %v2424_v36 }
  0xd2   : > { %2279 = vmatprep.subr.bf16.mxu0 %v2425_v38 }
  0xd5   : > { %2280 = vmatpush3.bf16.msra.mxu0 %v2425_v38 }
  0xd6   : > { %2281 = vmatprep.subr.bf16.mxu0 %v2426_v39 }
  0xd9   : > { %2282 = vmatpush3.bf16.msra.mxu0 %v2426_v39  ;;  %v2122_v39 = vld [vmem:[%s868_s22] ss:$0 sm:$0xff] }
  0xda   : > { %2283 = vmatprep.subr.bf16.mxu0 %v2427_v40 }
  0xdd   : > { %2284 = vmatpush3.bf16.msra.mxu0 %v2427_v40 }
  0xe0   : > { %2286 = vmatmul.mubr.bf16.vlgmr.msra.gmra.mrb[16].mxu0 %v2429_v41 }
 0x173   : > { %v2163_v42 = vpop.f32.mrb[0].mxu0 }
 0x174   : > { %v2191_v43 = vpop.f32.mrb[0].mxu1  ;;  %v2164_v44 = vpop.f32.mrb[1].mxu0 }
 0x175   : > { %v2165_v45 = vadd.f32 %v2164_v44, %v2163_v42  ;;  %v2192_v46 = vpop.f32.mrb[1].mxu1  ;;  %v2166_v47 = vpop.f32.mrb[2].mxu0  ;;  %v2123_v42 = vld [vmem:[%s871_s27] ss:$0 sm:$0xff] }
 0x176   : > { %v2193_v48 = vadd.f32 %v2192_v46, %v2191_v43  ;;  %v2194_v49 = vpop.f32.mrb[2].mxu1  ;;  %v2167_v50 = vpop.f32.mrb[3].mxu0 }
 0x177   : > { %v2168_v51 = vadd.f32 %v2167_v50, %v2166_v47  ;;  %v2195_v52 = vpop.f32.mrb[3].mxu1 }
 0x178   : > { %v1646_v53 = vadd.f32 %v2193_v48, %v2165_v45  ;;  %v2196_v54 = vadd.f32 %v2195_v52, %v2194_v49 }
 0x17a   : > { %v1649_v55 = vadd.f32 %v2196_v54, %v2168_v51 }
 0x17b   : > { %v2169_v56 = vpop.f32.mrb[4].mxu0 }
 0x17c   : > { %v2197_v57 = vpop.f32.mrb[4].mxu1  ;;  %v2170_v58 = vpop.f32.mrb[5].mxu0 }
 0x17d   : > { %v2198_v59 = vpop.f32.mrb[5].mxu1  ;;  %v2171_v60 = vadd.f32 %v2170_v58, %v2169_v56  ;;  %v2172_v62 = vpop.f32.mrb[6].mxu0  ;;  %v2470_v56 = vmov 0.0  }
 0x17e   : > { %v2199_v61 = vadd.f32 %v2198_v59, %v2197_v57  ;;  %v2200_v63 = vpop.f32.mrb[6].mxu1  ;;  %v2173_v0 = vpop.f32.mrb[7].mxu0 }
 0x17f   : > { %v2201_v1 = vpop.f32.mrb[7].mxu1  ;;  %v2174_v3 = vadd.f32 %v2173_v0, %v2172_v62 }
 0x180   : > { %v1654_v2 = vadd.f32 %v2199_v61, %v2171_v60  ;;  %v2202_v4 = vadd.f32 %v2201_v1, %v2200_v63 }
 0x182   : > { %v1657_v5 = vadd.f32 %v2202_v4, %v2174_v3 }
 0x193   : > { %v2219_v6 = vpop.f32.mrb[8].mxu0 }
 0x194   : > { %v2220_v7 = vpop.f32.mrb[9].mxu0  ;;  %v2247_v10 = vpop.f32.mrb[8].mxu1 }
 0x195   : > { %v2221_v8 = vadd.f32 %v2220_v7, %v2219_v6  ;;  %v2222_v9 = vpop.f32.mrb[10].mxu0  ;;  %v2248_v14 = vpop.f32.mrb[9].mxu1 }
 0x196   : > { %v2223_v11 = vpop.f32.mrb[11].mxu0  ;;  %v2249_v15 = vadd.f32 %v2248_v14, %v2247_v10  ;;  %v2250_v16 = vpop.f32.mrb[10].mxu1 }
 0x197   : > { %v1695_v12 = vadd.f32 %v2221_v8, %v1646_v53  ;;  %v2224_v13 = vadd.f32 %v2223_v11, %v2222_v9  ;;  %v2251_v18 = vpop.f32.mrb[11].mxu1 }
 0x198   : > { %v2252_v19 = vadd.f32 %v2251_v18, %v2250_v16 }
 0x199   : > { %v1698_v17 = vadd.f32 %v2224_v13, %v1649_v55  ;;  %v1744_v20 = vadd.f32 %v2249_v15, %v1695_v12 }
 0x19b   : > { %v2225_v21 = vpop.f32.mrb[12].mxu0  ;;  %v1747_v23 = vadd.f32 %v2252_v19, %v1698_v17 }
 0x19c   : > { %v2226_v22 = vpop.f32.mrb[13].mxu0  ;;  %v2253_v26 = vpop.f32.mrb[12].mxu1 }
 0x19d   : > { %v2227_v24 = vadd.f32 %v2226_v22, %v2225_v21  ;;  %v2228_v25 = vpop.f32.mrb[14].mxu0  ;;  %v2254_v30 = vpop.f32.mrb[13].mxu1 }
 0x19e   : > { %v2229_v27 = vpop.f32.mrb[15].mxu0  ;;  %v2255_v31 = vadd.f32 %v2254_v30, %v2253_v26  ;;  %v2256_v32 = vpop.f32.mrb[14].mxu1 }
 0x19f   : > { %v1703_v28 = vadd.f32 %v2227_v24, %v1654_v2  ;;  %v2230_v29 = vadd.f32 %v2229_v27, %v2228_v25  ;;  %v2257_v34 = vpop.f32.mrb[15].mxu1 }
 0x1a0   : > { %v2258_v35 = vadd.f32 %v2257_v34, %v2256_v32 }
 0x1a1   : > { %v1706_v33 = vadd.f32 %v2230_v29, %v1657_v5  ;;  %v1752_v36 = vadd.f32 %v2255_v31, %v1703_v28 }
 0x1a3   : > { %v1755_v37 = vadd.f32 %v2258_v35, %v1706_v33 }
 0x1b3   : > { %v2287_v38 = vpop.f32.mrb[16].mxu0 }
 0x1b4   : > { %v1801_v40 = vadd.f32 %v2287_v38, %v1752_v36  ;;  %v1792_v41 = vpop.f32.mrb[17].mxu0 }
 0x1b5   : > { %v1793_v43 = vadd.f32 %v1792_v41, %v1744_v20  ;;  %v2288_v44 = vpop.f32.mrb[18].mxu0 }
 0x1b6   : > { %v1816_v45 = vmul.f32 %v2122_v39, %v1801_v40  ;;  %v1804_v46 = vadd.f32 %v2288_v44, %v1755_v37  ;;  %v1795_v47 = vpop.f32.mrb[19].mxu0 }
 0x1b7   : > { %v1814_v48 = vmul.f32 %v2122_v39, %v1793_v43  ;;  %v1796_v49 = vadd.f32 %v1795_v47, %v1747_v23 }
 0x1b8   : > { %v1827_v50 = vadd.f32 %v2123_v42, %v1816_v45  ;;  %v1817_v51 = vmul.f32 %v2122_v39, %v1804_v46 }
 0x1b9   : > { %v1825_v52 = vadd.f32 %v2123_v42, %v1814_v48  ;;  %v1815_v53 = vmul.f32 %v2122_v39, %v1796_v49 }
 0x1ba   : > { %vm1831_vm0 = vcmp.gt.f32.partialorder %v1827_v50, 1.0  ;;  %v1828_v54 = vadd.f32 %v2123_v42, %v1817_v51 }
 0x1bb   : > { %vm1829_vm1 = vcmp.gt.f32.partialorder %v1825_v52, 1.0  ;;  %v1826_v55 = vadd.f32 %v2123_v42, %v1815_v53  ;;  %v2126_v57 = vsel %vm1831_vm0, 1.0, %v2470_v56  ;;  %1867 = sbr.rel (!%p2531_p6) target bundleno = 459 (0x1cb), region = 81 }
 0x1bc   : > { %vm1832_vm2 = vcmp.gt.f32.partialorder %v1828_v54, 1.0  ;;  %v2124_v59 = vsel %vm1829_vm1, 1.0, %v2470_v56 }
 0x1bd   : > { %v2127_v58 = vsel %vm1832_vm2, 1.0, %v2470_v56  ;;  %vm1830_vm3 = vcmp.gt.f32.partialorder %v1826_v55, 1.0 }
 0x1be   : > { %v2144_v60 = vpack.c.bf16 %v2127_v58, %v2126_v57  ;;  %v2125_v61 = vsel %vm1830_vm3, 1.0, %v2470_v56 }
 0x1bf   : > { %v2141_v62 = vpack.c.bf16 %v2125_v61, %v2124_v59 }
 0x1c0   : > { %2146 = vst [vmem:[%s858_s29 + $0x8] sm:$0xff] %v2144_v60  }
 0x1c1   : > { %2142 = vst [vmem:[%s858_s29] sm:$0xff] %v2141_v62  }
 0x1c7   : > { %v1892_v1 = vld [vmem:[%s858_s29 + $0x8] sm:$0xf]  ;;  %v1894_v2 = vld [vmem:[%s858_s29 + $0xc] sm:$0xf] }
 0x1c8   : > { %v1888_v63 = vld [vmem:[%s858_s29] sm:$0xf]  ;;  %v1890_v0 = vld [vmem:[%s858_s29 + $0x4] sm:$0xf]  ;;  %1893 = vst [vmem:[%s1872_s5 + $0x10] sm:$0xf] %v1892_v1 }
 0x1c9   : > { %1889 = vst [vmem:[%s1872_s5] sm:$0xf] %v1888_v63  ;;  %1891 = vst [vmem:[%s1872_s5 + $0x8] sm:$0xf] %v1890_v0 }
 0x1ca   : > { %1895 = vst [vmem:[%s1872_s5 + $0x18] sm:$0xf] %v1894_v2 }
 0x1cb PF: > { %s14_s19 = sadd.s32 1, %s2468_s19   ;;  %s3006_s15 = smov %s2456_s16 }
 0x1cc   : > { %p11_p12 = scmp.ge.s32.totalorder %s14_s19, 4   ;;  %s3007_s16 = smov %s2536_s25 }
 0x1cd   : > { %s3008_s17 = smov %s2464_s18  ;;  %s3009_s18 = smov %s3011_s20 }
 0x1ce   :  { %13 = sbr.rel (!%p11_p12) target bundleno = 3 (0x3), region = 162 }

// kernel: yolo_simple_forward.10
= control target key start
LH: loop header
LB: loop body
LE: loop exit
PB: predicated region body
PF: predicated region fallthrough
CT: control target
= control target key end

     0   :  { %s2679_s15 = smov 0   ;;  %s2681_s16 = smov 0   ;;  %s3177_s0 = inlined_call_operand.vmem [shape: bf16[32,2304], index: 0, kind: input, shape index: {}]   ;;  %s3178_s1 = inlined_call_operand.vmem [shape: bf16[2304,128], index: 1, kind: input, shape index: {}]   ;;  %s3179_s2 = inlined_call_operand.vmem [shape: f32[1,128], index: 2, kind: input, shape index: {}]   ;;  %s3180_s3 = inlined_call_operand.vmem [shape: f32[1,128], index: 3, kind: input, shape index: {}]   ;;  %s3181_s4 = inlined_call_operand.vmem [shape: bf16[32,128], index: 4, kind: output, shape index: {}]  }
   0x1   :  { %s2683_s17 = smov 0  }
   0x2 LB: > { %s26_s18 = sadd.s32 1, %s2647_s16  ;;  %p2054_p0 = scmp.ge.s32.totalorder %s2651_s17, 1  ;;  %s2651_s17 = sphi %s2683_s17, %s14_s17   ;;  %s2647_s16 = sphi %s2681_s16, %s3183_s16   ;;  %s2643_s15 = sphi %s2679_s15, %s3182_s15  }
   0x3   : > { %p28_p1 = scmp.ge.s32.totalorder %s26_s18, 2  ;;  %p203_p2 = scmp.lt.s32.totalorder %s2651_s17, 3 }
   0x5   : > { %s3185_s18 = smov (%p28_p1, %s26_s18), 0  ;;  %p204_p3 = pnand %p2054_p0, %p203_p2 }
   0x6   : > { %v2458_v0 = vld [vmem:[%s3178_s1 + $0x40] sm:$0xff] (!%p204_p3)   ;;  %v2462_v4 = vld [vmem:[%s3178_s1 + $0x48] sm:$0xff] (!%p204_p3)   ;;  %v2466_v8 = vld [vmem:[%s3178_s1 + $0x50] sm:$0xff] (!%p204_p3)   ;;  %s2055_s27 = sshll.u32 (!%p204_p3), %s2643_s15, 1 }
   0x7   : > { %207 = sbr.rel (%p204_p3) target bundleno = 396 (0x18c), region = 36  ;;  %v2459_v1 = vld [vmem:[%s3178_s1 + $0xc0] sm:$0xff] (!%p204_p3)   ;;  %2234 = vmatprep.subr.bf16.mxu0 (!%p204_p3), %v2458_v0  ;;  %v2463_v5 = vld [vmem:[%s3178_s1 + $0xc8] sm:$0xff] (!%p204_p3)   ;;  %v2467_v9 = vld [vmem:[%s3178_s1 + $0xd0] sm:$0xff] (!%p204_p3)   ;;  %p244_p4 = scmp.lt.s32.totalorder (!%p204_p3), %s2055_s27, 3 }
   0x8   : > { %v2460_v2 = vld [vmem:[%s3178_s1] sm:$0xff] (!%p204_p3)   ;;  %2256 = vmatprep.subr.bf16.mxu1 (!%p204_p3), %v2459_v1  ;;  %v2464_v6 = vld [vmem:[%s3178_s1 + $0x8] sm:$0xff] (!%p204_p3)   ;;  %v2468_v10 = vld [vmem:[%s3178_s1 + $0x10] sm:$0xff] (!%p204_p3)  }
   0x9   : > { %v2461_v3 = vld [vmem:[%s3178_s1 + $0x80] sm:$0xff] (!%p204_p3)   ;;  %2235 = vmatpush3.bf16.msra.mxu0 (!%p204_p3), %v2460_v2  ;;  %v2465_v7 = vld [vmem:[%s3178_s1 + $0x88] sm:$0xff] (!%p204_p3)   ;;  %v2469_v11 = vld [vmem:[%s3178_s1 + $0x90] sm:$0xff] (!%p204_p3)  }
   0xa   : > { %2257 = vmatpush3.bf16.msra.mxu1 (!%p204_p3), %v2461_v3  ;;  %2236 = vmatprep.subr.bf16.mxu0 (!%p204_p3), %v2462_v4  ;;  %v2470_v12 = vld [vmem:[%s3178_s1 + $0x58] sm:$0xff] (!%p204_p3)   ;;  %v2474_v16 = vld [vmem:[%s3178_s1 + $0x60] sm:$0xff] (!%p204_p3)   ;;  %v2478_v20 = vld [vmem:[%s3178_s1 + $0x68] sm:$0xff] (!%p204_p3)  }
   0xb   : > { %2258 = vmatprep.subr.bf16.mxu1 (!%p204_p3), %v2463_v5  ;;  %v2471_v13 = vld [vmem:[%s3178_s1 + $0xd8] sm:$0xff] (!%p204_p3)   ;;  %v2475_v17 = vld [vmem:[%s3178_s1 + $0xe0] sm:$0xff] (!%p204_p3)   ;;  %v2479_v21 = vld [vmem:[%s3178_s1 + $0xe8] sm:$0xff] (!%p204_p3)  }
   0xc   : > { %v2472_v14 = vld [vmem:[%s3178_s1 + $0x18] sm:$0xff] (!%p204_p3)   ;;  %v2476_v18 = vld [vmem:[%s3178_s1 + $0x20] sm:$0xff] (!%p204_p3)   ;;  %v2480_v22 = vld [vmem:[%s3178_s1 + $0x28] sm:$0xff] (!%p204_p3)  }
   0xd   : > { %2237 = vmatpush3.bf16.msra.mxu0 (!%p204_p3), %v2464_v6  ;;  %v2473_v15 = vld [vmem:[%s3178_s1 + $0x98] sm:$0xff] (!%p204_p3)   ;;  %v2477_v19 = vld [vmem:[%s3178_s1 + $0xa0] sm:$0xff] (!%p204_p3)   ;;  %v2481_v23 = vld [vmem:[%s3178_s1 + $0xa8] sm:$0xff] (!%p204_p3)  }
   0xe   : > { %2259 = vmatpush3.bf16.msra.mxu1 %v2465_v7  ;;  %2238 = vmatprep.subr.bf16.mxu0 %v2466_v8  ;;  %s3187_s27 = smov (!%p244_p4, %s2055_s27), 3  ;;  %v2482_v24 = vld [vmem:[%s3178_s1 + $0x70] sm:$0xff]   ;;  %v2486_v28 = vld [vmem:[%s3178_s1 + $0x78] sm:$0xff]   ;;  %v2496_v36 = vld [vmem:[%s3178_s1 + $0x140] sm:$0xff]  }
   0xf   : > { %2260 = vmatprep.subr.bf16.mxu1 %v2467_v9  ;;  %v2483_v25 = vld [vmem:[%s3178_s1 + $0xf0] sm:$0xff]   ;;  %s2432_s28 = smul.u32 72, %s3187_s27  ;;  %v2487_v29 = vld [vmem:[%s3178_s1 + $0xf8] sm:$0xff]   ;;  %v2497_v37 = vld [vmem:[%s3178_s1 + $0x100] sm:$0xff]   ;;  %s2058_s13 = sshll.u32 %s3187_s27, 2 }
  0x10   : > { %v2484_v26 = vld [vmem:[%s3178_s1 + $0x30] sm:$0xff]   ;;  %v2488_v30 = vld [vmem:[%s3178_s1 + $0x38] sm:$0xff]   ;;  %v2498_v38 = vld [vmem:[%s3178_s1 + $0x1c0] sm:$0xff]   ;;  %s267_s20 = scalar_lea.vmem %s3181_s4, %s2058_s13 }
  0x11   : > { %2239 = vmatpush3.bf16.msra.mxu0 %v2468_v10  ;;  %v2485_v27 = vld [vmem:[%s3178_s1 + $0xb0] sm:$0xff]   ;;  %s2796_s12 = scalar_lea.vmem %s3177_s0, %s2432_s28  ;;  %v2489_v31 = vld [vmem:[%s3178_s1 + $0xb8] sm:$0xff]   ;;  %v2499_v39 = vld [vmem:[%s3178_s1 + $0x180] sm:$0xff]  }
  0x12   : > { %2261 = vmatpush3.bf16.msra.mxu1 %v2469_v11  ;;  %2240 = vmatprep.subr.bf16.mxu0 %v2470_v12  ;;  %v2490_v32 = vld [vmem:[%s2796_s12] ss:$72 sps:$4 sm:$0xff]   ;;  %v2492_v33 = vld [vmem:[%s2796_s12 + $0x4] ss:$72 sps:$4 sm:$0xff]   ;;  %v2504_v44 = vld [vmem:[%s3178_s1 + $0x150] sm:$0xff]  }
  0x13   : > { %2262 = vmatprep.subr.bf16.mxu1 %v2471_v13  ;;  %v2493_v34 = vld [vmem:[%s2796_s12 + $0x8] ss:$72 sps:$4 sm:$0xff]   ;;  %v2495_v35 = vld [vmem:[%s2796_s12 + $0xc] ss:$72 sps:$4 sm:$0xff]   ;;  %1562 = vmatprep.mubr.bf16.mxu0 %v2492_v33  ;;  %v2508_v48 = vld [vmem:[%s3178_s1 + $0x158] sm:$0xff]  }
  0x14   : > { %1603 = vmatprep.mubr.bf16.mxu1 %v2495_v35  ;;  %v2500_v40 = vld [vmem:[%s3178_s1 + $0x148] sm:$0xff]   ;;  %v2505_v45 = vld [vmem:[%s3178_s1 + $0x110] sm:$0xff]   ;;  %v2509_v49 = vld [vmem:[%s3178_s1 + $0x118] sm:$0xff]  }
  0x15   : > { %2241 = vmatpush3.bf16.msra.mxu0 %v2472_v14  ;;  %v2501_v41 = vld [vmem:[%s3178_s1 + $0x108] sm:$0xff]   ;;  %v2506_v46 = vld [vmem:[%s3178_s1 + $0x1d0] sm:$0xff]   ;;  %v2510_v50 = vld [vmem:[%s3178_s1 + $0x1d8] sm:$0xff]  }
  0x16   : > { %2263 = vmatpush3.bf16.msra.mxu1 %v2473_v15  ;;  %2242 = vmatprep.subr.bf16.mxu0 %v2474_v16  ;;  %v2502_v42 = vld [vmem:[%s3178_s1 + $0x1c8] sm:$0xff]   ;;  %v2507_v47 = vld [vmem:[%s3178_s1 + $0x190] sm:$0xff]   ;;  %v2511_v51 = vld [vmem:[%s3178_s1 + $0x198] sm:$0xff]  }
  0x17   : > { %2264 = vmatprep.subr.bf16.mxu1 %v2475_v17  ;;  %v2503_v43 = vld [vmem:[%s3178_s1 + $0x188] sm:$0xff]   ;;  %v2512_v52 = vld [vmem:[%s3178_s1 + $0x160] sm:$0xff]   ;;  %v2520_v60 = vld [vmem:[%s3178_s1 + $0x170] sm:$0xff]  }
  0x18   : > { %v2513_v53 = vld [vmem:[%s3178_s1 + $0x120] sm:$0xff]   ;;  %v2516_v56 = vld [vmem:[%s3178_s1 + $0x168] sm:$0xff]   ;;  %v2521_v61 = vld [vmem:[%s3178_s1 + $0x130] sm:$0xff]  }
  0x19   : > { %2243 = vmatpush3.bf16.msra.mxu0 %v2476_v18  ;;  %v2514_v54 = vld [vmem:[%s3178_s1 + $0x1e0] sm:$0xff]   ;;  %v2517_v57 = vld [vmem:[%s3178_s1 + $0x128] sm:$0xff]   ;;  %v2522_v62 = vld [vmem:[%s3178_s1 + $0x1f0] sm:$0xff]  }
  0x1a   : > { %2265 = vmatpush3.bf16.msra.mxu1 %v2477_v19  ;;  %2244 = vmatprep.subr.bf16.mxu0 %v2478_v20  ;;  %v2515_v55 = vld [vmem:[%s3178_s1 + $0x1a0] sm:$0xff]   ;;  %v2518_v58 = vld [vmem:[%s3178_s1 + $0x1e8] sm:$0xff]   ;;  %v2523_v63 = vld [vmem:[%s3178_s1 + $0x1b0] sm:$0xff]  }
  0x1b   : > { %2266 = vmatprep.subr.bf16.mxu1 %v2479_v21  ;;  %v2519_v59 = vld [vmem:[%s3178_s1 + $0x1a8] sm:$0xff]   ;;  %v2524_v0 = vld [vmem:[%s3178_s1 + $0x178] sm:$0xff]   ;;  %v2531_v6 = vld [vmem:[%s3178_s1 + $0x240] sm:$0xff]  }
  0x1c   : > { %v2525_v1 = vld [vmem:[%s3178_s1 + $0x138] sm:$0xff]   ;;  %v2535_v9 = vld [vmem:[%s3178_s1 + $0x200] sm:$0xff]   ;;  %v2538_v12 = vld [vmem:[%s3178_s1 + $0x248] sm:$0xff]  }
  0x1d   : > { %2245 = vmatpush3.bf16.msra.mxu0 %v2480_v22  ;;  %v2526_v2 = vld [vmem:[%s3178_s1 + $0x1f8] sm:$0xff]   ;;  %v2536_v10 = vld [vmem:[%s3178_s1 + $0x2c0] sm:$0xff]   ;;  %v2539_v13 = vld [vmem:[%s3178_s1 + $0x208] sm:$0xff]  }
  0x1e   : > { %2267 = vmatpush3.bf16.msra.mxu1 %v2481_v23  ;;  %2246 = vmatprep.subr.bf16.mxu0 %v2482_v24  ;;  %v2527_v3 = vld [vmem:[%s2796_s12 + $0x10] ss:$72 sps:$4 sm:$0xff]   ;;  %v2529_v4 = vld [vmem:[%s2796_s12 + $0x14] ss:$72 sps:$4 sm:$0xff]   ;;  %v2537_v11 = vld [vmem:[%s3178_s1 + $0x280] sm:$0xff]  }
  0x1f   : > { %2268 = vmatprep.subr.bf16.mxu1 %v2483_v25  ;;  %v2530_v5 = vld [vmem:[%s3178_s1 + $0x1b8] sm:$0xff]   ;;  %v2540_v14 = vld [vmem:[%s3178_s1 + $0x2c8] sm:$0xff]   ;;  %v2542_v16 = vld [vmem:[%s3178_s1 + $0x250] sm:$0xff]  }
  0x20   : > { %v2532_v7 = vld [vmem:[%s2796_s12 + $0x18] ss:$72 sps:$4 sm:$0xff]   ;;  %v2534_v8 = vld [vmem:[%s2796_s12 + $0x1c] ss:$72 sps:$4 sm:$0xff]   ;;  %v2541_v15 = vld [vmem:[%s3178_s1 + $0x288] sm:$0xff]  }
  0x21   : > { %2247 = vmatpush3.bf16.msra.mxu0 %v2484_v26  ;;  %v2543_v17 = vld [vmem:[%s3178_s1 + $0x210] sm:$0xff]   ;;  %v2546_v20 = vld [vmem:[%s3178_s1 + $0x258] sm:$0xff]   ;;  %v2550_v24 = vld [vmem:[%s3178_s1 + $0x260] sm:$0xff]  }
  0x22   : > { %2269 = vmatpush3.bf16.msra.mxu1 %v2485_v27  ;;  %2248 = vmatprep.subr.bf16.mxu0 %v2486_v28  ;;  %v2544_v18 = vld [vmem:[%s3178_s1 + $0x2d0] sm:$0xff]   ;;  %v2547_v21 = vld [vmem:[%s3178_s1 + $0x218] sm:$0xff]   ;;  %v2551_v25 = vld [vmem:[%s3178_s1 + $0x220] sm:$0xff]  }
  0x23   : > { %2270 = vmatprep.subr.bf16.mxu1 %v2487_v29  ;;  %v2545_v19 = vld [vmem:[%s3178_s1 + $0x290] sm:$0xff]   ;;  %v2548_v22 = vld [vmem:[%s3178_s1 + $0x2d8] sm:$0xff]   ;;  %v2552_v26 = vld [vmem:[%s3178_s1 + $0x2e0] sm:$0xff]  }
  0x24   : > { %v2549_v23 = vld [vmem:[%s3178_s1 + $0x298] sm:$0xff]   ;;  %v2553_v27 = vld [vmem:[%s3178_s1 + $0x2a0] sm:$0xff]   ;;  %v2554_v28 = vld [vmem:[%s3178_s1 + $0x268] sm:$0xff]  }
  0x25   : > { %2249 = vmatpush3.bf16.msra.mxu0 %v2488_v30  ;;  %v2555_v29 = vld [vmem:[%s3178_s1 + $0x228] sm:$0xff]   ;;  %v2559_v33 = vld [vmem:[%s3178_s1 + $0x230] sm:$0xff]  }
  0x26   : > { %2271 = vmatpush3.bf16.msra.mxu1 %v2489_v31  ;;  %2278 = vmatprep.subr.bf16.mxu0 %v2496_v36  ;;  %v2556_v30 = vld [vmem:[%s3178_s1 + $0x2e8] sm:$0xff]   ;;  %v2561_v35 = vld [vmem:[%s3178_s1 + $0x2b0] sm:$0xff]   ;;  %v2562_v36 = vld [vmem:[%s3178_s1 + $0x278] sm:$0xff]  }
  0x27   : > { %2300 = vmatprep.subr.bf16.mxu1 %v2498_v38  ;;  %v2557_v31 = vld [vmem:[%s3178_s1 + $0x2a8] sm:$0xff]   ;;  %v2564_v38 = vld [vmem:[%s3178_s1 + $0x2f8] sm:$0xff]  }
  0x28   : > { %1563 = vmatmul.mubr.bf16.vlgmr.msra.gmra.mrb[0].mxu0 %v2490_v32  ;;  %v2558_v32 = vld [vmem:[%s3178_s1 + $0x270] sm:$0xff]  }
  0x29   : > { %1604 = vmatmul.mubr.bf16.vlgmr.msra.gmra.mrb[0].mxu1 %v2493_v34  ;;  %2279 = vmatpush3.bf16.msra.mxu0 %v2497_v37  ;;  %v2560_v34 = vld [vmem:[%s3178_s1 + $0x2f0] sm:$0xff]   ;;  %v2563_v37 = vld [vmem:[%s3178_s1 + $0x238] sm:$0xff]  }
  0x2a   : > { %2301 = vmatpush3.bf16.msra.mxu1 %v2499_v39  ;;  %2280 = vmatprep.subr.bf16.mxu0 %v2500_v40  ;;  %v2565_v39 = vld [vmem:[%s2796_s12 + $0x20] ss:$72 sps:$4 sm:$0xff]   ;;  %v2567_v40 = vld [vmem:[%s2796_s12 + $0x24] ss:$72 sps:$4 sm:$0xff]  }
  0x2b   : > { %2302 = vmatprep.subr.bf16.mxu1 %v2502_v42  ;;  %1644 = vmatprep.mubr.bf16.mxu0 %v2529_v4  ;;  %v2569_v42 = vld [vmem:[%s3178_s1 + $0x340] sm:$0xff]   ;;  %v2596_v4 = vld [vmem:[%s3178_s1 + $0x370] sm:$0xff]  }
  0x2c   : > { %1685 = vmatprep.mubr.bf16.mxu1 %v2534_v8  ;;  %v2600_v8 = vld [vmem:[%s3178_s1 + $0x378] sm:$0xff]  }
  0x2d   : > { %2281 = vmatpush3.bf16.msra.mxu0 %v2501_v41  ;;  %v2568_v41 = vld [vmem:[%s3178_s1 + $0x2b8] sm:$0xff]  }
  0x2e   : > { %2303 = vmatpush3.bf16.msra.mxu1 %v2503_v43  ;;  %2282 = vmatprep.subr.bf16.mxu0 %v2504_v44  ;;  %v2570_v43 = vld [vmem:[%s2796_s12 + $0x28] ss:$72 sps:$4 sm:$0xff]   ;;  %v2572_v44 = vld [vmem:[%s2796_s12 + $0x2c] ss:$72 sps:$4 sm:$0xff]  }
  0x2f   : > { %2304 = vmatprep.subr.bf16.mxu1 %v2506_v46  ;;  %v2574_v46 = vld [vmem:[%s3178_s1 + $0x3c0] sm:$0xff]  }
  0x31   : > { %2283 = vmatpush3.bf16.msra.mxu0 %v2505_v45  ;;  %v2573_v45 = vld [vmem:[%s3178_s1 + $0x300] sm:$0xff]  }
  0x32   : > { %2305 = vmatpush3.bf16.msra.mxu1 %v2507_v47  ;;  %2284 = vmatprep.subr.bf16.mxu0 %v2508_v48  ;;  %v2575_v47 = vld [vmem:[%s3178_s1 + $0x380] sm:$0xff]   ;;  %v2576_v48 = vld [vmem:[%s3178_s1 + $0x348] sm:$0xff]  }
  0x33   : > { %2306 = vmatprep.subr.bf16.mxu1 %v2510_v50  ;;  %v2578_v50 = vld [vmem:[%s3178_s1 + $0x3c8] sm:$0xff]  }
  0x35   : > { %2285 = vmatpush3.bf16.msra.mxu0 %v2509_v49  ;;  %v2577_v49 = vld [vmem:[%s3178_s1 + $0x308] sm:$0xff]  }
  0x36   : > { %2307 = vmatpush3.bf16.msra.mxu1 %v2511_v51  ;;  %2286 = vmatprep.subr.bf16.mxu0 %v2512_v52  ;;  %v2579_v51 = vld [vmem:[%s3178_s1 + $0x388] sm:$0xff]   ;;  %v2580_v52 = vld [vmem:[%s3178_s1 + $0x350] sm:$0xff]  }
  0x37   : > { %2308 = vmatprep.subr.bf16.mxu1 %v2514_v54  ;;  %v2582_v54 = vld [vmem:[%s3178_s1 + $0x3d0] sm:$0xff]  }
  0x39   : > { %2287 = vmatpush3.bf16.msra.mxu0 %v2513_v53  ;;  %v2581_v53 = vld [vmem:[%s3178_s1 + $0x310] sm:$0xff]  }
  0x3a   : > { %2309 = vmatpush3.bf16.msra.mxu1 %v2515_v55  ;;  %2288 = vmatprep.subr.bf16.mxu0 %v2516_v56  ;;  %v2583_v55 = vld [vmem:[%s3178_s1 + $0x390] sm:$0xff]   ;;  %v2584_v56 = vld [vmem:[%s3178_s1 + $0x358] sm:$0xff]  }
  0x3b   : > { %2310 = vmatprep.subr.bf16.mxu1 %v2518_v58  ;;  %v2586_v58 = vld [vmem:[%s3178_s1 + $0x3d8] sm:$0xff]  }
  0x3d   : > { %2289 = vmatpush3.bf16.msra.mxu0 %v2517_v57  ;;  %v2585_v57 = vld [vmem:[%s3178_s1 + $0x318] sm:$0xff]  }
  0x3e   : > { %2311 = vmatpush3.bf16.msra.mxu1 %v2519_v59  ;;  %2290 = vmatprep.subr.bf16.mxu0 %v2520_v60  ;;  %v2587_v59 = vld [vmem:[%s3178_s1 + $0x398] sm:$0xff]   ;;  %v2588_v60 = vld [vmem:[%s3178_s1 + $0x360] sm:$0xff]  }
  0x3f   : > { %2312 = vmatprep.subr.bf16.mxu1 %v2522_v62  ;;  %v2590_v62 = vld [vmem:[%s3178_s1 + $0x3e0] sm:$0xff]  }
  0x41   : > { %2291 = vmatpush3.bf16.msra.mxu0 %v2521_v61  ;;  %v2589_v61 = vld [vmem:[%s3178_s1 + $0x320] sm:$0xff]  }
  0x42   : > { %2313 = vmatpush3.bf16.msra.mxu1 %v2523_v63  ;;  %2292 = vmatprep.subr.bf16.mxu0 %v2524_v0  ;;  %v2591_v63 = vld [vmem:[%s3178_s1 + $0x3a0] sm:$0xff]   ;;  %v2592_v0 = vld [vmem:[%s3178_s1 + $0x368] sm:$0xff]  }
  0x43   : > { %2314 = vmatprep.subr.bf16.mxu1 %v2526_v2  ;;  %v2594_v2 = vld [vmem:[%s3178_s1 + $0x3e8] sm:$0xff]  }
  0x45   : > { %2293 = vmatpush3.bf16.msra.mxu0 %v2525_v1  ;;  %v2593_v1 = vld [vmem:[%s3178_s1 + $0x328] sm:$0xff]  }
  0x46   : > { %2315 = vmatpush3.bf16.msra.mxu1 %v2530_v5  ;;  %2322 = vmatprep.subr.bf16.mxu0 %v2531_v6  ;;  %v2597_v5 = vld [vmem:[%s3178_s1 + $0x330] sm:$0xff]  }
  0x47   : > { %2344 = vmatprep.subr.bf16.mxu1 %v2536_v10  ;;  %v2598_v6 = vld [vmem:[%s3178_s1 + $0x3f0] sm:$0xff]   ;;  %v2602_v10 = vld [vmem:[%s3178_s1 + $0x3f8] sm:$0xff]  }
  0x48   : > { %1645 = vmatmul.mubr.bf16.vlgmr.msra.gmra.mrb[4].mxu0 %v2527_v3  ;;  %v2595_v3 = vld [vmem:[%s3178_s1 + $0x3a8] sm:$0xff]  }
  0x49   : > { %2323 = vmatpush3.bf16.msra.mxu0 %v2535_v9  ;;  %1686 = vmatmul.mubr.bf16.vlgmr.msra.gmra.mrb[4].mxu1 %v2532_v7  ;;  %v2599_v7 = vld [vmem:[%s3178_s1 + $0x3b0] sm:$0xff]   ;;  %v2601_v9 = vld [vmem:[%s3178_s1 + $0x338] sm:$0xff]  }
  0x4a   : > { %2345 = vmatpush3.bf16.msra.mxu1 %v2537_v11  ;;  %2324 = vmatprep.subr.bf16.mxu0 %v2538_v12  ;;  %v2603_v11 = vld [vmem:[%s2796_s12 + $0x30] ss:$72 sps:$4 sm:$0xff]   ;;  %v2605_v12 = vld [vmem:[%s2796_s12 + $0x34] ss:$72 sps:$4 sm:$0xff]  }
  0x4b   : > { %2346 = vmatprep.subr.bf16.mxu1 %v2540_v14  ;;  %1726 = vmatprep.mubr.bf16.mxu0 %v2567_v40  ;;  %v2607_v14 = vld [vmem:[%s3178_s1 + $0x440] sm:$0xff]  }
  0x4c   : > { %1767 = vmatprep.mubr.bf16.mxu1 %v2572_v44 }
  0x4d   : > { %2325 = vmatpush3.bf16.msra.mxu0 %v2539_v13  ;;  %v2606_v13 = vld [vmem:[%s3178_s1 + $0x3b8] sm:$0xff]  }
  0x4e   : > { %2347 = vmatpush3.bf16.msra.mxu1 %v2541_v15  ;;  %2326 = vmatprep.subr.bf16.mxu0 %v2542_v16  ;;  %v2608_v15 = vld [vmem:[%s2796_s12 + $0x38] ss:$72 sps:$4 sm:$0xff]   ;;  %v2610_v16 = vld [vmem:[%s2796_s12 + $0x3c] ss:$72 sps:$4 sm:$0xff]  }
  0x4f   : > { %2348 = vmatprep.subr.bf16.mxu1 %v2544_v18  ;;  %v2612_v18 = vld [vmem:[%s3178_s1 + $0x448] sm:$0xff]  }
  0x51   : > { %2327 = vmatpush3.bf16.msra.mxu0 %v2543_v17  ;;  %v2611_v17 = vld [vmem:[%s3178_s1 + $0x400] sm:$0xff]  }
  0x52   : > { %2349 = vmatpush3.bf16.msra.mxu1 %v2545_v19  ;;  %2328 = vmatprep.subr.bf16.mxu0 %v2546_v20  ;;  %v2613_v19 = vld [vmem:[%s3178_s1 + $0x408] sm:$0xff]   ;;  %v2614_v20 = vld [vmem:[%s3178_s1 + $0x450] sm:$0xff]  }
  0x53   : > { %2350 = vmatprep.subr.bf16.mxu1 %v2548_v22  ;;  %v2616_v22 = vld [vmem:[%s3178_s1 + $0x458] sm:$0xff]  }
  0x55   : > { %2329 = vmatpush3.bf16.msra.mxu0 %v2547_v21  ;;  %v2615_v21 = vld [vmem:[%s3178_s1 + $0x410] sm:$0xff]  }
  0x56   : > { %2351 = vmatpush3.bf16.msra.mxu1 %v2549_v23  ;;  %2330 = vmatprep.subr.bf16.mxu0 %v2550_v24  ;;  %v2617_v23 = vld [vmem:[%s3178_s1 + $0x418] sm:$0xff]   ;;  %v2618_v24 = vld [vmem:[%s3178_s1 + $0x460] sm:$0xff]  }
  0x57   : > { %2352 = vmatprep.subr.bf16.mxu1 %v2552_v26  ;;  %v2620_v26 = vld [vmem:[%s3178_s1 + $0x468] sm:$0xff]  }
  0x59   : > { %2331 = vmatpush3.bf16.msra.mxu0 %v2551_v25  ;;  %v2619_v25 = vld [vmem:[%s3178_s1 + $0x420] sm:$0xff]  }
  0x5a   : > { %2353 = vmatpush3.bf16.msra.mxu1 %v2553_v27  ;;  %2332 = vmatprep.subr.bf16.mxu0 %v2554_v28  ;;  %v2628_v27 = vld [vmem:[%s2796_s12 + $0x44] ss:$72 sps:$4 sm:$0xff]  }
  0x5b   : > { %2354 = vmatprep.subr.bf16.mxu1 %v2556_v30  ;;  %v2621_v28 = vld [vmem:[%s3178_s1 + $0x428] sm:$0xff]   ;;  %v2623_v30 = vld [vmem:[%s3178_s1 + $0x430] sm:$0xff]  }
  0x5d   : > { %2333 = vmatpush3.bf16.msra.mxu0 %v2555_v29  ;;  %v2622_v29 = vld [vmem:[%s3178_s1 + $0x470] sm:$0xff]  }
  0x5e   : > { %2355 = vmatpush3.bf16.msra.mxu1 %v2557_v31  ;;  %2334 = vmatprep.subr.bf16.mxu0 %v2558_v32  ;;  %v2624_v31 = vld [vmem:[%s3178_s1 + $0x478] sm:$0xff]  }
  0x5f   : > { %2356 = vmatprep.subr.bf16.mxu1 %v2560_v34  ;;  %v2625_v32 = vld [vmem:[%s3178_s1 + $0x438] sm:$0xff]  }
  0x61   : > { %2335 = vmatpush3.bf16.msra.mxu0 %v2559_v33  ;;  %v2626_v33 = vld [vmem:[%s2796_s12 + $0x40] ss:$72 sps:$4 sm:$0xff]  }
  0x62   : > { %2357 = vmatpush3.bf16.msra.mxu1 %v2561_v35  ;;  %2336 = vmatprep.subr.bf16.mxu0 %v2562_v36 }
  0x63   : > { %2358 = vmatprep.subr.bf16.mxu1 %v2564_v38 }
  0x65   : > { %2337 = vmatpush3.bf16.msra.mxu0 %v2563_v37 }
  0x66   : > { %2359 = vmatpush3.bf16.msra.mxu1 %v2568_v41  ;;  %2366 = vmatprep.subr.bf16.mxu0 %v2569_v42 }
  0x67   : > { %2388 = vmatprep.subr.bf16.mxu1 %v2574_v46 }
  0x68   : > { %1727 = vmatmul.mubr.bf16.vlgmr.msra.gmra.mrb[8].mxu0 %v2565_v39 }
  0x69   : > { %2367 = vmatpush3.bf16.msra.mxu0 %v2573_v45  ;;  %1768 = vmatmul.mubr.bf16.vlgmr.msra.gmra.mrb[8].mxu1 %v2570_v43 }
  0x6a   : > { %2389 = vmatpush3.bf16.msra.mxu1 %v2575_v47  ;;  %2368 = vmatprep.subr.bf16.mxu0 %v2576_v48 }
  0x6b   : > { %2390 = vmatprep.subr.bf16.mxu1 %v2578_v50  ;;  %1808 = vmatprep.mubr.bf16.mxu0 %v2605_v12 }
  0x6c   : > { %1849 = vmatprep.mubr.bf16.mxu1 %v2610_v16 }
  0x6d   : > { %2369 = vmatpush3.bf16.msra.mxu0 %v2577_v49 }
  0x6e   : > { %2391 = vmatpush3.bf16.msra.mxu1 %v2579_v51  ;;  %2370 = vmatprep.subr.bf16.mxu0 %v2580_v52 }
  0x6f   : > { %2392 = vmatprep.subr.bf16.mxu1 %v2582_v54 }
  0x71   : > { %2371 = vmatpush3.bf16.msra.mxu0 %v2581_v53 }
  0x72   : > { %2393 = vmatpush3.bf16.msra.mxu1 %v2583_v55  ;;  %2372 = vmatprep.subr.bf16.mxu0 %v2584_v56 }
  0x73   : > { %2394 = vmatprep.subr.bf16.mxu1 %v2586_v58 }
  0x75   : > { %2373 = vmatpush3.bf16.msra.mxu0 %v2585_v57 }
  0x76   : > { %2395 = vmatpush3.bf16.msra.mxu1 %v2587_v59  ;;  %2374 = vmatprep.subr.bf16.mxu0 %v2588_v60 }
  0x77   : > { %2396 = vmatprep.subr.bf16.mxu1 %v2590_v62 }
  0x79   : > { %2375 = vmatpush3.bf16.msra.mxu0 %v2589_v61 }
  0x7a   : > { %2397 = vmatpush3.bf16.msra.mxu1 %v2591_v63  ;;  %2376 = vmatprep.subr.bf16.mxu0 %v2592_v0 }
  0x7b   : > { %2398 = vmatprep.subr.bf16.mxu1 %v2594_v2 }
  0x7d   : > { %2377 = vmatpush3.bf16.msra.mxu0 %v2593_v1 }
  0x7e   : > { %2399 = vmatpush3.bf16.msra.mxu1 %v2595_v3  ;;  %2378 = vmatprep.subr.bf16.mxu0 %v2596_v4 }
  0x7f   : > { %2400 = vmatprep.subr.bf16.mxu1 %v2598_v6 }
  0x81   : > { %2379 = vmatpush3.bf16.msra.mxu0 %v2597_v5 }
  0x82   : > { %2401 = vmatpush3.bf16.msra.mxu1 %v2599_v7  ;;  %2380 = vmatprep.subr.bf16.mxu0 %v2600_v8 }
  0x83   : > { %2402 = vmatprep.subr.bf16.mxu1 %v2602_v10 }
  0x85   : > { %2381 = vmatpush3.bf16.msra.mxu0 %v2601_v9 }
  0x86   : > { %2403 = vmatpush3.bf16.msra.mxu1 %v2606_v13  ;;  %2410 = vmatprep.subr.bf16.mxu0 %v2607_v14 }
  0x88   : > { %1809 = vmatmul.mubr.bf16.vlgmr.msra.gmra.mrb[12].mxu0 %v2603_v11 }
  0x89   : > { %2411 = vmatpush3.bf16.msra.mxu0 %v2611_v17  ;;  %1850 = vmatmul.mubr.bf16.vlgmr.msra.gmra.mrb[12].mxu1 %v2608_v15 }
  0x8a   : > { %2412 = vmatprep.subr.bf16.mxu0 %v2612_v18  ;;  %1890 = vmatprep.mubr.bf16.mxu0 %v2628_v27 }
  0x8d   : > { %2413 = vmatpush3.bf16.msra.mxu0 %v2613_v19 }
  0x8e   : > { %2414 = vmatprep.subr.bf16.mxu0 %v2614_v20 }
  0x91   : > { %2415 = vmatpush3.bf16.msra.mxu0 %v2615_v21 }
  0x92   : > { %2416 = vmatprep.subr.bf16.mxu0 %v2616_v22 }
  0x95   : > { %2417 = vmatpush3.bf16.msra.mxu0 %v2617_v23 }
  0x96   : > { %2418 = vmatprep.subr.bf16.mxu0 %v2618_v24 }
  0x99   : > { %2419 = vmatpush3.bf16.msra.mxu0 %v2619_v25 }
  0x9a   : > { %2420 = vmatprep.subr.bf16.mxu0 %v2620_v26 }
  0x9d   : > { %2421 = vmatpush3.bf16.msra.mxu0 %v2621_v28 }
  0x9e   : > { %2422 = vmatprep.subr.bf16.mxu0 %v2622_v29 }
  0xa1   : > { %2423 = vmatpush3.bf16.msra.mxu0 %v2623_v30 }
  0xa2   : > { %2424 = vmatprep.subr.bf16.mxu0 %v2624_v31 }
  0xa5   : > { %2425 = vmatpush3.bf16.msra.mxu0 %v2625_v32 }
  0xa8   : > { %1891 = vmatmul.mubr.bf16.vlgmr.msra.gmra.mrb[16].mxu0 %v2626_v33 }
  0xfb   : > { %v2250_v34 = vpop.f32.mrb[0].mxu0 }
  0xfc   : > { %v2272_v35 = vpop.f32.mrb[0].mxu1  ;;  %v2251_v36 = vpop.f32.mrb[1].mxu0 }
  0xfd   : > { %v2252_v37 = vadd.f32 %v2251_v36, %v2250_v34  ;;  %v2273_v38 = vpop.f32.mrb[1].mxu1  ;;  %v2253_v39 = vpop.f32.mrb[2].mxu0  ;;  %v2221_v36 = vld [vmem:[%s3179_s2] ss:$0 sm:$0xff] }
  0xfe   : > { %v2274_v40 = vadd.f32 %v2273_v38, %v2272_v35  ;;  %v2275_v41 = vpop.f32.mrb[2].mxu1  ;;  %v2254_v42 = vpop.f32.mrb[3].mxu0 }
  0xff   : > { %v2255_v43 = vadd.f32 %v2254_v42, %v2253_v39  ;;  %v2276_v44 = vpop.f32.mrb[3].mxu1 }
 0x100   : > { %v1606_v45 = vadd.f32 %v2274_v40, %v2252_v37  ;;  %v2277_v46 = vadd.f32 %v2276_v44, %v2275_v41  ;;  %v2222_v40 = vld [vmem:[%s3180_s3] ss:$0 sm:$0xff] }
 0x102   : > { %v1609_v47 = vadd.f32 %v2277_v46, %v2255_v43  ;;  %v2653_v46 = vmov 0.0  }
 0x11b   : > { %v2294_v48 = vpop.f32.mrb[4].mxu0 }
 0x11c   : > { %v2295_v49 = vpop.f32.mrb[5].mxu0  ;;  %v2316_v54 = vpop.f32.mrb[4].mxu1 }
 0x11d   : > { %v2296_v50 = vadd.f32 %v2295_v49, %v2294_v48  ;;  %v2297_v51 = vpop.f32.mrb[6].mxu0  ;;  %v2317_v56 = vpop.f32.mrb[5].mxu1 }
 0x11e   : > { %v2298_v52 = vpop.f32.mrb[7].mxu0  ;;  %v2318_v58 = vadd.f32 %v2317_v56, %v2316_v54  ;;  %v2319_v59 = vpop.f32.mrb[6].mxu1 }
 0x11f   : > { %v1647_v53 = vadd.f32 %v2296_v50, %v1606_v45  ;;  %v2299_v55 = vadd.f32 %v2298_v52, %v2297_v51  ;;  %v2320_v60 = vpop.f32.mrb[7].mxu1 }
 0x120   : > { %v2321_v62 = vadd.f32 %v2320_v60, %v2319_v59 }
 0x121   : > { %v1650_v57 = vadd.f32 %v2299_v55, %v1609_v47  ;;  %v1688_v61 = vadd.f32 %v2318_v58, %v1647_v53 }
 0x123   : > { %v1691_v63 = vadd.f32 %v2321_v62, %v1650_v57 }
 0x13b   : > { %v2338_v0 = vpop.f32.mrb[8].mxu0 }
 0x13c   : > { %v2339_v1 = vpop.f32.mrb[9].mxu0  ;;  %v2360_v4 = vpop.f32.mrb[8].mxu1 }
 0x13d   : > { %v2340_v2 = vadd.f32 %v2339_v1, %v2338_v0  ;;  %v2341_v3 = vpop.f32.mrb[10].mxu0  ;;  %v2361_v8 = vpop.f32.mrb[9].mxu1 }
 0x13e   : > { %v2342_v5 = vpop.f32.mrb[11].mxu0  ;;  %v2362_v9 = vadd.f32 %v2361_v8, %v2360_v4  ;;  %v2363_v10 = vpop.f32.mrb[10].mxu1 }
 0x13f   : > { %v1729_v6 = vadd.f32 %v2340_v2, %v1688_v61  ;;  %v2343_v7 = vadd.f32 %v2342_v5, %v2341_v3  ;;  %v2364_v12 = vpop.f32.mrb[11].mxu1 }
 0x140   : > { %v2365_v14 = vadd.f32 %v2364_v12, %v2363_v10 }
 0x141   : > { %v1732_v11 = vadd.f32 %v2343_v7, %v1691_v63  ;;  %v1770_v13 = vadd.f32 %v2362_v9, %v1729_v6 }
 0x143   : > { %v1773_v15 = vadd.f32 %v2365_v14, %v1732_v11 }
 0x15b   : > { %v2382_v16 = vpop.f32.mrb[12].mxu0 }
 0x15c   : > { %v2383_v17 = vpop.f32.mrb[13].mxu0  ;;  %v2404_v20 = vpop.f32.mrb[12].mxu1 }
 0x15d   : > { %v2384_v18 = vadd.f32 %v2383_v17, %v2382_v16  ;;  %v2385_v19 = vpop.f32.mrb[14].mxu0  ;;  %v2405_v24 = vpop.f32.mrb[13].mxu1 }
 0x15e   : > { %v2386_v21 = vpop.f32.mrb[15].mxu0  ;;  %v2406_v25 = vadd.f32 %v2405_v24, %v2404_v20  ;;  %v2407_v26 = vpop.f32.mrb[14].mxu1 }
 0x15f   : > { %v1811_v22 = vadd.f32 %v2384_v18, %v1770_v13  ;;  %v2387_v23 = vadd.f32 %v2386_v21, %v2385_v19  ;;  %v2408_v28 = vpop.f32.mrb[15].mxu1 }
 0x160   : > { %v2409_v30 = vadd.f32 %v2408_v28, %v2407_v26 }
 0x161   : > { %v1814_v27 = vadd.f32 %v2387_v23, %v1773_v15  ;;  %v1852_v29 = vadd.f32 %v2406_v25, %v1811_v22 }
 0x163   : > { %v1855_v31 = vadd.f32 %v2409_v30, %v1814_v27 }
 0x17b   : > { %v2426_v32 = vpop.f32.mrb[16].mxu0 }
 0x17c   : > { %v2427_v33 = vpop.f32.mrb[17].mxu0 }
 0x17d   : > { %v2428_v34 = vadd.f32 %v2427_v33, %v2426_v32  ;;  %v2429_v35 = vpop.f32.mrb[18].mxu0 }
 0x17e   : > { %v2430_v37 = vpop.f32.mrb[19].mxu0 }
 0x17f   : > { %v1893_v38 = vadd.f32 %v2428_v34, %v1852_v29  ;;  %v2431_v39 = vadd.f32 %v2430_v37, %v2429_v35 }
 0x181   : > { %v1906_v41 = vmul.f32 %v2221_v36, %v1893_v38  ;;  %v1896_v42 = vadd.f32 %v2431_v39, %v1855_v31 }
 0x183   : > { %v1915_v43 = vadd.f32 %v2222_v40, %v1906_v41  ;;  %v1907_v44 = vmul.f32 %v2221_v36, %v1896_v42 }
 0x185   : > { %vm1917_vm0 = vcmp.gt.f32.partialorder %v1915_v43, 1.0  ;;  %v1916_v45 = vadd.f32 %v2222_v40, %v1907_v44 }
 0x186   : > { %v2223_v47 = vsel %vm1917_vm0, 1.0, %v2653_v46 }
 0x187   : > { %vm1918_vm1 = vcmp.gt.f32.partialorder %v1916_v45, 1.0 }
 0x188   : > { %v2224_v48 = vsel %vm1918_vm1, 1.0, %v2653_v46 }
 0x189   : > { %v2232_v49 = vpack.c.bf16 %v2224_v48, %v2223_v47 }
 0x18b   : > { %2233 = vst [vmem:[%s267_s20] sm:$0xff] %v2232_v49  }
 0x18c PF: > { %s14_s17 = sadd.s32 1, %s2651_s17   ;;  %s3182_s15 = smov %s2647_s16 }
 0x18d   : > { %p11_p5 = scmp.ge.s32.totalorder %s14_s17, 4   ;;  %s3183_s16 = smov %s3185_s18 }
 0x18f   :  { %13 = sbr.rel (!%p11_p5) target bundleno = 2 (0x2), region = 75 }

</bundles_post_ra>
